<compile_context>
chip_gen: v7x
topology: tpu7x:2x2x1
jax: 0.10.0
libtpu: 0.0.40
codegen_flags: <defaults>
</compile_context>

<pallas_src>
import functools

import jax
import jax.numpy as jnp
from jax.experimental import pallas as pl
from jax.experimental.pallas import tpu as pltpu


def _round_up(x, m):
  return ((x + m - 1) // m) * m


# ----------------------------------------------------------------------------
# Pass 1: aux head + conv3x3 (halo assembled in VMEM) + online SpatialGather.
# ----------------------------------------------------------------------------
def _ocr_pass1_kernel(body_ref, halo_ref,
                      w_aux1_ref, b_aux1_ref, w_aux2_ref, b_aux2_ref,
                      w3_ref, b3_ref,
                      out_aux_ref, feats_ref, ctxnum_ref, m_ref, den_ref,
                      xext_ref,
                      *, tile_rows, width, single_matmul):
  f32, bf16 = jnp.float32, jnp.bfloat16
  TH, W = tile_rows, width
  THW = TH * W
  t = pl.program_id(2)

  body = body_ref[0]                                  # (TH, W+2, Cin) bf16
  cin = body.shape[-1]

  # ---- aux_head: conv1x1+BN+ReLU, then conv1x1 (class dim padded to 8k) ----
  xc = body[:, 1:W + 1, :].reshape(THW, cin)
  h = jnp.maximum(
      jnp.dot(xc, w_aux1_ref[...], preferred_element_type=f32) + b_aux1_ref[...],
      0.0)
  logits = (jnp.dot(h.astype(bf16), w_aux2_ref[...], preferred_element_type=f32)
            + b_aux2_ref[...])                        # (THW, K) f32

  # ---- assemble the row-halo tile in VMEM (only 2 halo rows come from HBM) ----
  halo = halo_ref[...].reshape(2, W + 2, cin)         # (2, W+2, Cin) bf16
  xext_ref[pl.ds(0, 1), :, :] = halo[0:1]
  xext_ref[pl.ds(TH + 1, 1), :, :] = halo[1:2]
  xext_ref[pl.ds(1, TH), :, :] = body
  xext = xext_ref[...]                                # (TH+2, W+2, Cin)

  # ---- conv3x3+BN+ReLU: hoist the dx column shifts (3 relayouts, not 9) ----
  cols = [xext[:, dx:dx + W, :].reshape((TH + 2) * W, cin) for dx in range(3)]
  if single_matmul:
    # small Cin: one (THW, 9*Cin) im2col in VMEM -> ONE MXU matmul (K = 9*Cin).
    taps = [cols[dx][dy * W:dy * W + THW] for dy in range(3) for dx in range(3)]
    xcol = jnp.concatenate(taps, axis=-1)             # (THW, 9*Cin) bf16
    acc = jnp.dot(xcol, w3_ref[...], preferred_element_type=f32)
  else:
    acc = None
    for dy in range(3):
      for dx in range(3):
        d = jnp.dot(cols[dx][dy * W:dy * W + THW], w3_ref[3 * dy + dx],
                    preferred_element_type=f32)
        acc = d if acc is None else acc + d
  feats = jnp.maximum(acc + b3_ref[...], 0.0)         # bias fused into the ReLU
  feats_bf = feats.astype(bf16)
  feats_ref[0] = feats_bf

  # ---- lane-dense, class-major aux logits output ----
  logits_t = logits.T                                 # (K, THW) f32
  out_aux_ref[0] = logits_t

  # ---- SpatialGather: online softmax over this (batch, hw-half)'s tiles ----
  # NOTE: correctness requires the hw-tile axis (grid axis 2) to be the innermost
  # grid axis and marked "arbitrary" so the (b, p) accumulators below are
  # revisited sequentially and reset at t == 0.
  kdim = m_ref.shape[2]

  @pl.when(t == 0)
  def _():
    m_ref[...] = jnp.full(m_ref.shape, -jnp.inf, f32)
    den_ref[...] = jnp.zeros(den_ref.shape, f32)
    ctxnum_ref[...] = jnp.zeros(ctxnum_ref.shape, f32)

  m_old = m_ref[...].reshape(kdim, 1)
  den_old = den_ref[...].reshape(kdim, 1)
  ctx_old = ctxnum_ref[...].reshape(kdim, feats.shape[-1])

  m_new = jnp.maximum(m_old, jnp.max(logits_t, axis=1, keepdims=True))
  alpha = jnp.exp(m_old - m_new)
  p_t = jnp.exp(logits_t - m_new)                     # (K, THW) f32
  den_new = den_old * alpha + jnp.sum(p_t, axis=1, keepdims=True)
  ctx_new = ctx_old * alpha + jnp.dot(p_t.astype(bf16), feats_bf,
                                      preferred_element_type=f32)

  m_ref[...] = m_new.reshape(m_ref.shape)
  den_ref[...] = den_new.reshape(den_ref.shape)
  ctxnum_ref[...] = ctx_new.reshape(ctxnum_ref.shape)


# ----------------------------------------------------------------------------
# Pass 2: object attention (query/attend) + fuse + cls head, per HW tile.
# keyv / value (tiny (K, ckey)) are precomputed per image in the wrapper.
# ----------------------------------------------------------------------------
def _ocr_pass2_kernel(feats_ref, keyv_ref, value_ref,
                      w_fp1_ref, b_fp1_ref, w_fp2_ref, b_fp2_ref,
                      w_fu_ref, b_fu_ref,
                      w_cat1_ref, w_cat2_ref, b_cat_ref,
                      w_cls_ref, b_cls_ref,
                      out_ref, *, key_channels, num_classes):
  f32, bf16 = jnp.float32, jnp.bfloat16
  feats = feats_ref[0]                                # (THW, Cmid) bf16
  keyv = keyv_ref[0]                                  # (K, Ckey) bf16
  value = value_ref[0]                                # (K, Ckey) bf16
  ncls_pad = keyv.shape[0]

  def mm(a_bf, w_ref, b_ref, relu=True):
    y = jnp.dot(a_bf, w_ref[...], preferred_element_type=f32) + b_ref[...]
    return jnp.maximum(y, 0.0) if relu else y

  # ---- f_pixel (query) ----
  query = mm(mm(feats, w_fp1_ref, b_fp1_ref).astype(bf16), w_fp2_ref, b_fp2_ref)

  # ---- per-pixel softmax over the (padded) class axis ----
  sim = jax.lax.dot_general(query.astype(bf16), keyv,
                            (((1,), (1,)), ((), ())),
                            preferred_element_type=f32)   # (THW, K)
  sim = sim * (float(key_channels) ** -0.5)
  lane = jax.lax.broadcasted_iota(jnp.int32, (1, ncls_pad), 1)
  sim = jnp.where(lane < num_classes, sim, -1e30)
  se = jnp.exp(sim - jnp.max(sim, axis=-1, keepdims=True))
  attn = se / jnp.sum(se, axis=-1, keepdims=True)     # exact denominator

  ctx_pix = jnp.dot(attn.astype(bf16), value, preferred_element_type=f32)
  ctx_pix = mm(ctx_pix.astype(bf16), w_fu_ref, b_fu_ref)   # (THW, Cmid)

  # ---- SpatialOCR fuse: split-concat -> two matmuls (no (THW, 2*Cmid) buffer) ----
  fused = (jnp.dot(ctx_pix.astype(bf16), w_cat1_ref[...], preferred_element_type=f32)
           + jnp.dot(feats, w_cat2_ref[...], preferred_element_type=f32)
           + b_cat_ref[...])
  feats_ocr = jnp.maximum(fused, 0.0)

  # ---- cls head, stored class-major / lane-dense ----
  out = (jnp.dot(feats_ocr.astype(bf16), w_cls_ref[...], preferred_element_type=f32)
         + b_cls_ref[...])                            # (THW, K)
  out_ref[0] = out.T


# ----------------------------------------------------------------------------
# VMEM budgeting / tile picking.
# ----------------------------------------------------------------------------
def _vmem_limit_bytes():
  cap = 64 * 1024 * 1024
  try:
    cap = int(getattr(pltpu.get_tpu_info(), "vmem_capacity_bytes", cap))
  except Exception:
    pass
  # Headroom under physical VMEM (v7x: 64 MiB -> 56 MiB; v5e/v6e: 128 -> 96 MiB).
  return min((cap * 7) // 8, 96 * 1024 * 1024)


def _tile_vmem_bytes(th, W, cin, cmid, ckey, ncls_pad):
  thw = th * W
  bf, f4 = 2, 4
  halo_tile = (th + 2) * (W + 2) * cin
  p1 = (2 * th * (W + 2) * cin * bf          # double-buffered body input
        + 5 * halo_tile * bf                 # xext scratch + column-shift copies
        + thw * 9 * cin * bf                 # im2col (small-Cin upper bound)
        + thw * cmid * f4                    # conv accumulator
        + 3 * thw * cmid * bf                # feats + double-buffered feats out
        + 4 * thw * ncls_pad * f4)           # logits / probs / aux out blocks
  p2 = (2 * thw * cmid * bf                  # double-buffered feats input
        + 3 * thw * ckey * f4                # query chain + ctx_pix
        + 2 * thw * cmid * f4                # f_up out + fused
        + 4 * thw * ncls_pad * f4)           # out + double-buffered out block
  return max(p1, p2)


def _pick_tile_rows(H, W, cin, cmid, ckey, ncls_pad, weight_bytes, vmem_limit,
                    max_tile_rows=8192):
  """Largest row tile fitting the per-chip VMEM budget (v5e/v6e > v7x)."""
  budget = int(vmem_limit * 0.75) - 2 * weight_bytes
  best, fallback = None, None
  for th in range(1, H + 1):
    if H % th:
      continue
    thw = th * W
    if thw % 128:
      continue
    if fallback is None:
      fallback = th
    if thw > max_tile_rows:
      break
    if _tile_vmem_bytes(th, W, cin, cmid, ckey, ncls_pad) <= budget:
      best = th
  if best is not None:
    return best
  if fallback is not None:
    return fallback
  # TODO(synk): pad H*W to a 128 multiple (and mask the gather softmax) instead
  # of falling back to a whole-image tile with masked lane stores.
  return H


# ----------------------------------------------------------------------------
# Wrapper glue.
# ----------------------------------------------------------------------------
def segmentation_ocr_head_forward(x_nchw, params, *, key_channels=256,
                                  tile_rows=None, hw_splits=None):
  """x_nchw: (N, Cin, H, W) float32. Returns [coarse_pre, pre] as NCHW float32."""
  f32, bf16 = jnp.float32, jnp.bfloat16
  N, Cin, H, W = x_nchw.shape
  cmid, ncls = params["w_cls"].shape
  ckey = params["w_fd"].shape[1]
  ncls_pad = _round_up(ncls, 8)
  HW = H * W

  # ---- params: pad class dim, split concat weight, cast matmul weights bf16 ----
  def pad_cls(w, b):
    wp = jnp.zeros((w.shape[0], ncls_pad), f32).at[:, :ncls].set(w)
    bp = jnp.zeros((1, ncls_pad), f32).at[:, :ncls].set(b.reshape(1, -1))
    return wp, bp

  w_aux2p, b_aux2p = pad_cls(params["w_aux2"], params["b_aux2"])
  w_clsp, b_clsp = pad_cls(params["w_cls"], params["b_cls"])
  w_cat1 = params["w_cat"][:cmid]
  w_cat2 = params["w_cat"][cmid:]

  single_matmul = Cin <= 64
  w3_op = params["w3"].reshape(9 * Cin, cmid) if single_matmul else params["w3"]

  p1_weights = [
      params["w_aux1"].astype(bf16), params["b_aux1"].astype(f32),
      w_aux2p.astype(bf16), b_aux2p,
      w3_op.astype(bf16), params["b3"].astype(f32),
  ]
  p2_weights = [
      params["w_fp1"].astype(bf16), params["b_fp1"].astype(f32),
      params["w_fp2"].astype(bf16), params["b_fp2"].astype(f32),
      params["w_fu"].astype(bf16), params["b_fu"].astype(f32),
      w_cat1.astype(bf16), w_cat2.astype(bf16), params["b_cat"].astype(f32),
      w_clsp.astype(bf16), b_clsp,
  ]

  vmem_limit = _vmem_limit_bytes()
  weight_bytes = max(
      sum(int(a.size) * a.dtype.itemsize for a in p1_weights),
      sum(int(a.size) * a.dtype.itemsize for a in p2_weights))

  if tile_rows is None:
    tile_rows = _pick_tile_rows(H, W, Cin, cmid, ckey, ncls_pad,
                                weight_bytes, vmem_limit)
  TH = int(tile_rows)
  assert H % TH == 0, (H, TH)
  T = H // TH
  THW = TH * W
  if THW % 128 != 0:
    assert T == 1, "tile rows must give a 128-multiple tile or be the whole image"

  # HW split: 2 independent halves -> both v7x TensorCores busy even at N=1.
  if hw_splits is None:
    hw_splits = 2 if (T % 2 == 0 and T >= 2) else 1
  P = int(hw_splits)
  assert T % P == 0, (T, P)
  Tp = T // P

  # ---- input prep: NCHW -> NHWC bf16 with column pad only; tiny per-tile halos ----
  x = jnp.transpose(x_nchw, (0, 2, 3, 1)).astype(bf16)          # (N,H,W,Cin)
  xcp = jnp.pad(x, ((0, 0), (0, 0), (1, 1), (0, 0)))            # (N,H,W+2,Cin)
  zrow = jnp.zeros((N, 1, W + 2, Cin), bf16)
  halo_list = []
  for ti in range(T):
    top = zrow if ti == 0 else xcp[:, ti * TH - 1:ti * TH]
    bot = zrow if ti == T - 1 else xcp[:, (ti + 1) * TH:(ti + 1) * TH + 1]
    halo_list.append(jnp.concatenate([top, bot], axis=1))       # (N,2,W+2,Cin)
  halos = jnp.stack(halo_list, axis=1)                          # (N,T,2,W+2,Cin)

  # Constant index_map -> block stays resident across grid steps.
  # TODO(synk): pipeline_mode=pl.Buffered(1) here once verified on this toolchain.
  def wspec1(w):
    return pl.BlockSpec(w.shape, lambda b, p, t, nd=w.ndim: (0,) * nd)

  def wspec2(w):
    return pl.BlockSpec(w.shape, lambda b, t, nd=w.ndim: (0,) * nd)

  # ---------------- pass 1 ----------------
  p1 = pl.pallas_call(
      functools.partial(_ocr_pass1_kernel, tile_rows=TH, width=W,
                        single_matmul=single_matmul),
      grid=(N, P, Tp),
      in_specs=[
          pl.BlockSpec((1, TH, W + 2, Cin), lambda b, p, t: (b, p * Tp + t, 0, 0)),
          pl.BlockSpec((1, 1, 2, W + 2, Cin),
                       lambda b, p, t: (b, p * Tp + t, 0, 0, 0)),
      ] + [wspec1(w) for w in p1_weights],
      out_specs=[
          pl.BlockSpec((1, ncls_pad, THW), lambda b, p, t: (b, 0, p * Tp + t)),
          pl.BlockSpec((1, THW, cmid), lambda b, p, t: (b, p * Tp + t, 0)),
          pl.BlockSpec((1, 1, ncls_pad, cmid), lambda b, p, t: (b, p, 0, 0)),
          pl.BlockSpec((1, 1, ncls_pad, 1), lambda b, p, t: (b, p, 0, 0)),
          pl.BlockSpec((1, 1, ncls_pad, 1), lambda b, p, t: (b, p, 0, 0)),
      ],
      out_shape=[
          jax.ShapeDtypeStruct((N, ncls_pad, HW), f32),     # aux logits (class-major)
          jax.ShapeDtypeStruct((N, HW, cmid), bf16),        # conv3x3 features
          jax.ShapeDtypeStruct((N, P, ncls_pad, cmid), f32),  # ctx numerator (partial)
          jax.ShapeDtypeStruct((N, P, ncls_pad, 1), f32),     # running max (partial)
          jax.ShapeDtypeStruct((N, P, ncls_pad, 1), f32),     # running denom (partial)
      ],
      scratch_shapes=[pltpu.VMEM((TH + 2, W + 2, Cin), bf16)],
      compiler_params=pltpu.CompilerParams(
          # Axis 2 (hw tiles within a half) MUST stay innermost + "arbitrary":
          # the gather accumulators rely on sequential revisits with t==0 reset.
          dimension_semantics=("parallel", "parallel", "arbitrary"),
          vmem_limit_bytes=vmem_limit),
  )
  out_aux, feats_hbm, ctx_num, ctx_m, ctx_den = p1(xcp, halos, *p1_weights)

  # ---- merge the per-half online-softmax partial states (tiny, f32) ----
  m_max = jnp.max(ctx_m, axis=1, keepdims=True)                 # (N,1,K,1)
  scale = jnp.exp(ctx_m - m_max)                                # (N,P,K,1)
  den = jnp.sum(ctx_den * scale, axis=1)                        # (N,K,1)
  context = jnp.sum(ctx_num * scale, axis=1) / den              # (N,K,cmid) f32

  # ---- f_object / f_down on the tiny context: once per image, in f32 ----
  def head(a, w, b, relu=True):
    y = jnp.einsum("nkc,cd->nkd", a, w) + b
    return jnp.maximum(y, 0.0) if relu else y

  keyv = head(head(context, params["w_fo1"], params["b_fo1"]),
              params["w_fo2"], params["b_fo2"]).astype(bf16)    # (N,K,ckey)
  value = head(context, params["w_fd"], params["b_fd"]).astype(bf16)

  # ---------------- pass 2 ----------------
  p2 = pl.pallas_call(
      functools.partial(_ocr_pass2_kernel, key_channels=key_channels,
                        num_classes=ncls),
      grid=(N, T),
      in_specs=[
          pl.BlockSpec((1, THW, cmid), lambda b, t: (b, t, 0)),
          pl.BlockSpec((1, ncls_pad, ckey), lambda b, t: (b, 0, 0)),
          pl.BlockSpec((1, ncls_pad, ckey), lambda b, t: (b, 0, 0)),
      ] + [wspec2(w) for w in p2_weights],
      out_specs=[pl.BlockSpec((1, ncls_pad, THW), lambda b, t: (b, 0, t))],
      out_shape=[jax.ShapeDtypeStruct((N, ncls_pad, HW), f32)],
      compiler_params=pltpu.CompilerParams(
          dimension_semantics=("parallel", "parallel"),
          vmem_limit_bytes=vmem_limit),
  )
  (out_main,) = p2(feats_hbm, keyv, value, *p2_weights)

  # Class-major outputs -> NCHW directly (no transpose needed).
  coarse_pre = out_aux[:, :ncls, :].reshape(N, ncls, H, W)
  pre = out_main[:, :ncls, :].reshape(N, ncls, H, W)
  # upsampling=1 -> nn.Identity ; activation=None -> Identity
  return [coarse_pre, pre]


# ----------------------------------------------------------------------------
# Deterministic synthetic parameters (BN folded into the preceding conv, eval).
# ----------------------------------------------------------------------------
def make_params(rng, cin, ncls, cmid=512, ckey=256, eps=1e-5):
  keys = iter(jax.random.split(rng, 64))

  def rnd(shape, scale=0.05):
    return (scale * jax.random.normal(next(keys), shape)).astype(jnp.float32)

  def fold_bn(w, bvec, c):
    gamma = (1.0 + 0.1 * jax.random.normal(next(keys), (c,))).astype(jnp.float32)
    beta = (0.1 * jax.random.normal(next(keys), (c,))).astype(jnp.float32)
    mean = (0.05 * jax.random.normal(next(keys), (c,))).astype(jnp.float32)
    var = jax.random.uniform(next(keys), (c,), minval=0.5, maxval=1.5).astype(jnp.float32)
    s = gamma / jnp.sqrt(var + eps)
    return w * s, (((bvec - mean) * s) + beta)[None, :]

  p = {}
  p["w_aux1"], p["b_aux1"] = fold_bn(rnd((cin, cin)), rnd((cin,)), cin)
  p["w_aux2"], p["b_aux2"] = rnd((cin, ncls)), rnd((ncls,))[None, :]
  p["w3"], p["b3"] = fold_bn(rnd((9, cin, cmid)), rnd((cmid,)), cmid)
  p["w_fp1"], p["b_fp1"] = fold_bn(rnd((cmid, ckey)), rnd((ckey,)), ckey)
  p["w_fp2"], p["b_fp2"] = fold_bn(rnd((ckey, ckey)), rnd((ckey,)), ckey)
  p["w_fo1"], p["b_fo1"] = fold_bn(rnd((cmid, ckey)), rnd((ckey,)), ckey)
  p["w_fo2"], p["b_fo2"] = fold_bn(rnd((ckey, ckey)), rnd((ckey,)), ckey)
  p["w_fd"], p["b_fd"] = fold_bn(rnd((cmid, ckey)), rnd((ckey,)), ckey)
  p["w_fu"], p["b_fu"] = fold_bn(rnd((ckey, cmid)), rnd((cmid,)), cmid)
  p["w_cat"], p["b_cat"] = fold_bn(rnd((2 * cmid, cmid)), rnd((cmid,)), cmid)
  p["w_cls"], p["b_cls"] = rnd((cmid, ncls)), rnd((ncls,))[None, :]
  return p


# ----------------------------------------------------------------------------
# Pure-JAX f32 reference (mirrors the PyTorch module semantics).
# ----------------------------------------------------------------------------
def reference_forward(x_nchw, params, *, key_channels=256):
  N, Cin, H, W = x_nchw.shape
  ncls = params["w_cls"].shape[1]
  HW = H * W
  x = jnp.transpose(x_nchw, (0, 2, 3, 1)).astype(jnp.float32)
  xf = x.reshape(N, HW, Cin)
  xpad = jnp.pad(x, ((0, 0), (1, 1), (1, 1), (0, 0)))
  cols = [xpad[:, dy:dy + H, dx:dx + W, :] for dy in range(3) for dx in range(3)]
  xcol = jnp.concatenate(cols, axis=-1).reshape(N, HW, 9 * Cin)

  def mm(a, w, b, relu=True):
    y = jnp.einsum("nxc,cd->nxd", a, w) + b
    return jnp.maximum(y, 0.0) if relu else y

  h = mm(xf, params["w_aux1"], params["b_aux1"])
  aux = mm(h, params["w_aux2"], params["b_aux2"], relu=False)
  feats = mm(xcol, params["w3"].reshape(9 * Cin, -1), params["b3"])
  probs = jax.nn.softmax(aux, axis=1)                 # softmax over HW
  context = jnp.einsum("nxk,nxc->nkc", probs, feats)
  query = mm(mm(feats, params["w_fp1"], params["b_fp1"]), params["w_fp2"], params["b_fp2"])
  keyv = mm(mm(context, params["w_fo1"], params["b_fo1"]), params["w_fo2"], params["b_fo2"])
  value = mm(context, params["w_fd"], params["b_fd"])
  sim = jnp.einsum("nxe,nke->nxk", query, keyv) * (float(key_channels) ** -0.5)
  attn = jax.nn.softmax(sim, axis=-1)
  ctx_pix = mm(jnp.einsum("nxk,nke->nxe", attn, value), params["w_fu"], params["b_fu"])
  fused = jnp.concatenate([ctx_pix, feats], axis=-1)
  feats_ocr = mm(fused, params["w_cat"], params["b_cat"])
  out = mm(feats_ocr, params["w_cls"], params["b_cls"], relu=False)
  to_nchw = lambda a: jnp.transpose(a.reshape(N, H, W, ncls), (0, 3, 1, 2))
  return to_nchw(aux), to_nchw(out)


if __name__ == "__main__":
  cmid, ckey = 512, 256   # OCR defaults (ocr_mid_channels, ocr_key_channels)
  ncls, cin = 3, 4

  root = jax.random.PRNGKey(0)
  kx1, kx2, kp = jax.random.split(root, 3)
  params = make_params(kp, cin, ncls, cmid=cmid, ckey=ckey)

  def check(x, tile_rows):
    got_c, got_p = segmentation_ocr_head_forward(x, params, key_channels=ckey,
                                                 tile_rows=tile_rows)
    jax.block_until_ready((got_c, got_p))
    n, _, h, w = x.shape
    assert got_c.shape == (n, ncls, h, w), got_c.shape
    assert got_p.shape == (n, ncls, h, w), got_p.shape
    assert got_c.dtype == jnp.float32 and got_p.dtype == jnp.float32
    ref_c, ref_p = reference_forward(x, params, key_channels=ckey)
    for got, ref in ((got_c, ref_c), (got_p, ref_p)):
      err = float(jnp.max(jnp.abs(got - ref)))
      scale = float(jnp.max(jnp.abs(ref))) + 1e-6
      assert err <= 5e-2 + 5e-2 * scale, (err, scale)

  # (a) VMEM-aware auto tile -> single tile per image (T=1, no HW split), batch 2.
  x_a = jax.random.normal(kx1, (2, cin, 16, 16), dtype=jnp.float32)
  check(x_a, tile_rows=None)

  # (b) explicit 8-row tiles on a 32x16 image -> 4 tiles, split into 2 parallel HW
  # halves of 2 tiles each: exercises the online-softmax gather accumulation, the
  # partial-state merge and the dual-TensorCore pass-1 split at batch 1.
  x_b = jax.random.normal(kx2, (1, cin, 32, 16), dtype=jnp.float32)
  check(x_b, tile_rows=8)

  print("KERNEL_OK")
</pallas_src>

<mosaic_0001>
module attributes {stable_mosaic.version = 11 : i64} {
  func.func @_ocr_pass1_kernel(%arg0: i32, %arg1: i32, %arg2: i32, %arg3: memref<1x16x18x4xbf16, #tpu.memory_space<vmem>>, %arg4: memref<1x1x2x18x4xbf16, #tpu.memory_space<vmem>>, %arg5: memref<4x4xbf16, #tpu.memory_space<vmem>>, %arg6: memref<1x4xf32, #tpu.memory_space<vmem>>, %arg7: memref<4x8xbf16, #tpu.memory_space<vmem>>, %arg8: memref<1x8xf32, #tpu.memory_space<vmem>>, %arg9: memref<36x512xbf16, #tpu.memory_space<vmem>>, %arg10: memref<1x512xf32, #tpu.memory_space<vmem>>, %arg11: memref<1x8x256xf32, #tpu.memory_space<vmem>>, %arg12: memref<1x256x512xbf16, #tpu.memory_space<vmem>>, %arg13: memref<1x1x8x512xf32, #tpu.memory_space<vmem>>, %arg14: memref<1x1x8x1xf32, #tpu.memory_space<vmem>>, %arg15: memref<1x1x8x1xf32, #tpu.memory_space<vmem>>, %arg16: memref<18x18x4xbf16, #tpu.memory_space<vmem>>) attributes {dimension_semantics = [#tpu.dimension_semantics<parallel>, #tpu.dimension_semantics<parallel>, #tpu.dimension_semantics<arbitrary>], iteration_bounds = array<i64: 2, 1, 1>, scalar_prefetch = 0 : i64, scratch_operands = 1 : i64, tpu.core_type = #tpu.core_type<tc>, window_params = [{transform_indices = @transform_0, window_bounds = array<i64: 1, 16, 18, 4>}, {transform_indices = @transform_1, window_bounds = array<i64: 1, 1, 2, 18, 4>}, {pipeline_mode = #tpu.pipeline_mode<synchronous>, transform_indices = @transform_2, window_bounds = array<i64: 4, 4>}, {pipeline_mode = #tpu.pipeline_mode<synchronous>, transform_indices = @transform_3, window_bounds = array<i64: 1, 4>}, {pipeline_mode = #tpu.pipeline_mode<synchronous>, transform_indices = @transform_4, window_bounds = array<i64: 4, 8>}, {pipeline_mode = #tpu.pipeline_mode<synchronous>, transform_indices = @transform_5, window_bounds = array<i64: 1, 8>}, {pipeline_mode = #tpu.pipeline_mode<synchronous>, transform_indices = @transform_6, window_bounds = array<i64: 36, 512>}, {pipeline_mode = #tpu.pipeline_mode<synchronous>, transform_indices = @transform_7, window_bounds = array<i64: 1, 512>}, {transform_indices = @transform_8, window_bounds = array<i64: 1, 8, 256>}, {transform_indices = @transform_9, window_bounds = array<i64: 1, 256, 512>}, {transform_indices = @transform_10, window_bounds = array<i64: 1, 1, 8, 512>}, {transform_indices = @transform_11, window_bounds = array<i64: 1, 1, 8, 1>}, {transform_indices = @transform_12, window_bounds = array<i64: 1, 1, 8, 1>}]} {
    %c0 = arith.constant 0 : index
    %c0_0 = arith.constant 0 : index
    %c0_1 = arith.constant 0 : index
    %c0_2 = arith.constant 0 : index
    %0 = vector.load %arg3[%c0, %c0_0, %c0_1, %c0_2] : memref<1x16x18x4xbf16, #tpu.memory_space<vmem>>, vector<1x16x18x4xbf16>
    %1 = vector.shape_cast %0 : vector<1x16x18x4xbf16> to vector<16x18x4xbf16>
    %2 = vector.extract_strided_slice %1 {offsets = [0, 1, 0], sizes = [16, 16, 4], strides = [1, 1, 1]} : vector<16x18x4xbf16> to vector<16x16x4xbf16>
    %3 = vector.shape_cast %2 : vector<16x16x4xbf16> to vector<256x4xbf16>
    %c0_3 = arith.constant 0 : index
    %c0_4 = arith.constant 0 : index
    %4 = vector.load %arg5[%c0_3, %c0_4] : memref<4x4xbf16, #tpu.memory_space<vmem>>, vector<4x4xbf16>
    %cst = arith.constant dense<0.000000e+00> : vector<256x4xf32>
    %5 = tpu.matmul %3, %4, %cst {dimension_numbers = #tpu.dot_dimension_numbers<[1], [0], [0], [1], [0, 0, 1, 1], [], []>} : vector<256x4xbf16>, vector<4x4xbf16>, vector<256x4xf32> -> vector<256x4xf32>
    %c0_5 = arith.constant 0 : index
    %c0_6 = arith.constant 0 : index
    %6 = vector.load %arg6[%c0_5, %c0_6] : memref<1x4xf32, #tpu.memory_space<vmem>>, vector<1x4xf32>
    %7 = vector.broadcast %6 : vector<1x4xf32> to vector<256x4xf32>
    %8 = arith.addf %5, %7 : vector<256x4xf32>
    %cst_7 = arith.constant 0.000000e+00 : f32
    %9 = vector.broadcast %cst_7 : f32 to vector<256x4xf32>
    %10 = arith.maximumf %8, %9 : vector<256x4xf32>
    %11 = arith.truncf %10 : vector<256x4xf32> to vector<256x4xbf16>
    %c0_8 = arith.constant 0 : index
    %c0_9 = arith.constant 0 : index
    %12 = vector.load %arg7[%c0_8, %c0_9] : memref<4x8xbf16, #tpu.memory_space<vmem>>, vector<4x8xbf16>
    %cst_10 = arith.constant dense<0.000000e+00> : vector<256x8xf32>
    %13 = tpu.matmul %11, %12, %cst_10 {dimension_numbers = #tpu.dot_dimension_numbers<[1], [0], [0], [1], [0, 0, 1, 1], [], []>} : vector<256x4xbf16>, vector<4x8xbf16>, vector<256x8xf32> -> vector<256x8xf32>
    %c0_11 = arith.constant 0 : index
    %c0_12 = arith.constant 0 : index
    %14 = vector.load %arg8[%c0_11, %c0_12] : memref<1x8xf32, #tpu.memory_space<vmem>>, vector<1x8xf32>
    %15 = vector.broadcast %14 : vector<1x8xf32> to vector<256x8xf32>
    %16 = arith.addf %13, %15 : vector<256x8xf32>
    %c0_13 = arith.constant 0 : index
    %c0_14 = arith.constant 0 : index
    %c0_15 = arith.constant 0 : index
    %c0_16 = arith.constant 0 : index
    %c0_17 = arith.constant 0 : index
    %17 = vector.load %arg4[%c0_13, %c0_14, %c0_15, %c0_16, %c0_17] : memref<1x1x2x18x4xbf16, #tpu.memory_space<vmem>>, vector<1x1x2x18x4xbf16>
    %18 = vector.shape_cast %17 : vector<1x1x2x18x4xbf16> to vector<2x18x4xbf16>
    %19 = vector.extract_strided_slice %18 {offsets = [0, 0, 0], sizes = [1, 18, 4], strides = [1, 1, 1]} : vector<2x18x4xbf16> to vector<1x18x4xbf16>
    %c0_18 = arith.constant 0 : index
    %c0_19 = arith.constant 0 : index
    %c0_20 = arith.constant 0 : index
    %20 = vector.load %arg16[%c0_18, %c0_19, %c0_20] : memref<18x18x4xbf16, #tpu.memory_space<vmem>>, vector<1x18x4xbf16>
    tpu.vector_store %arg16[%c0_18, %c0_19, %c0_20], %19 {strides = array<i32>} : memref<18x18x4xbf16, #tpu.memory_space<vmem>>, vector<1x18x4xbf16>,
    %21 = vector.extract_strided_slice %18 {offsets = [1, 0, 0], sizes = [1, 18, 4], strides = [1, 1, 1]} : vector<2x18x4xbf16> to vector<1x18x4xbf16>
    %c17 = arith.constant 17 : index
    %c0_21 = arith.constant 0 : index
    %c0_22 = arith.constant 0 : index
    %22 = vector.load %arg16[%c17, %c0_21, %c0_22] : memref<18x18x4xbf16, #tpu.memory_space<vmem>>, vector<1x18x4xbf16>
    tpu.vector_store %arg16[%c17, %c0_21, %c0_22], %21 {strides = array<i32>} : memref<18x18x4xbf16, #tpu.memory_space<vmem>>, vector<1x18x4xbf16>,
    %c1 = arith.constant 1 : index
    %c0_23 = arith.constant 0 : index
    %c0_24 = arith.constant 0 : index
    %23 = vector.load %arg16[%c1, %c0_23, %c0_24] : memref<18x18x4xbf16, #tpu.memory_space<vmem>>, vector<16x18x4xbf16>
    tpu.vector_store %arg16[%c1, %c0_23, %c0_24], %1 {strides = array<i32>} : memref<18x18x4xbf16, #tpu.memory_space<vmem>>, vector<16x18x4xbf16>,
    %c0_25 = arith.constant 0 : index
    %c0_26 = arith.constant 0 : index
    %c0_27 = arith.constant 0 : index
    %24 = vector.load %arg16[%c0_25, %c0_26, %c0_27] : memref<18x18x4xbf16, #tpu.memory_space<vmem>>, vector<18x18x4xbf16>
    %25 = vector.extract_strided_slice %24 {offsets = [0, 0, 0], sizes = [18, 16, 4], strides = [1, 1, 1]} : vector<18x18x4xbf16> to vector<18x16x4xbf16>
    %26 = vector.shape_cast %25 : vector<18x16x4xbf16> to vector<288x4xbf16>
    %27 = vector.extract_strided_slice %24 {offsets = [0, 1, 0], sizes = [18, 16, 4], strides = [1, 1, 1]} : vector<18x18x4xbf16> to vector<18x16x4xbf16>
    %28 = vector.shape_cast %27 : vector<18x16x4xbf16> to vector<288x4xbf16>
    %29 = vector.extract_strided_slice %24 {offsets = [0, 2, 0], sizes = [18, 16, 4], strides = [1, 1, 1]} : vector<18x18x4xbf16> to vector<18x16x4xbf16>
    %30 = vector.shape_cast %29 : vector<18x16x4xbf16> to vector<288x4xbf16>
    %31 = vector.extract_strided_slice %26 {offsets = [0, 0], sizes = [256, 4], strides = [1, 1]} : vector<288x4xbf16> to vector<256x4xbf16>
    %32 = vector.extract_strided_slice %28 {offsets = [0, 0], sizes = [256, 4], strides = [1, 1]} : vector<288x4xbf16> to vector<256x4xbf16>
    %33 = vector.extract_strided_slice %30 {offsets = [0, 0], sizes = [256, 4], strides = [1, 1]} : vector<288x4xbf16> to vector<256x4xbf16>
    %34 = vector.extract_strided_slice %26 {offsets = [16, 0], sizes = [256, 4], strides = [1, 1]} : vector<288x4xbf16> to vector<256x4xbf16>
    %35 = vector.extract_strided_slice %28 {offsets = [16, 0], sizes = [256, 4], strides = [1, 1]} : vector<288x4xbf16> to vector<256x4xbf16>
    %36 = vector.extract_strided_slice %30 {offsets = [16, 0], sizes = [256, 4], strides = [1, 1]} : vector<288x4xbf16> to vector<256x4xbf16>
    %37 = vector.extract_strided_slice %26 {offsets = [32, 0], sizes = [256, 4], strides = [1, 1]} : vector<288x4xbf16> to vector<256x4xbf16>
    %38 = vector.extract_strided_slice %28 {offsets = [32, 0], sizes = [256, 4], strides = [1, 1]} : vector<288x4xbf16> to vector<256x4xbf16>
    %39 = vector.extract_strided_slice %30 {offsets = [32, 0], sizes = [256, 4], strides = [1, 1]} : vector<288x4xbf16> to vector<256x4xbf16>
    %40 = tpu.concatenate %31, %32, %33, %34, %35, %36, %37, %38, %39 in 1 : vector<256x4xbf16>, vector<256x4xbf16>, vector<256x4xbf16>, vector<256x4xbf16>, vector<256x4xbf16>, vector<256x4xbf16>, vector<256x4xbf16>, vector<256x4xbf16>, vector<256x4xbf16> -> vector<256x36xbf16>
    %c0_28 = arith.constant 0 : index
    %c0_29 = arith.constant 0 : index
    %41 = vector.load %arg9[%c0_28, %c0_29] : memref<36x512xbf16, #tpu.memory_space<vmem>>, vector<36x512xbf16>
    %cst_30 = arith.constant dense<0.000000e+00> : vector<256x512xf32>
    %42 = tpu.matmul %40, %41, %cst_30 {dimension_numbers = #tpu.dot_dimension_numbers<[1], [0], [0], [1], [0, 0, 1, 1], [], []>} : vector<256x36xbf16>, vector<36x512xbf16>, vector<256x512xf32> -> vector<256x512xf32>
    %c0_31 = arith.constant 0 : index
    %c0_32 = arith.constant 0 : index
    %43 = vector.load %arg10[%c0_31, %c0_32] : memref<1x512xf32, #tpu.memory_space<vmem>>, vector<1x512xf32>
    %44 = vector.broadcast %43 : vector<1x512xf32> to vector<256x512xf32>
    %45 = arith.addf %42, %44 : vector<256x512xf32>
    %cst_33 = arith.constant 0.000000e+00 : f32
    %46 = vector.broadcast %cst_33 : f32 to vector<256x512xf32>
    %47 = arith.maximumf %45, %46 : vector<256x512xf32>
    %48 = arith.truncf %47 : vector<256x512xf32> to vector<256x512xbf16>
    %c0_34 = arith.constant 0 : index
    %c0_35 = arith.constant 0 : index
    %c0_36 = arith.constant 0 : index
    %49 = vector.load %arg12[%c0_34, %c0_35, %c0_36] : memref<1x256x512xbf16, #tpu.memory_space<vmem>>, vector<1x256x512xbf16>
    %50 = vector.shape_cast %49 : vector<1x256x512xbf16> to vector<256x512xbf16>
    %51 = vector.shape_cast %48 : vector<256x512xbf16> to vector<1x256x512xbf16>
    tpu.vector_store %arg12[%c0_34, %c0_35, %c0_36], %51 {strides = array<i32>} : memref<1x256x512xbf16, #tpu.memory_space<vmem>>, vector<1x256x512xbf16>,
    %52 = tpu.transpose %16, [1, 0] : vector<256x8xf32> -> vector<8x256xf32>
    %c0_37 = arith.constant 0 : index
    %c0_38 = arith.constant 0 : index
    %c0_39 = arith.constant 0 : index
    %53 = vector.load %arg11[%c0_37, %c0_38, %c0_39] : memref<1x8x256xf32, #tpu.memory_space<vmem>>, vector<1x8x256xf32>
    %54 = vector.shape_cast %53 : vector<1x8x256xf32> to vector<8x256xf32>
    %55 = vector.shape_cast %52 : vector<8x256xf32> to vector<1x8x256xf32>
    tpu.vector_store %arg11[%c0_37, %c0_38, %c0_39], %55 {strides = array<i32>} : memref<1x8x256xf32, #tpu.memory_space<vmem>>, vector<1x8x256xf32>,
    %c0_i32 = arith.constant 0 : i32
    %56 = arith.cmpi eq, %arg2, %c0_i32 : i32
    %57 = arith.extui %56 : i1 to i32
    %c0_i32_40 = arith.constant 0 : i32
    %58 = arith.cmpi ne, %57, %c0_i32_40 : i32
    scf.if %58 {
      %cst_68 = arith.constant 0xFF800000 : f32
      %88 = vector.broadcast %cst_68 : f32 to vector<1x1x8x1xf32>
      %c0_69 = arith.constant 0 : index
      %c0_70 = arith.constant 0 : index
      %c0_71 = arith.constant 0 : index
      %c0_72 = arith.constant 0 : index
      %89 = vector.load %arg14[%c0_69, %c0_70, %c0_71, %c0_72] : memref<1x1x8x1xf32, #tpu.memory_space<vmem>>, vector<1x1x8x1xf32>
      tpu.vector_store %arg14[%c0_69, %c0_70, %c0_71, %c0_72], %88 {strides = array<i32>} : memref<1x1x8x1xf32, #tpu.memory_space<vmem>>, vector<1x1x8x1xf32>,
      %cst_73 = arith.constant 0.000000e+00 : f32
      %90 = vector.broadcast %cst_73 : f32 to vector<1x1x8x1xf32>
      %c0_74 = arith.constant 0 : index
      %c0_75 = arith.constant 0 : index
      %c0_76 = arith.constant 0 : index
      %c0_77 = arith.constant 0 : index
      %91 = vector.load %arg15[%c0_74, %c0_75, %c0_76, %c0_77] : memref<1x1x8x1xf32, #tpu.memory_space<vmem>>, vector<1x1x8x1xf32>
      tpu.vector_store %arg15[%c0_74, %c0_75, %c0_76, %c0_77], %90 {strides = array<i32>} : memref<1x1x8x1xf32, #tpu.memory_space<vmem>>, vector<1x1x8x1xf32>,
      %cst_78 = arith.constant 0.000000e+00 : f32
      %92 = vector.broadcast %cst_78 : f32 to vector<1x1x8x512xf32>
      %c0_79 = arith.constant 0 : index
      %c0_80 = arith.constant 0 : index
      %c0_81 = arith.constant 0 : index
      %c0_82 = arith.constant 0 : index
      %93 = vector.load %arg13[%c0_79, %c0_80, %c0_81, %c0_82] : memref<1x1x8x512xf32, #tpu.memory_space<vmem>>, vector<1x1x8x512xf32>
      tpu.vector_store %arg13[%c0_79, %c0_80, %c0_81, %c0_82], %92 {strides = array<i32>} : memref<1x1x8x512xf32, #tpu.memory_space<vmem>>, vector<1x1x8x512xf32>,
    } else {
    }
    %c0_41 = arith.constant 0 : index
    %c0_42 = arith.constant 0 : index
    %c0_43 = arith.constant 0 : index
    %c0_44 = arith.constant 0 : index
    %59 = vector.load %arg14[%c0_41, %c0_42, %c0_43, %c0_44] : memref<1x1x8x1xf32, #tpu.memory_space<vmem>>, vector<1x1x8x1xf32>
    %60 = vector.shape_cast %59 : vector<1x1x8x1xf32> to vector<8x1xf32>
    %c0_45 = arith.constant 0 : index
    %c0_46 = arith.constant 0 : index
    %c0_47 = arith.constant 0 : index
    %c0_48 = arith.constant 0 : index
    %61 = vector.load %arg15[%c0_45, %c0_46, %c0_47, %c0_48] : memref<1x1x8x1xf32, #tpu.memory_space<vmem>>, vector<1x1x8x1xf32>
    %62 = vector.shape_cast %61 : vector<1x1x8x1xf32> to vector<8x1xf32>
    %c0_49 = arith.constant 0 : index
    %c0_50 = arith.constant 0 : index
    %c0_51 = arith.constant 0 : index
    %c0_52 = arith.constant 0 : index
    %63 = vector.load %arg13[%c0_49, %c0_50, %c0_51, %c0_52] : memref<1x1x8x512xf32, #tpu.memory_space<vmem>>, vector<1x1x8x512xf32>
    %64 = vector.shape_cast %63 : vector<1x1x8x512xf32> to vector<8x512xf32>
    %cst_53 = arith.constant dense<0xFF800000> : vector<8xf32>
    %65 = vector.multi_reduction <maximumf>, %52, %cst_53 [1] : vector<8x256xf32> to vector<8xf32>
    %66 = vector.shape_cast %65 : vector<8xf32> to vector<8x1xf32>
    %67 = arith.maximumf %60, %66 : vector<8x1xf32>
    %68 = arith.subf %60, %67 : vector<8x1xf32>
    %69 = math.exp %68 : vector<8x1xf32>
    %70 = vector.broadcast %67 : vector<8x1xf32> to vector<8x256xf32>
    %71 = arith.subf %52, %70 : vector<8x256xf32>
    %72 = math.exp %71 : vector<8x256xf32>
    %73 = arith.mulf %62, %69 : vector<8x1xf32>
    %cst_54 = arith.constant dense<0.000000e+00> : vector<8xf32>
    %74 = vector.multi_reduction <add>, %72, %cst_54 [1] : vector<8x256xf32> to vector<8xf32>
    %75 = vector.shape_cast %74 : vector<8xf32> to vector<8x1xf32>
    %76 = arith.addf %73, %75 : vector<8x1xf32>
    %77 = vector.broadcast %69 : vector<8x1xf32> to vector<8x512xf32>
    %78 = arith.mulf %64, %77 : vector<8x512xf32>
    %79 = arith.truncf %72 : vector<8x256xf32> to vector<8x256xbf16>
    %cst_55 = arith.constant dense<0.000000e+00> : vector<8x512xf32>
    %80 = tpu.matmul %79, %48, %cst_55 {dimension_numbers = #tpu.dot_dimension_numbers<[1], [0], [0], [1], [0, 0, 1, 1], [], []>} : vector<8x256xbf16>, vector<256x512xbf16>, vector<8x512xf32> -> vector<8x512xf32>
    %81 = arith.addf %78, %80 : vector<8x512xf32>
    %82 = vector.shape_cast %67 : vector<8x1xf32> to vector<1x1x8x1xf32>
    %c0_56 = arith.constant 0 : index
    %c0_57 = arith.constant 0 : index
    %c0_58 = arith.constant 0 : index
    %c0_59 = arith.constant 0 : index
    %83 = vector.load %arg14[%c0_56, %c0_57, %c0_58, %c0_59] : memref<1x1x8x1xf32, #tpu.memory_space<vmem>>, vector<1x1x8x1xf32>
    tpu.vector_store %arg14[%c0_56, %c0_57, %c0_58, %c0_59], %82 {strides = array<i32>} : memref<1x1x8x1xf32, #tpu.memory_space<vmem>>, vector<1x1x8x1xf32>,
    %84 = vector.shape_cast %76 : vector<8x1xf32> to vector<1x1x8x1xf32>
    %c0_60 = arith.constant 0 : index
    %c0_61 = arith.constant 0 : index
    %c0_62 = arith.constant 0 : index
    %c0_63 = arith.constant 0 : index
    %85 = vector.load %arg15[%c0_60, %c0_61, %c0_62, %c0_63] : memref<1x1x8x1xf32, #tpu.memory_space<vmem>>, vector<1x1x8x1xf32>
    tpu.vector_store %arg15[%c0_60, %c0_61, %c0_62, %c0_63], %84 {strides = array<i32>} : memref<1x1x8x1xf32, #tpu.memory_space<vmem>>, vector<1x1x8x1xf32>,
    %86 = vector.shape_cast %81 : vector<8x512xf32> to vector<1x1x8x512xf32>
    %c0_64 = arith.constant 0 : index
    %c0_65 = arith.constant 0 : index
    %c0_66 = arith.constant 0 : index
    %c0_67 = arith.constant 0 : index
    %87 = vector.load %arg13[%c0_64, %c0_65, %c0_66, %c0_67] : memref<1x1x8x512xf32, #tpu.memory_space<vmem>>, vector<1x1x8x512xf32>
    tpu.vector_store %arg13[%c0_64, %c0_65, %c0_66, %c0_67], %86 {strides = array<i32>} : memref<1x1x8x512xf32, #tpu.memory_space<vmem>>, vector<1x1x8x512xf32>,
    return
  }
  func.func @transform_0(%arg0: i32, %arg1: i32, %arg2: i32) -> (i32, i32, i32, i32) {
    %c1_i32 = arith.constant 1 : i32
    %0 = arith.muli %arg1, %c1_i32 : i32
    %1 = arith.addi %0, %arg2 : i32
    %c0_i32 = arith.constant 0 : i32
    %c0_i32_0 = arith.constant 0 : i32
    %c0_i32_1 = arith.constant 0 : i32
    return %arg0, %1, %c0_i32, %c0_i32_0 : i32, i32, i32, i32
  }
  func.func @transform_1(%arg0: i32, %arg1: i32, %arg2: i32) -> (i32, i32, i32, i32, i32) {
    %c1_i32 = arith.constant 1 : i32
    %0 = arith.muli %arg1, %c1_i32 : i32
    %1 = arith.addi %0, %arg2 : i32
    %c0_i32 = arith.constant 0 : i32
    %c0_i32_0 = arith.constant 0 : i32
    %c0_i32_1 = arith.constant 0 : i32
    %c0_i32_2 = arith.constant 0 : i32
    return %arg0, %1, %c0_i32, %c0_i32_0, %c0_i32_1 : i32, i32, i32, i32, i32
  }
  func.func @transform_2(%arg0: i32, %arg1: i32, %arg2: i32) -> (i32, i32) {
    %c0_i32 = arith.constant 0 : i32
    %c0_i32_0 = arith.constant 0 : i32
    %c0_i32_1 = arith.constant 0 : i32
    return %c0_i32, %c0_i32_0 : i32, i32
  }
  func.func @transform_3(%arg0: i32, %arg1: i32, %arg2: i32) -> (i32, i32) {
    %c0_i32 = arith.constant 0 : i32
    %c0_i32_0 = arith.constant 0 : i32
    %c0_i32_1 = arith.constant 0 : i32
    return %c0_i32, %c0_i32_0 : i32, i32
  }
  func.func @transform_4(%arg0: i32, %arg1: i32, %arg2: i32) -> (i32, i32) {
    %c0_i32 = arith.constant 0 : i32
    %c0_i32_0 = arith.constant 0 : i32
    %c0_i32_1 = arith.constant 0 : i32
    return %c0_i32, %c0_i32_0 : i32, i32
  }
  func.func @transform_5(%arg0: i32, %arg1: i32, %arg2: i32) -> (i32, i32) {
    %c0_i32 = arith.constant 0 : i32
    %c0_i32_0 = arith.constant 0 : i32
    %c0_i32_1 = arith.constant 0 : i32
    return %c0_i32, %c0_i32_0 : i32, i32
  }
  func.func @transform_6(%arg0: i32, %arg1: i32, %arg2: i32) -> (i32, i32) {
    %c0_i32 = arith.constant 0 : i32
    %c0_i32_0 = arith.constant 0 : i32
    %c0_i32_1 = arith.constant 0 : i32
    return %c0_i32, %c0_i32_0 : i32, i32
  }
  func.func @transform_7(%arg0: i32, %arg1: i32, %arg2: i32) -> (i32, i32) {
    %c0_i32 = arith.constant 0 : i32
    %c0_i32_0 = arith.constant 0 : i32
    %c0_i32_1 = arith.constant 0 : i32
    return %c0_i32, %c0_i32_0 : i32, i32
  }
  func.func @transform_8(%arg0: i32, %arg1: i32, %arg2: i32) -> (i32, i32, i32) {
    %c1_i32 = arith.constant 1 : i32
    %0 = arith.muli %arg1, %c1_i32 : i32
    %1 = arith.addi %0, %arg2 : i32
    %c0_i32 = arith.constant 0 : i32
    %c0_i32_0 = arith.constant 0 : i32
    return %arg0, %c0_i32, %1 : i32, i32, i32
  }
  func.func @transform_9(%arg0: i32, %arg1: i32, %arg2: i32) -> (i32, i32, i32) {
    %c1_i32 = arith.constant 1 : i32
    %0 = arith.muli %arg1, %c1_i32 : i32
    %1 = arith.addi %0, %arg2 : i32
    %c0_i32 = arith.constant 0 : i32
    %c0_i32_0 = arith.constant 0 : i32
    return %arg0, %1, %c0_i32 : i32, i32, i32
  }
  func.func @transform_10(%arg0: i32, %arg1: i32, %arg2: i32) -> (i32, i32, i32, i32) {
    %c0_i32 = arith.constant 0 : i32
    %c0_i32_0 = arith.constant 0 : i32
    %c0_i32_1 = arith.constant 0 : i32
    return %arg0, %arg1, %c0_i32, %c0_i32_0 : i32, i32, i32, i32
  }
  func.func @transform_11(%arg0: i32, %arg1: i32, %arg2: i32) -> (i32, i32, i32, i32) {
    %c0_i32 = arith.constant 0 : i32
    %c0_i32_0 = arith.constant 0 : i32
    %c0_i32_1 = arith.constant 0 : i32
    return %arg0, %arg1, %c0_i32, %c0_i32_0 : i32, i32, i32, i32
  }
  func.func @transform_12(%arg0: i32, %arg1: i32, %arg2: i32) -> (i32, i32, i32, i32) {
    %c0_i32 = arith.constant 0 : i32
    %c0_i32_0 = arith.constant 0 : i32
    %c0_i32_1 = arith.constant 0 : i32
    return %arg0, %arg1, %c0_i32, %c0_i32_0 : i32, i32, i32, i32
  }
}

</mosaic_0001>

<bundles_post_ra>
// kernel: tpu_custom_call.1
= control target key start
LH: loop header
LB: loop body
LE: loop exit
PB: predicated region body
PF: predicated region fallthrough
CT: control target
= control target key end

     0   :  { %s7184_s0 = inlined_call_operand.vmem [shape: bf16[2,16,18,4], index: 0, kind: input, shape index: {}]   ;;  %s7185_s1 = inlined_call_operand.vmem [shape: bf16[2,1,2,18,4], index: 1, kind: input, shape index: {}]   ;;  %s7186_s2 = inlined_call_operand.vmem [shape: bf16[4,4], index: 2, kind: input, shape index: {}]   ;;  %s7187_s3 = inlined_call_operand.vmem [shape: f32[1,4], index: 3, kind: input, shape index: {}]   ;;  %s7188_s4 = inlined_call_operand.vmem [shape: bf16[4,8], index: 4, kind: input, shape index: {}]   ;;  %s7189_s5 = inlined_call_operand.vmem [shape: f32[1,8], index: 5, kind: input, shape index: {}]   ;;  %s7190_s6 = inlined_call_operand.vmem [shape: bf16[36,512], index: 6, kind: input, shape index: {}]   ;;  %s7191_s7 = inlined_call_operand.vmem [shape: f32[1,512], index: 7, kind: input, shape index: {}]   ;;  %s7192_s8 = inlined_call_operand.hbm [shape: f32[2,8,256], index: 8, kind: output, shape index: {0}]   ;;  %s7193_s9 = inlined_call_operand.hbm [shape: bf16[2,256,512], index: 9, kind: output, shape index: {1}]   ;;  %s7194_s10 = inlined_call_operand.hbm [shape: f32[2,1,8,512], index: 10, kind: output, shape index: {2}]   ;;  %s7195_s11 = inlined_call_operand.vmem [shape: f32[2,1,8,1], index: 11, kind: output, shape index: {3}]   ;;  %s7196_s12 = inlined_call_operand.vmem [shape: f32[2,1,8,1], index: 12, kind: output, shape index: {4}]  }
   0x1   :  { %7218 = sst [smem:[#allocation14_spill]] %s7184_s0 }
   0x2   :  { %7219 = sst [smem:[#allocation15_spill]] %s7185_s1 }
   0x3   :  { %7220 = sst [smem:[#allocation16_spill]] %s7186_s2 }
   0x4   :  { %7221 = sst [smem:[#allocation17_spill]] %s7187_s3 }
   0x5   :  { %7222 = sst [smem:[#allocation18_spill]] %s7188_s4 }
   0x6   :  { %7223 = sst [smem:[#allocation19_spill]] %s7189_s5 }
   0x7   :  { %7224 = sst [smem:[#allocation20_spill]] %s7190_s6 }
   0x8   :  { %18 = vsyncpa [#allocation4], 0 }
   0x9   :  { %20 = vsyncpa [#allocation4 + $0x1], 0 }
   0xa   :  { %21 = vsyncpa [#allocation6], 0 }
   0xb   :  { %23 = vsyncpa [#allocation6 + $0x1], 0  ;;  %s5354_s21 = smov 0   ;;  %s5356_s22 = smov 0  }
   0xc   :  { %s5358_s23 = smov 0   ;;  %s5360_s24 = smov 0  }
   0xd   :  { %s5362_s25 = smov 0   ;;  %s5364_s26 = smov 0  }
   0xe LB: > { %7225 = sst [smem:[#allocation10_spill]] %s5260_s23  ;;  %s7198_s27 = sadd.s32 4294967295, %s5272_s26   ;;  %s5272_s26 = sphi %s5364_s26, %s29_s26   ;;  %s5268_s25 = sphi %s5362_s25, %s7255_s25   ;;  %s5264_s24 = sphi %s5360_s24, %s7254_s24   ;;  %s5260_s23 = sphi %s5358_s23, %s7253_s23   ;;  %s5256_s22 = sphi %s5356_s22, %s7257_s22   ;;  %s5252_s21 = sphi %s5354_s21, %s7256_s21  }
   0xf   : > { %7226 = sst [smem:[#allocation11_spill]] %s5268_s25  ;;  %s7197_s28 = sadd.s32 4294967294, %s5272_s26  }
  0x10   : > { %s48_s29 = sadd.s32 1, %s5268_s25  ;;  %s245_s30 = sadd.s32 1, %s5260_s23 }
  0x11   : > { %p50_p0 = scmp.ge.s32.totalorder %s48_s29, 2  ;;  %p255_p1 = scmp.ne.s32.totalorder %s5260_s23, %s5256_s22 }
  0x12   : > { %p256_p2 = scmp.eq.s32.totalorder %s7198_s27, 1  ;;  %p261_p3 = scmp.ne.s32.totalorder %s5256_s22, %s5252_s21 }
  0x13   : > { %s7259_s29 = smov (%p50_p0, %s48_s29), 0  ;;  %p262_p5 = scmp.eq.s32.totalorder %s7197_s28, 1 }
  0x14   : > { %7227 = sst [smem:[#allocation12_spill]] %s7259_s29  ;;  %p5396_p4 = por %p256_p2, %p255_p1 }
  0x15   : > { %s240_s14 = ssub.s32 %s5268_s25, %s7259_s29  ;;  %p4591_p6 = scmp.ge.s32.totalorder %s5272_s26, 1 }
  0x16   : > { %p243_p7 = scmp.eq.s32.totalorder %s240_s14, 0  ;;  %p5405_p8 = por %p262_p5, %p261_p3 }
  0x17   : > { %p442_p9 = scmp.lt.s32.totalorder %s5272_s26, 3 }
  0x18   : > { %s5411_s16 = scalar_select %p243_p7, %s5260_s23, %s245_s30  }
  0x19   : > { %p443_p10 = pnand %p4591_p6, %p442_p9 }
  0x1a   : > { %7230 = sst [smem:[#allocation13_spill]] %s5411_s16  ;;  %vm1107_vm0 = vcmask (!%p443_p10), 1041408   ;;  %p526_p11 = scmp.lt.s32.totalorder (!%p443_p10), %s5264_s24, 1  ;;  %vm1546_vm1 = vcmask (!%p443_p10), 27648   ;;  %vm615_vm2 = vsmask.f32 (!%p443_p10), 3328 }
  0x1b   : > { %446 = sbr.rel (%p443_p10) target bundleno = 1191 (0x4a7), region = 52  ;;  %s7231_s2 = sld [smem:[#allocation16_spill]] (!%p443_p10)  ;;  %vm616_vm3 = vsmask.f32 (!%p443_p10), 7440  ;;  %vm1549_vm4 = vcmask (!%p443_p10), 24576   ;;  %vm1058_vm5 = vcmask (!%p443_p10), 31744  }
  0x1c   : > { %s7232_s0 = sld [smem:[#allocation14_spill]] (!%p443_p10)  ;;  %vm5448_vm6 = vmor (!%p443_p10), %vm615_vm2, %vm616_vm3  ;;  %s7235_s1 = sld [smem:[#allocation15_spill]] (!%p443_p10)  ;;  %vm2144_vm7 = vcmask (!%p443_p10), 1042432   ;;  %vm2145_vm8 = vcmask (!%p443_p10), 1046532   ;;  %vm2739_vm10 = vcmask (!%p443_p10), 64512   ;;  %vm2772_vm11 = vcmask (!%p443_p10), 97280  }
  0x1d   : > { %vm5834_vm9 = vmor (!%p443_p10), %vm2144_vm7, %vm2145_vm8  ;;  %s7201_s14 = smov (!%p443_p10), 24   ;;  %s7199_s18 = smov (!%p443_p10), 20   ;;  %vm2805_vm12 = vcmask (!%p443_p10), 130048   ;;  %vm2838_vm13 = vcmask (!%p443_p10), 162816   ;;  %vm2871_vm14 = vcmask (!%p443_p10), 195584   ;;  %vm2904_vm15 = vcmask (!%p443_p10), 228352  }
  0x1e   : > { %s7209_s27 = smov (!%p443_p10), 4   ;;  %s7238_s4 = sld [smem:[#allocation18_spill]] (!%p443_p10)  ;;  %vm2937_vm2 = vcmask (!%p443_p10), 261120   ;;  %vm3052_vm3 = vcmask (!%p443_p10), 293888  }
  0x1f   : > { %s7246_s6 = sld [smem:[#allocation20_spill]] (!%p443_p10)  ;;  %s7247_s25 = smov (!%p443_p10), 28  }
  0x20   : > { %s7248_s3 = sld [smem:[#allocation17_spill]] (!%p443_p10)  ;;  %s7249_s5 = sld [smem:[#allocation19_spill]] (!%p443_p10) }
  0x21   : > { %v1002_v0 = vld [vmem:[%s7231_s2] sm:$0x3] (!%p443_p10)  ;;  %s5285_s29 = smov (!%p443_p10), [#allocation5]  }
  0x22   : > { %5011 = vmatprep.subr.msk.bf16.mxu0 %vm1107_vm0, %v1002_v0  ;;  %v1109_v1 = vsel %vm1107_vm0, %v1002_v0, 0  ;;  %s5420_s19 = scalar_select %p526_p11, %s5264_s24, 1 }
  0x23   : > { %4944 = vmatpush3.bf16.msra.mxu0 %v1109_v1 }
  0x24   : > { %s5013_s20 = smul.u32 192, %s5420_s19 }
  0x25   : > { %s5014_s17 = smul.u32 24, %s5420_s19 }
  0x26   : > { %s5426_s28 = scalar_lea.vmem %s7232_s0, %s5013_s20  ;;  %s7207_s20 = smov 32  }
  0x27   : > { %v567_v2 = vld [vmem:[%s5426_s28] sm:$0xf]  ;;  %v568_v3 = vld [vmem:[%s5426_s28 + $0x4] sm:$0xf]  ;;  %v569_v4 = vld [vmem:[%s5426_s28 + $0x8] sm:$0x1]  ;;  %s5716_s30 = scalar_lea.vmem %s7235_s1, %s5014_s17 }
  0x28   : > { %v619_v5 = vshrl.u32 %v567_v2, 16  ;;  %v622_v6 = vshll.u32 %v567_v2, 16  ;;  %v628_v7 = vshll.u32 %v568_v3, 16  ;;  %v632_v8 = vshrl.u32 %v568_v3, 16  ;;  %1556 = vst.msk [vmem:[#allocation2 + $0xc] sm:$0xf] %vm1546_vm1, %v567_v2 }
  0x29   : > { %1557 = vst.msk [vmem:[#allocation2 + $0x10] sm:$0xf] %vm1546_vm1, %v568_v3  ;;  %v570_v9 = vld [vmem:[%s5426_s28 + $0xc] sm:$0xf]  ;;  %v638_v10 = vshll.u32 %v569_v4, 16  ;;  %s7211_s17 = smov 8  }
  0x2a   : > { %1558 = vst.msk [vmem:[#allocation2 + $0x14] sm:$0x1] %vm1549_vm4, %v569_v4  ;;  %v571_v11 = vld [vmem:[%s5426_s28 + $0x10] sm:$0xf]  ;;  %v572_v12 = vld [vmem:[%s5426_s28 + $0x14] sm:$0x1] }
  0x2b   : > { %v643_v13 = vshrl.u32 %v570_v9, 16  ;;  %1559 = vst.msk [vmem:[#allocation2 + $0x18] sm:$0xf] %vm1546_vm1, %v570_v9  ;;  %v621_v14 = vrot.slane %v619_v5, 4  ;;  %v624_v15 = vrot.slane %v622_v6, 5  ;;  %v630_v16 = vrot.slane %v628_v7, 5 }
  0x2c   : > { %v634_v17 = vrot.slane %v632_v8, 4  ;;  %1560 = vst.msk [vmem:[#allocation2 + $0x1c] sm:$0xf] %vm1546_vm1, %v571_v11  ;;  %v573_v18 = vld [vmem:[%s5426_s28 + $0x18] sm:$0xf]  ;;  %v640_v19 = vrot.slane %v638_v10, 5 }
  0x2d   : > { %1561 = vst.msk [vmem:[#allocation2 + $0x20] sm:$0x1] %vm1549_vm4, %v572_v12  ;;  %v645_v20 = vrot.slane %v643_v13, 4  ;;  %v646_v21 = vshll.u32 %v570_v9, 16  ;;  %v652_v22 = vshll.u32 %v571_v11, 16  ;;  %v625_v24 = vor.u32 %v624_v15, %v621_v14  ;;  %s7244_s0 = smov 8  }
  0x2e   : > { %v574_v23 = vld [vmem:[%s5426_s28 + $0x1c] sm:$0xf]  ;;  %1562 = vst.msk [vmem:[#allocation2 + $0x24] sm:$0xf] %vm1546_vm1, %v573_v18  ;;  %v635_v25 = vor.u32 %v634_v17, %v630_v16  ;;  %v656_v26 = vshrl.u32 %v571_v11, 16  ;;  %v662_v27 = vshll.u32 %v572_v12, 16 }
  0x2f   : > { %v575_v28 = vld [vmem:[%s5426_s28 + $0x20] sm:$0x1]  ;;  %1563 = vst.msk [vmem:[#allocation2 + $0x28] sm:$0xf] %vm1546_vm1, %v574_v23  ;;  %v576_v29 = vld [vmem:[%s5426_s28 + $0x24] sm:$0xf] }
  0x30   : > { %v648_v31 = vrot.slane %v646_v21, 5  ;;  %v654_v32 = vrot.slane %v652_v22, 5  ;;  %v667_v33 = vshrl.u32 %v573_v18, 16  ;;  %v670_v34 = vshll.u32 %v573_v18, 16  ;;  %1564 = vst.msk [vmem:[#allocation2 + $0x2c] sm:$0x1] %vm1549_vm4, %v575_v28 }
  0x31   : > { %v5454_v35 = vld [vmem:[%s5426_s28 + $0x28] sm:$0xf]  ;;  %1565 = vst.msk [vmem:[#allocation2 + $0x30] sm:$0xf] %vm1546_vm1, %v576_v29  ;;  %v626_v36 = vrot.slane %v625_v24, 4  ;;  %v636_v37 = vrot.slane %v635_v25, 4 }
  0x32   : > { %v658_v38 = vrot.slane %v656_v26, 4  ;;  %v664_v39 = vrot.slane %v662_v27, 5  ;;  %v5458_v40 = vld [vmem:[%s5426_s28 + $0x2c] sm:$0x1]  ;;  %1566 = vst.msk [vmem:[#allocation2 + $0x34] sm:$0xf] %vm1546_vm1, %v5454_v35  ;;  %v649_v41 = vor.u32 %v648_v31, %v645_v20 }
  0x33   : > { %v669_v42 = vrot.slane %v667_v33, 4  ;;  %v672_v43 = vrot.slane %v670_v34, 5  ;;  %v676_v44 = vshll.u32 %v574_v23, 16  ;;  %1567 = vst.msk [vmem:[#allocation2 + $0x38] sm:$0x1] %vm1549_vm4, %v5458_v40  ;;  %v631_v46 = vsel %vm5448_vm6, %v626_v36, %v630_v16  ;;  %s7245_s1 = smov 4  }
  0x34   : > { %v5465_v45 = vld [vmem:[%s5426_s28 + $0x30] sm:$0xf]  ;;  %v641_v47 = vsel %vm5448_vm6, %v636_v37, %v640_v19  ;;  %v659_v48 = vor.u32 %v658_v38, %v654_v32  ;;  %v680_v49 = vshrl.u32 %v574_v23, 16  ;;  %v5472_v50 = vld [vmem:[%s5426_s28 + $0x34] sm:$0xf]  ;;  %v650_v53 = vrot.slane %v649_v41, 4 }
  0x35   : > { %v5475_v51 = vld [vmem:[%s5426_s28 + $0x38] sm:$0x1]  ;;  %1568 = vst.msk [vmem:[#allocation2 + $0x3c] sm:$0xf] %vm1546_vm1, %v5465_v45  ;;  %v4600_v52 = vcombine.low %v631_v46, %v641_v47  ;;  %v673_v54 = vor.u32 %v672_v43, %v669_v42  ;;  %v678_v55 = vrot.slane %v676_v44, 5  ;;  %v686_v60 = vshll.u32 %v575_v28, 16 }
  0x36   : > { %1569 = vst.msk [vmem:[#allocation2 + $0x40] sm:$0xf] %vm1546_vm1, %v5472_v50  ;;  %v5484_v56 = vld [vmem:[%s5426_s28 + $0x3c] sm:$0xf]  ;;  %v5487_v57 = vld [vmem:[%s5426_s28 + $0x40] sm:$0xf]  ;;  %v655_v63 = vsel %vm5448_vm6, %v650_v53, %v654_v32 }
  0x37   : > { %1570 = vst.msk [vmem:[#allocation2 + $0x44] sm:$0x1] %vm1549_vm4, %v5475_v51  ;;  %v660_v58 = vrot.slane %v659_v48, 4  ;;  %v682_v59 = vrot.slane %v680_v49, 4  ;;  %v691_v61 = vshrl.u32 %v576_v29, 16  ;;  %4945 = vmatprep.mubr.msk.bf16.mxu0 %vm1058_vm5, %v4600_v52  ;;  %v674_v0 = vrot.slane %v673_v54, 4 }
  0x38   : > { %v5490_v62 = vld [vmem:[%s5426_s28 + $0x44] sm:$0x1]  ;;  %1571 = vst.msk [vmem:[#allocation2 + $0x48] sm:$0xf] %vm1546_vm1, %v5484_v56  ;;  %1572 = vst.msk [vmem:[#allocation2 + $0x4c] sm:$0xf] %vm1546_vm1, %v5487_v57 }
  0x39   : > { %v694_v1 = vshll.u32 %v576_v29, 16  ;;  %v700_v2 = vshll.u32 %v5454_v35, 16  ;;  %1573 = vst.msk [vmem:[#allocation2 + $0x50] sm:$0x1] %vm1549_vm4, %v5490_v62  ;;  %v5503_v3 = vld [vmem:[%s5426_s28 + $0x48] sm:$0xf]  ;;  %v665_v4 = vsel %vm5448_vm6, %v660_v58, %v664_v39  ;;  %v683_v5 = vor.u32 %v682_v59, %v678_v55 }
  0x3a   : > { %v688_v6 = vrot.slane %v686_v60, 5  ;;  %v693_v7 = vrot.slane %v691_v61, 4  ;;  %v5508_v8 = vld [vmem:[%s5426_s28 + $0x4c] sm:$0xf]  ;;  %v5511_v9 = vld [vmem:[%s5426_s28 + $0x50] sm:$0x1]  ;;  %v4601_v10 = vcombine.low %v655_v63, %v665_v4  ;;  %v679_v11 = vsel %vm5448_vm6, %v674_v0, %v678_v55 }
  0x3b   : > { %1574 = vst.msk [vmem:[#allocation2 + $0x54] sm:$0xf] %vm1546_vm1, %v5503_v3  ;;  %v696_v12 = vrot.slane %v694_v1, 5  ;;  %v5517_v13 = vrot.slane %v700_v2, 5  ;;  %1575 = vst.msk [vmem:[#allocation2 + $0x58] sm:$0xf] %vm1546_vm1, %v5508_v8 }
  0x3c   : > { %1576 = vst.msk [vmem:[#allocation2 + $0x5c] sm:$0x1] %vm1549_vm4, %v5511_v9  ;;  %v5524_v14 = vld [vmem:[%s5426_s28 + $0x54] sm:$0xf]  ;;  %v5527_v15 = vld [vmem:[%s5426_s28 + $0x58] sm:$0xf]  ;;  %4946 = vmatmul.mubr.msk.bf16.vlgmr.msra.gmra.mrb[0].mxu0 %vm1058_vm5, %v4601_v10 }
  0x3d   : > { %v684_v16 = vrot.slane %v683_v5, 4  ;;  %v704_v17 = vshrl.u32 %v5454_v35, 16  ;;  %v710_v18 = vshll.u32 %v5458_v40, 16  ;;  %v715_v19 = vshrl.u32 %v5465_v45, 16  ;;  %v5533_v20 = vld [vmem:[%s5426_s28 + $0x5c] sm:$0x1] }
  0x3e   : > { %1577 = vst.msk [vmem:[#allocation2 + $0x60] sm:$0xf] %vm1546_vm1, %v5524_v14  ;;  %1578 = vst.msk [vmem:[#allocation2 + $0x64] sm:$0xf] %vm1546_vm1, %v5527_v15  ;;  %v697_v21 = vor.u32 %v696_v12, %v693_v7  ;;  %v718_v22 = vshll.u32 %v5465_v45, 16  ;;  %v724_v23 = vshll.u32 %v5472_v50, 16 }
  0x3f   : > { %v728_v24 = vshrl.u32 %v5472_v50, 16  ;;  %1579 = vst.msk [vmem:[#allocation2 + $0x68] sm:$0x1] %vm1549_vm4, %v5533_v20  ;;  %v5546_v25 = vld [vmem:[%s5426_s28 + $0x60] sm:$0xf]  ;;  %v689_v26 = vsel %vm5448_vm6, %v684_v16, %v688_v6  ;;  %v706_v27 = vrot.slane %v704_v17, 4 }
  0x40   : > { %v712_v28 = vrot.slane %v710_v18, 5  ;;  %v717_v29 = vrot.slane %v715_v19, 4  ;;  %v5551_v31 = vld [vmem:[%s5426_s28 + $0x64] sm:$0xf]  ;;  %1580 = vst.msk [vmem:[#allocation2 + $0x6c] sm:$0xf] %vm1546_vm1, %v5546_v25  ;;  %v4602_v32 = vcombine.low %v679_v11, %v689_v26 }
  0x41   : > { %v698_v33 = vrot.slane %v697_v21, 4  ;;  %v720_v34 = vrot.slane %v718_v22, 5  ;;  %v726_v35 = vrot.slane %v724_v23, 5  ;;  %v5556_v36 = vld [vmem:[%s5426_s28 + $0x68] sm:$0x1]  ;;  %v707_v37 = vor.u32 %v706_v27, %v5517_v13 }
  0x42   : > { %1581 = vst.msk [vmem:[#allocation2 + $0x70] sm:$0xf] %vm1546_vm1, %v5551_v31  ;;  %v730_v38 = vrot.slane %v728_v24, 4  ;;  %v734_v39 = vshll.u32 %v5475_v51, 16  ;;  %v739_v40 = vshrl.u32 %v5484_v56, 16  ;;  %4949 = vmatprep.mubr.msk.bf16.mxu0 %vm1058_vm5, %v4602_v32  ;;  %v742_v44 = vshll.u32 %v5484_v56, 16 }
  0x43   : > { %1582 = vst.msk [vmem:[#allocation2 + $0x74] sm:$0x1] %vm1549_vm4, %v5556_v36  ;;  %v5566_v41 = vld [vmem:[%s5426_s28 + $0x6c] sm:$0xf]  ;;  %v703_v42 = vsel %vm5448_vm6, %v698_v33, %v5517_v13  ;;  %v721_v43 = vor.u32 %v720_v34, %v717_v29  ;;  %v748_v45 = vshll.u32 %v5487_v57, 16  ;;  %v708_v48 = vrot.slane %v707_v37, 4 }
  0x44   : > { %v5575_v46 = vld [vmem:[%s5426_s28 + $0x70] sm:$0xf]  ;;  %v5578_v47 = vld [vmem:[%s5426_s28 + $0x74] sm:$0x1]  ;;  %1583 = vst.msk [vmem:[#allocation2 + $0x78] sm:$0xf] %vm1546_vm1, %v5566_v41  ;;  %v731_v49 = vor.u32 %v730_v38, %v726_v35 }
  0x45   : > { %v736_v50 = vrot.slane %v734_v39, 5  ;;  %v741_v51 = vrot.slane %v739_v40, 4  ;;  %1584 = vst.msk [vmem:[#allocation2 + $0x7c] sm:$0xf] %vm1546_vm1, %v5575_v46  ;;  %v5587_v52 = vld [vmem:[%s5426_s28 + $0x78] sm:$0xf]  ;;  %v713_v59 = vsel %vm5448_vm6, %v708_v48, %v712_v28 }
  0x46   : > { %1585 = vst.msk [vmem:[#allocation2 + $0x80] sm:$0x1] %vm1549_vm4, %v5578_v47  ;;  %v722_v53 = vrot.slane %v721_v43, 4  ;;  %v744_v54 = vrot.slane %v742_v44, 5  ;;  %v750_v55 = vrot.slane %v748_v45, 5  ;;  %v752_v56 = vshrl.u32 %v5487_v57, 16 }
  0x47   : > { %v5591_v58 = vld [vmem:[%s5426_s28 + $0x7c] sm:$0xf]  ;;  %1586 = vst.msk [vmem:[#allocation2 + $0x84] sm:$0xf] %vm1546_vm1, %v5587_v52  ;;  %v732_v60 = vrot.slane %v731_v49, 4  ;;  %v758_v61 = vshll.u32 %v5490_v62, 16  ;;  %v4603_v57 = vcombine.low %v703_v42, %v713_v59 }
  0x48   : > { %v763_v63 = vshrl.u32 %v5503_v3, 16  ;;  %v5600_v0 = vld [vmem:[%s5426_s28 + $0x80] sm:$0x1]  ;;  %1587 = vst.msk [vmem:[#allocation2 + $0x88] sm:$0xf] %vm1546_vm1, %v5591_v58  ;;  %v727_v1 = vsel %vm5448_vm6, %v722_v53, %v726_v35  ;;  %v745_v2 = vor.u32 %v744_v54, %v741_v51  ;;  %v754_v4 = vrot.slane %v752_v56, 4 }
  0x49   : > { %1588 = vst.msk [vmem:[#allocation2 + $0x8c] sm:$0x1] %vm1549_vm4, %v5600_v0  ;;  %v5609_v5 = vld [vmem:[%s5426_s28 + $0x84] sm:$0xf]  ;;  %v5612_v62 = vld [vmem:[%s5426_s28 + $0x88] sm:$0xf]  ;;  %v737_v6 = vsel %vm5448_vm6, %v732_v60, %v736_v50  ;;  %4950 = vmatmul.mubr.msk.bf16.gmra.mrb[4].mxu0 %vm1058_vm5, %v4603_v57 }
  0x4a   : > { %v760_v7 = vrot.slane %v758_v61, 5  ;;  %v765_v10 = vrot.slane %v763_v63, 4  ;;  %v766_v11 = vshll.u32 %v5503_v3, 16  ;;  %v5618_v12 = vld [vmem:[%s5426_s28 + $0x8c] sm:$0x1]  ;;  %v4604_v13 = vcombine.low %v727_v1, %v737_v6 }
  0x4b   : > { %1589 = vst.msk [vmem:[#allocation2 + $0x90] sm:$0xf] %vm1546_vm1, %v5609_v5  ;;  %1590 = vst.msk [vmem:[#allocation2 + $0x94] sm:$0xf] %vm1546_vm1, %v5612_v62  ;;  %v746_v16 = vrot.slane %v745_v2, 4  ;;  %v755_v17 = vor.u32 %v754_v4, %v750_v55  ;;  %v772_v18 = vshll.u32 %v5508_v8, 16 }
  0x4c   : > { %1591 = vst.msk [vmem:[#allocation2 + $0x98] sm:$0x1] %vm1549_vm4, %v5618_v12  ;;  %v5629_v3 = vld [vmem:[%s5426_s28 + $0x90] sm:$0xf]  ;;  %v5632_v19 = vld [vmem:[%s5426_s28 + $0x94] sm:$0xf]  ;;  %4953 = vmatprep.mubr.msk.bf16.mxu0 %vm1058_vm5, %v4604_v13 }
  0x4d   : > { %v768_v21 = vrot.slane %v766_v11, 5  ;;  %v776_v22 = vshrl.u32 %v5508_v8, 16  ;;  %v782_v23 = vshll.u32 %v5511_v9, 16  ;;  %v787_v24 = vshrl.u32 %v5524_v14, 16  ;;  %v5638_v26 = vld [vmem:[%s5426_s28 + $0x98] sm:$0x1] }
  0x4e   : > { %1592 = vst.msk [vmem:[#allocation2 + $0x9c] sm:$0xf] %vm1546_vm1, %v5629_v3  ;;  %1593 = vst.msk [vmem:[#allocation2 + $0xa0] sm:$0xf] %vm1546_vm1, %v5632_v19  ;;  %v751_v27 = vsel %vm5448_vm6, %v746_v16, %v750_v55  ;;  %v756_v8 = vrot.slane %v755_v17, 4  ;;  %v774_v28 = vrot.slane %v772_v18, 5 }
  0x4f   : > { %v790_v9 = vshll.u32 %v5524_v14, 16  ;;  %1594 = vst.msk [vmem:[#allocation2 + $0xa4] sm:$0x1] %vm1549_vm4, %v5638_v26  ;;  %v5651_v29 = vld [vmem:[%s5426_s28 + $0x9c] sm:$0xf]  ;;  %v769_v32 = vor.u32 %v768_v21, %v765_v10  ;;  %v778_v33 = vrot.slane %v776_v22, 4 }
  0x50   : > { %v784_v34 = vrot.slane %v782_v23, 5  ;;  %v789_v35 = vrot.slane %v787_v24, 4  ;;  %v5654_v37 = vld [vmem:[%s5426_s28 + $0xa0] sm:$0xf]  ;;  %1595 = vst.msk [vmem:[#allocation2 + $0xa8] sm:$0xf] %vm1546_vm1, %v5651_v29  ;;  %v761_v38 = vsel %vm5448_vm6, %v756_v8, %v760_v7 }
  0x51   : > { %v792_v14 = vrot.slane %v790_v9, 5  ;;  %v796_v39 = vshll.u32 %v5527_v15, 16  ;;  %v800_v40 = vshrl.u32 %v5527_v15, 16  ;;  %v5663_v42 = vld [vmem:[%s5426_s28 + $0xa4] sm:$0x1]  ;;  %v4605_v43 = vcombine.low %v751_v27, %v761_v38 }
  0x52   : > { %1596 = vst.msk [vmem:[#allocation2 + $0xac] sm:$0xf] %vm1546_vm1, %v5654_v37  ;;  %v770_v44 = vrot.slane %v769_v32, 4  ;;  %v779_v45 = vor.u32 %v778_v33, %v774_v28  ;;  %v806_v48 = vshll.u32 %v5533_v20, 16  ;;  %v5671_v49 = vld [vmem:[%s5426_s28 + $0xa8] sm:$0xf] }
  0x53   : > { %1597 = vst.msk [vmem:[#allocation2 + $0xb0] sm:$0x1] %vm1549_vm4, %v5663_v42  ;;  %v5674_v50 = vld [vmem:[%s5426_s28 + $0xac] sm:$0xf]  ;;  %v793_v15 = vor.u32 %v792_v14, %v789_v35  ;;  %v798_v51 = vrot.slane %v796_v39, 5  ;;  %v802_v53 = vrot.slane %v800_v40, 4  ;;  %4954 = vmatmul.mubr.msk.bf16.gmra.mrb[8].mxu0 %vm1058_vm5, %v4605_v43 }
  0x54   : > { %v811_v54 = vshrl.u32 %v5546_v25, 16  ;;  %v5678_v55 = vld [vmem:[%s5426_s28 + $0xb0] sm:$0x1]  ;;  %1598 = vst.msk [vmem:[#allocation2 + $0xb4] sm:$0xf] %vm1546_vm1, %v5671_v49  ;;  %v775_v20 = vsel %vm5448_vm6, %v770_v44, %v774_v28  ;;  %v780_v56 = vrot.slane %v779_v45, 4 }
  0x55   : > { %1599 = vst.msk [vmem:[#allocation2 + $0xb8] sm:$0xf] %vm1546_vm1, %v5674_v50  ;;  %v808_v59 = vrot.slane %v806_v48, 5  ;;  %v814_v60 = vshll.u32 %v5546_v25, 16  ;;  %v5691_v61 = vld [vmem:[%s5426_s28 + $0xb4] sm:$0xf]  ;;  %v803_v57 = vor.u32 %v802_v53, %v798_v51 }
  0x56   : > { %1600 = vst.msk [vmem:[#allocation2 + $0xbc] sm:$0x1] %vm1549_vm4, %v5678_v55  ;;  %v794_v63 = vrot.slane %v793_v15, 4  ;;  %v813_v1 = vrot.slane %v811_v54, 4  ;;  %v820_v2 = vshll.u32 %v5551_v31, 16  ;;  %v785_v25 = vsel %vm5448_vm6, %v780_v56, %v784_v34 }
  0x57   : > { %v5696_v4 = vld [vmem:[%s5426_s28 + $0xb8] sm:$0xf]  ;;  %1601 = vst.msk [vmem:[#allocation2 + $0xc0] sm:$0xf] %vm1546_vm1, %v5691_v61  ;;  %v816_v6 = vrot.slane %v814_v60, 5  ;;  %v824_v7 = vshrl.u32 %v5551_v31, 16  ;;  %v4606_v13 = vcombine.low %v775_v20, %v785_v25 }
  0x58   : > { %v830_v10 = vshll.u32 %v5556_v36, 16  ;;  %v5705_v11 = vld [vmem:[%s5426_s28 + $0xbc] sm:$0x1]  ;;  %1602 = vst.msk [vmem:[#allocation2 + $0xc4] sm:$0xf] %vm1546_vm1, %v5696_v4  ;;  %v799_v16 = vsel %vm5448_vm6, %v794_v63, %v798_v51  ;;  %v804_v17 = vrot.slane %v803_v57, 4 }
  0x59   : > { %v822_v18 = vrot.slane %v820_v2, 5  ;;  %1603 = vst.msk [vmem:[#allocation2 + $0xc8] sm:$0x1] %vm1549_vm4, %v5705_v11  ;;  %v817_v31 = vor.u32 %v816_v6, %v813_v1  ;;  %v826_v36 = vrot.slane %v824_v7, 4  ;;  %v835_v22 = vshrl.u32 %v5566_v41, 16  ;;  %4957 = vmatprep.mubr.msk.bf16.mxu0 %vm1058_vm5, %v4606_v13  ;;  %s7203_s28 = smov 12  }
  0x5a   : > { %v832_v21 = vrot.slane %v830_v10, 5  ;;  %v809_v23 = vsel %vm5448_vm6, %v804_v17, %v808_v59  ;;  %v838_v24 = vshll.u32 %v5566_v41, 16  ;;  %v844_v27 = vshll.u32 %v5575_v46, 16  ;;  %v1540_v34 = vld [vmem:[%s5716_s30] sm:$0xf] }
  0x5b   : > { %v848_v8 = vshrl.u32 %v5575_v46, 16  ;;  %v4607_v28 = vcombine.low %v799_v16, %v809_v23  ;;  %v818_v9 = vrot.slane %v817_v31, 4  ;;  %v827_v32 = vor.u32 %v826_v36, %v822_v18  ;;  %v1541_v35 = vld [vmem:[%s5716_s30 + $0x4] sm:$0xf]  ;;  %v1542_v43 = vld [vmem:[%s5716_s30 + $0x8] sm:$0x1] }
  0x5c   : > { %v837_v33 = vrot.slane %v835_v22, 4  ;;  %v840_v38 = vrot.slane %v838_v24, 5  ;;  %v846_v14 = vrot.slane %v844_v27, 5  ;;  %v854_v40 = vshll.u32 %v5578_v47, 16  ;;  %1547 = vst.msk [vmem:[#allocation2] sm:$0xf] %vm1546_vm1, %v1540_v34 }
  0x5d   : > { %v850_v39 = vrot.slane %v848_v8, 4  ;;  %1548 = vst.msk [vmem:[#allocation2 + $0x4] sm:$0xf] %vm1546_vm1, %v1541_v35  ;;  %v823_v41 = vsel %vm5448_vm6, %v818_v9, %v822_v18  ;;  %v828_v46 = vrot.slane %v827_v32, 4  ;;  %v859_v44 = vshrl.u32 %v5587_v52, 16  ;;  %4958 = vmatmul.mubr.msk.bf16.gmra.mrb[12].mxu0 %vm1058_vm5, %v4607_v28 }
  0x5e   : > { %v862_v45 = vshll.u32 %v5587_v52, 16  ;;  %1550 = vst.msk [vmem:[#allocation2 + $0x8] sm:$0x1] %vm1549_vm4, %v1542_v43  ;;  %v841_v48 = vor.u32 %v840_v38, %v837_v33  ;;  %v856_v47 = vrot.slane %v854_v40, 5  ;;  %v868_v51 = vshll.u32 %v5591_v58, 16 }
  0x5f   : > { %v851_v15 = vor.u32 %v850_v39, %v846_v14  ;;  %v833_v53 = vsel %vm5448_vm6, %v828_v46, %v832_v21  ;;  %v861_v54 = vrot.slane %v859_v44, 4  ;;  %v872_v56 = vshrl.u32 %v5591_v58, 16 }
  0x60   : > { %v864_v20 = vrot.slane %v862_v45, 5  ;;  %v4608_v59 = vcombine.low %v823_v41, %v833_v53  ;;  %v842_v60 = vrot.slane %v841_v48, 4  ;;  %v870_v52 = vrot.slane %v868_v51, 5 }
  0x61   : > { %v852_v63 = vrot.slane %v851_v15, 4  ;;  %v874_v1 = vrot.slane %v872_v56, 4  ;;  %v878_v2 = vshll.u32 %v5600_v0, 16  ;;  %v883_v25 = vshrl.u32 %v5609_v5, 16 }
  0x62   : > { %v865_v57 = vor.u32 %v864_v20, %v861_v54  ;;  %4961 = vmatprep.mubr.msk.bf16.mxu0 %vm1058_vm5, %v4608_v59  ;;  %v847_v6 = vsel %vm5448_vm6, %v842_v60, %v846_v14  ;;  %v886_v58 = vshll.u32 %v5609_v5, 16  ;;  %v892_v10 = vshll.u32 %v5612_v62, 16 }
  0x63   : > { %v857_v7 = vsel %vm5448_vm6, %v852_v63, %v856_v47  ;;  %v875_v17 = vor.u32 %v874_v1, %v870_v52  ;;  %v880_v18 = vrot.slane %v878_v2, 5  ;;  %v885_v31 = vrot.slane %v883_v25, 4 }
  0x64   : > { %v4609_v13 = vcombine.low %v847_v6, %v857_v7  ;;  %v866_v16 = vrot.slane %v865_v57, 4  ;;  %v888_v0 = vrot.slane %v886_v58, 5  ;;  %v894_v36 = vrot.slane %v892_v10, 5 }
  0x65   : > { %v896_v21 = vshrl.u32 %v5612_v62, 16  ;;  %v876_v23 = vrot.slane %v875_v17, 4  ;;  %v902_v24 = vshll.u32 %v5618_v12, 16  ;;  %v907_v27 = vshrl.u32 %v5629_v3, 16 }
  0x66   : > { %v871_v22 = vsel %vm5448_vm6, %v866_v16, %v870_v52  ;;  %4962 = vmatmul.mubr.msk.bf16.gmra.mrb[16].mxu0 %vm1058_vm5, %v4609_v13  ;;  %v889_v5 = vor.u32 %v888_v0, %v885_v31  ;;  %v910_v28 = vshll.u32 %v5629_v3, 16  ;;  %v916_v9 = vshll.u32 %v5632_v19, 16 }
  0x67   : > { %v898_v8 = vrot.slane %v896_v21, 4  ;;  %v881_v32 = vsel %vm5448_vm6, %v876_v23, %v880_v18  ;;  %v904_v62 = vrot.slane %v902_v24, 5  ;;  %v909_v33 = vrot.slane %v907_v27, 4  ;;  %v5788_v24 = vld [vmem:[#allocation2 + $0xc] sm:$0xf] }
  0x68   : > { %v920_v34 = vshrl.u32 %v5632_v19, 16  ;;  %v4610_v35 = vcombine.low %v871_v22, %v881_v32  ;;  %v890_v38 = vrot.slane %v889_v5, 4  ;;  %v912_v14 = vrot.slane %v910_v28, 5 }
  0x69   : > { %v899_v12 = vor.u32 %v898_v8, %v894_v36  ;;  %v918_v39 = vrot.slane %v916_v9, 5  ;;  %v926_v43 = vshll.u32 %v5638_v26, 16  ;;  %v931_v41 = vshrl.u32 %v5651_v29, 16  ;;  %v5793_v8 = vld [vmem:[#allocation2 + $0x10] sm:$0xf] }
  0x6a   : > { %v922_v40 = vrot.slane %v920_v34, 4  ;;  %4965 = vmatprep.mubr.msk.bf16.mxu0 %vm1058_vm5, %v4610_v35  ;;  %v895_v3 = vsel %vm5448_vm6, %v890_v38, %v894_v36  ;;  %v913_v44 = vor.u32 %v912_v14, %v909_v33  ;;  %v934_v45 = vshll.u32 %v5651_v29, 16  ;;  %v5797_v38 = vld [vmem:[#allocation2 + $0x18] sm:$0xf] }
  0x6b   : > { %v900_v46 = vrot.slane %v899_v12, 4  ;;  %v928_v48 = vrot.slane %v926_v43, 5  ;;  %v933_v15 = vrot.slane %v931_v41, 4  ;;  %v940_v47 = vshll.u32 %v5654_v37, 16  ;;  %v5809_v43 = vld [vmem:[#allocation2] sm:$0xf] }
  0x6c   : > { %v923_v19 = vor.u32 %v922_v40, %v918_v39  ;;  %v914_v26 = vrot.slane %v913_v44, 4  ;;  %v936_v53 = vrot.slane %v934_v45, 5  ;;  %v944_v54 = vshrl.u32 %v5654_v37, 16  ;;  %v5807_v40 = vld [vmem:[#allocation2 + $0x1c] sm:$0xf] }
  0x6d   : > { %v905_v51 = vsel %vm5448_vm6, %v900_v46, %v904_v62  ;;  %v942_v59 = vrot.slane %v940_v47, 5  ;;  %v950_v60 = vshll.u32 %v5663_v42, 16  ;;  %v955_v57 = vshrl.u32 %v5671_v49, 16  ;;  %v5812_v44 = vld [vmem:[#allocation2 + $0x4] sm:$0xf] }
  0x6e   : > { %v4611_v20 = vcombine.low %v895_v3, %v905_v51  ;;  %v924_v56 = vrot.slane %v923_v19, 4  ;;  %v919_v29 = vsel %vm5448_vm6, %v914_v26, %v918_v39  ;;  %v937_v63 = vor.u32 %v936_v53, %v933_v15  ;;  %v1606_v47 = vld [vmem:[#allocation2 + $0x8] sm:$0x1] }
  0x6f   : > { %v946_v52 = vrot.slane %v944_v54, 4  ;;  %v952_v2 = vrot.slane %v950_v60, 5  ;;  %v958_v37 = vshll.u32 %v5671_v49, 16  ;;  %v964_v25 = vshll.u32 %v5674_v50, 16 }
  0x70   : > { %4966 = vmatmul.mubr.msk.bf16.gmra.mrb[20].mxu0 %vm1058_vm5, %v4611_v20  ;;  %v929_v1 = vsel %vm5448_vm6, %v924_v56, %v928_v48  ;;  %v938_v7 = vrot.slane %v937_v63, 4  ;;  %v957_v58 = vrot.slane %v955_v57, 4  ;;  %v968_v16 = vshrl.u32 %v5674_v50, 16  ;;  %v5824_v20 = vld [vmem:[#allocation2 + $0x24] sm:$0xf] }
  0x71   : > { %v4612_v6 = vcombine.low %v919_v29, %v929_v1  ;;  %v947_v42 = vor.u32 %v946_v52, %v942_v59  ;;  %v960_v10 = vrot.slane %v958_v37, 5  ;;  %v966_v13 = vrot.slane %v964_v25, 5  ;;  %v5838_v52 = vld [vmem:[#allocation2 + $0x28] sm:$0xf]  ;;  %v1609_v25 = vld [vmem:[#allocation2 + $0x14] sm:$0x1] }
  0x72   : > { %v974_v17 = vshll.u32 %v5678_v55, 16  ;;  %v943_v18 = vsel %vm5448_vm6, %v938_v7, %v942_v59  ;;  %v979_v31 = vshrl.u32 %v5691_v61, 16  ;;  %v982_v0 = vshll.u32 %v5691_v61, 16 }
  0x73   : > { %4969 = vmatprep.mubr.msk.bf16.mxu0 %vm1058_vm5, %v4612_v6  ;;  %v948_v49 = vrot.slane %v947_v42, 4  ;;  %v961_v36 = vor.u32 %v960_v10, %v957_v58  ;;  %v970_v21 = vrot.slane %v968_v16, 4  ;;  %v988_v23 = vshll.u32 %v5696_v4, 16  ;;  %v5852_v10 = vld [vmem:[#allocation2 + $0x20] sm:$0x1] }
  0x74   : > { %v976_v22 = vrot.slane %v974_v17, 5  ;;  %v981_v55 = vrot.slane %v979_v31, 4  ;;  %v984_v27 = vrot.slane %v982_v0, 5  ;;  %v992_v5 = vshrl.u32 %v5696_v4, 16 }
  0x75   : > { %v953_v50 = vsel %vm5448_vm6, %v948_v49, %v952_v2  ;;  %v962_v9 = vrot.slane %v961_v36, 4  ;;  %v971_v32 = vor.u32 %v970_v21, %v966_v13  ;;  %v990_v61 = vrot.slane %v988_v23, 5 }
  0x76   : > { %v4613_v28 = vcombine.low %v943_v18, %v953_v50  ;;  %v985_v62 = vor.u32 %v984_v27, %v981_v55  ;;  %v994_v33 = vrot.slane %v992_v5, 4  ;;  %v998_v34 = vshll.u32 %v5705_v11, 16 }
  0x77   : > { %v1692_v35 = vshll.u32 %v5793_v8, 16  ;;  %v967_v12 = vsel %vm5448_vm6, %v962_v9, %v966_v13  ;;  %v972_v4 = vrot.slane %v971_v32, 4  ;;  %v1696_v14 = vshrl.u32 %v5793_v8, 16 }
  0x78   : > { %4970 = vmatmul.mubr.msk.bf16.gmra.mrb[24].mxu0 %vm1058_vm5, %v4613_v28  ;;  %v5805_v39 = vcombine.low %v5788_v24, %v5793_v8  ;;  %v986_v11 = vrot.slane %v985_v62, 4  ;;  %v995_v41 = vor.u32 %v994_v33, %v990_v61  ;;  %v1000_v3 = vrot.slane %v998_v34, 5 }
  0x79   : > { %v1683_v46 = vshrl.u32 %v5788_v24, 16  ;;  %v977_v45 = vsel %vm5448_vm6, %v972_v4, %v976_v22  ;;  %v5816_v19 = vrot.slane %v1696_v14, 4  ;;  %v1686_v48 = vshll.u32 %v5788_v24, 16 }
  0x7a   : > { %2484 = vrot.lane.b32.xlu1 %v5805_v39, %s7203_s28  ;;  %v1720_v15 = vshrl.u32 %v5807_v40, 16  ;;  %v4614_v51 = vcombine.low %v967_v12, %v977_v45  ;;  %v991_v26 = vsel %vm5448_vm6, %v986_v11, %v990_v61  ;;  %v996_v53 = vrot.slane %v995_v41, 4 }
  0x7b   : > { %v1685_v54 = vrot.slane %v1683_v46, 4  ;;  %v1688_v56 = vrot.slane %v1686_v48, 5  ;;  %v5828_v59 = vcombine.low %v5797_v38, %v5807_v40  ;;  %v1707_v60 = vshrl.u32 %v5797_v38, 16 }
  0x7c   : > { %v1710_v29 = vshll.u32 %v5797_v38, 16  ;;  %4973 = vmatprep.mubr.msk.bf16.mxu0 %vm1058_vm5, %v4614_v51  ;;  %v1001_v57 = vsel %vm5448_vm6, %v996_v53, %v1000_v3  ;;  %v4649_v1 = vrot.slane %v5809_v43, 9  ;;  %v2149_v2 = vrot.slane %v5812_v44, 5 }
  0x7d   : > { %v2152_v37 = vrot.slane %v1606_v47, 5  ;;  %v4615_v6 = vcombine.low %v991_v26, %v1001_v57  ;;  %2486 = vrot.lane.b32.xlu0 %v5828_v59, %s7203_s28  ;;  %v1731_v7 = vshrl.u32 %v5824_v20, 16  ;;  %v1734_v42 = vshll.u32 %v5824_v20, 16  ;;  %s7240_s28 = smov 12  }
  0x7e   : > { %2589 = vrot.lane.b32.xlu1 %v5828_v59, %s7201_s14  ;;  %v1744_v58 = vshrl.u32 %v5838_v52, 16  ;;  %v2150_v13 = vsel %vm5834_vm9, %v4649_v1, %v2149_v2  ;;  %v2151_v16 = vrot.slane %v2149_v2, 4  ;;  %v5858_v17 = vcombine.low %v5824_v20, %v5838_v52 }
  0x7f   : > { %v4650_v18 = vrot.slane %v5788_v24, 9  ;;  %v2156_v49 = vrot.slane %v5793_v8, 5  ;;  %v2159_v31 = vrot.slane %v1609_v25, 5  ;;  %v4651_v0 = vrot.slane %v5797_v38, 9 }
  0x80   : > { %4974 = vmatmul.mubr.msk.bf16.gmra.mrb[28].mxu0 %vm1058_vm5, %v4615_v6  ;;  %v2163_v36 = vrot.slane %v5807_v40, 5  ;;  %v2153_v21 = vsel %vm5834_vm9, %v2151_v16, %v2152_v37  ;;  %v2166_v22 = vrot.slane %v5852_v10, 5  ;;  %v1659_v23 = vshrl.u32 %v5809_v43, 16 }
  0x81   : > { %v1662_v50 = vshll.u32 %v5809_v43, 16  ;;  %v4699_v55 = vcombine.low %v2150_v13, %v2153_v21  ;;  %v2157_v24 = vsel %vm5834_vm9, %v4650_v18, %v2156_v49  ;;  %v2158_v27 = vrot.slane %v2156_v49, 4 }
  0x82   : > { %2591 = vrot.lane.b32.xlu1 %v5858_v17, %s7201_s14  ;;  %v2164_v5 = vsel %vm5834_vm9, %v4651_v0, %v2163_v36  ;;  %v2165_v28 = vrot.slane %v2163_v36, 4  ;;  %v1661_v9 = vrot.slane %v1659_v23, 4  ;;  %v1668_v61 = vshll.u32 %v5812_v44, 16  ;;  %s7213_s14 = smov 28  }
  0x83   : > { %v1664_v32 = vrot.slane %v1662_v50, 5  ;;  %2449 = vrot.lane.b32.xlu0 %v4699_v55, %s7211_s17  ;;  %v2160_v62 = vsel %vm5834_vm9, %v2158_v27, %v2159_v31  ;;  %v1672_v33 = vshrl.u32 %v5812_v44, 16  ;;  %v1678_v34 = vshll.u32 %v1606_v47, 16  ;;  %v1615_v31 = vld [vmem:[#allocation2 + $0x2c] sm:$0x1] }
  0x84   : > { %v1689_v38 = vor.u32 %v1688_v56, %v1685_v54  ;;  %v4700_v12 = vcombine.low %v2157_v24, %v2160_v62  ;;  %v2167_v4 = vsel %vm5834_vm9, %v2165_v28, %v2166_v22  ;;  %v1670_v11 = vrot.slane %v1668_v61, 5 }
  0x85   : > { %v1665_v14 = vor.u32 %v1664_v32, %v1661_v9  ;;  %v5883_v41 = vcombine.low %v2164_v5, %v2167_v4  ;;  %v1674_v3 = vrot.slane %v1672_v33, 4  ;;  %v1680_v46 = vrot.slane %v1678_v34, 5  ;;  %v1617_v33 = vld [vmem:[#allocation2 + $0x34] sm:$0xf] }
  0x86   : > { %v1690_v45 = vrot.slane %v1689_v38, 4  ;;  %v1694_v51 = vrot.slane %v1692_v35, 5  ;;  %v1702_v26 = vshll.u32 %v1609_v25, 16  ;;  %v1709_v53 = vrot.slane %v1707_v60, 4 }
  0x87   : > { %v1666_v48 = vrot.slane %v1665_v14, 4  ;;  %2554 = vrot.lane.b32.xlu0 %v4700_v12, %s7199_s18  ;;  %2659 = vrot.lane.b32.xlu1 %v5883_v41, %s7207_s20  ;;  %v1675_v47 = vor.u32 %v1674_v3, %v1670_v11  ;;  %v1712_v54 = vrot.slane %v1710_v29, 5  ;;  %v1716_v56 = vshll.u32 %v5807_v40, 16 }
  0x88   : > { %v1722_v57 = vrot.slane %v1720_v15, 4  ;;  %v1695_v35 = vsel %vm5448_vm6, %v1690_v45, %v1694_v51  ;;  %v1699_v60 = vor.u32 %v5816_v19, %v1694_v51  ;;  %v1704_v1 = vrot.slane %v1702_v26, 5  ;;  %v1618_v51 = vld [vmem:[#allocation2 + $0x38] sm:$0x1] }
  0x89   : > { %v1671_v8 = vsel %vm5448_vm6, %v1666_v48, %v1670_v11  ;;  %v1676_v2 = vrot.slane %v1675_v47, 4  ;;  %v1713_v37 = vor.u32 %v1712_v54, %v1709_v53  ;;  %v1718_v25 = vrot.slane %v1716_v56, 5 }
  0x8a   : > { %v1726_v6 = vshll.u32 %v5852_v10, 16  ;;  %v1700_v29 = vrot.slane %v1699_v60, 4  ;;  %v1733_v13 = vrot.slane %v1731_v7, 4  ;;  %v1736_v16 = vrot.slane %v1734_v42, 5 }
  0x8b   : > { %v1740_v40 = vshll.u32 %v5838_v52, 16  ;;  %2556 = vrot.lane.b32.xlu0 %v5883_v41, %s7199_s18  ;;  %2451 = vrot.lane.b32.xlu1 %v4700_v12, %s7211_s17  ;;  %v1681_v15 = vsel %vm5448_vm6, %v1676_v2, %v1680_v46  ;;  %v1714_v19 = vrot.slane %v1713_v37, 4  ;;  %v1723_v18 = vor.u32 %v1722_v57, %v1718_v25  ;;  %s7205_s18 = smov 16   ;;  %v1320_v2 = vld [vmem:[%s7238_s4] sm:$0x3] }
  0x8c   : > { %v1728_v49 = vrot.slane %v1726_v6, 5  ;;  %v4683_v0 = vcombine.low %v1671_v8, %v1681_v15  ;;  %v1705_v10 = vsel %vm5448_vm6, %v1700_v29, %v1704_v1  ;;  %v1737_v7 = vor.u32 %v1736_v16, %v1733_v13  ;;  %5012 = vmatprep.subr.msk.bf16.mxu1 %vm1107_vm0, %v1320_v2  ;;  %v1620_v15 = vld [vmem:[#allocation2 + $0x40] sm:$0xf] }
  0x8d   : > { %v1742_v42 = vrot.slane %v1740_v40, 5  ;;  %v4684_v36 = vcombine.low %v1695_v35, %v1705_v10  ;;  %v1719_v21 = vsel %vm5448_vm6, %v1714_v19, %v1718_v25  ;;  %v1724_v22 = vrot.slane %v1723_v18, 4  ;;  %v1619_v40 = vld [vmem:[#allocation2 + $0x3c] sm:$0xf] }
  0x8e   : > { %v1746_v23 = vrot.slane %v1744_v58, 4  ;;  %v1750_v50 = vshll.u32 %v1615_v31, 16  ;;  %v4652_v55 = vrot.slane %v5824_v20, 9  ;;  %v2170_v24 = vrot.slane %v5838_v52, 5  ;;  %v1616_v58 = vld [vmem:[#allocation2 + $0x30] sm:$0xf] }
  0x8f   : > { %2369 = vrot.lane.b32.xlu0 %v4683_v0, %s7209_s27  ;;  %2519 = vrot.lane.b32.xlu1 %v4684_v36, %s7205_s18  ;;  %v1729_v27 = vsel %vm5448_vm6, %v1724_v22, %v1728_v49  ;;  %v1738_v5 = vrot.slane %v1737_v7, 4  ;;  %v2173_v9 = vrot.slane %v1615_v31, 5  ;;  %v1755_v12 = vshrl.u32 %v1616_v58, 16  ;;  %v1621_v22 = vld [vmem:[#allocation2 + $0x44] sm:$0x1] }
  0x90   : > { %v1747_v28 = vor.u32 %v1746_v23, %v1742_v42  ;;  %v4685_v32 = vcombine.low %v1719_v21, %v1729_v27  ;;  %v1752_v61 = vrot.slane %v1750_v50, 5  ;;  %v2171_v20 = vsel %vm5834_vm9, %v4652_v55, %v2170_v24 }
  0x91   : > { %v2172_v52 = vrot.slane %v2170_v24, 4  ;;  %v1743_v34 = vsel %vm5448_vm6, %v1738_v5, %v1742_v42  ;;  %v1758_v4 = vshll.u32 %v1616_v58, 16  ;;  %v1764_v3 = vshll.u32 %v1617_v33, 16 }
  0x92   : > { %v1748_v62 = vrot.slane %v1747_v28, 4  ;;  %v1768_v46 = vshrl.u32 %v1617_v33, 16  ;;  %v1757_v48 = vrot.slane %v1755_v12, 4  ;;  %v2177_v54 = vrot.slane %v1617_v33, 5 }
  0x93   : > { %2624 = vrot.lane.b32.xlu0 %v4685_v32, %s7213_s14  ;;  %2521 = vrot.lane.b32.xlu1 %v4685_v32, %s7205_s18  ;;  %v2174_v38 = vsel %vm5834_vm9, %v2172_v52, %v2173_v9  ;;  %v1760_v26 = vrot.slane %v1758_v4, 5  ;;  %v1766_v53 = vrot.slane %v1764_v3, 5  ;;  %v1774_v56 = vshll.u32 %v1618_v51, 16  ;;  %s7241_s18 = smov 24  }
  0x94   : > { %v1753_v14 = vsel %vm5448_vm6, %v1748_v62, %v1752_v61  ;;  %v4702_v11 = vcombine.low %v2171_v20, %v2174_v38  ;;  %v1770_v47 = vrot.slane %v1768_v46, 4  ;;  %v4653_v57 = vrot.slane %v1616_v58, 9  ;;  %v1623_v38 = vld [vmem:[#allocation2 + $0x4c] sm:$0xf] }
  0x95   : > { %v4686_v45 = vcombine.low %v1743_v34, %v1753_v14  ;;  %v1761_v8 = vor.u32 %v1760_v26, %v1757_v48  ;;  %v2179_v60 = vrot.slane %v2177_v54, 4  ;;  %v2180_v1 = vrot.slane %v1618_v51, 5  ;;  %v1622_v34 = vld [vmem:[#allocation2 + $0x48] sm:$0xf] }
  0x96   : > { %v1771_v35 = vor.u32 %v1770_v47, %v1766_v53  ;;  %v1776_v37 = vrot.slane %v1774_v56, 5  ;;  %v5937_v25 = vcombine.low %v1616_v58, %v1617_v33  ;;  %v1377_v6 = vsel %vm1107_vm0, %v1320_v2, 0 }
  0x97   : > { %2371 = vrot.lane.b32.xlu0 %v4684_v36, %s7209_s27  ;;  %2661 = vrot.lane.b32.xlu1 %v4702_v11, %s7207_s20  ;;  %s7239_s20 = smov 16   ;;  %v2178_v13 = vsel %vm5834_vm9, %v4653_v57, %v2177_v54  ;;  %v2181_v16 = vsel %vm5834_vm9, %v2179_v60, %v2180_v1  ;;  %v1779_v18 = vshrl.u32 %v1619_v40, 16  ;;  %v1782_v49 = vshll.u32 %v1619_v40, 16 }
  0x98   : > { %v1772_v29 = vrot.slane %v1771_v35, 4  ;;  %4978 = vmatpush3.bf16.msra.mxu1 %v1377_v6  ;;  %v4703_v19 = vcombine.low %v2178_v13, %v2181_v16  ;;  %v1788_v10 = vshll.u32 %v1620_v15, 16  ;;  %v1792_v7 = vshrl.u32 %v1620_v15, 16 }
  0x99   : > { %v1781_v36 = vrot.slane %v1779_v18, 4  ;;  %v1784_v21 = vrot.slane %v1782_v49, 5  ;;  %v2184_v55 = vrot.slane %v1620_v15, 5  ;;  %v1798_v27 = vshll.u32 %v1621_v22, 16 }
  0x9a   : > { %v1777_v0 = vsel %vm5448_vm6, %v1772_v29, %v1776_v37  ;;  %v1790_v23 = vrot.slane %v1788_v10, 5  ;;  %v1794_v50 = vrot.slane %v1792_v7, 4  ;;  %v4654_v28 = vrot.slane %v1619_v40, 9  ;;  %v1626_v29 = vld [vmem:[#allocation2 + $0x58] sm:$0xf] }
  0x9b   : > { %2626 = vrot.lane.b32.xlu0 %v4686_v45, %s7213_s14  ;;  %2453 = vrot.lane.b32.xlu1 %v5883_v41, %s7211_s17  ;;  %v1762_v41 = vrot.slane %v1761_v8, 4  ;;  %s7243_s17 = smov 32   ;;  %v1785_v24 = vor.u32 %v1784_v21, %v1781_v36  ;;  %v2186_v9 = vrot.slane %v2184_v55, 4  ;;  %v1800_v61 = vrot.slane %v1798_v27, 5 }
  0x9c   : > { %v1795_v5 = vor.u32 %v1794_v50, %v1790_v23  ;;  %v5959_v58 = vcombine.low %v1619_v40, %v1620_v15  ;;  %v2185_v52 = vsel %vm5834_vm9, %v4654_v28, %v2184_v55  ;;  %v1803_v4 = vshrl.u32 %v1622_v34, 16  ;;  %v1627_v50 = vld [vmem:[#allocation2 + $0x5c] sm:$0x1] }
  0x9d   : > { %v1767_v31 = vsel %vm5448_vm6, %v1762_v41, %v1766_v53  ;;  %v1786_v62 = vrot.slane %v1785_v24, 4  ;;  %v1806_v14 = vshll.u32 %v1622_v34, 16  ;;  %v1812_v46 = vshll.u32 %v1623_v38, 16  ;;  %v1624_v53 = vld [vmem:[#allocation2 + $0x50] sm:$0x1] }
  0x9e   : > { %v4687_v42 = vcombine.low %v1767_v31, %v1777_v0  ;;  %v1796_v20 = vrot.slane %v1795_v5, 4  ;;  %v1805_v51 = vrot.slane %v1803_v4, 4  ;;  %v2191_v56 = vrot.slane %v1623_v38, 5  ;;  %v1625_v41 = vld [vmem:[#allocation2 + $0x54] sm:$0xf] }
  0x9f   : > { %2373 = vrot.lane.b32.xlu0 %v4685_v32, %s7209_s27  ;;  %2523 = vrot.lane.b32.xlu1 %v4686_v45, %s7239_s20  ;;  %s7242_s27 = smov 20   ;;  %v2187_v32 = vrot.slane %v1621_v22, 5  ;;  %v1808_v26 = vrot.slane %v1806_v14, 5  ;;  %v1814_v47 = vrot.slane %v1812_v46, 5  ;;  %v1822_v8 = vshll.u32 %v1624_v53, 16 }
  0xa0   : > { %v1801_v3 = vsel %vm5448_vm6, %v1796_v20, %v1800_v61  ;;  %v4655_v60 = vrot.slane %v1622_v34, 9  ;;  %v2193_v1 = vrot.slane %v2191_v56, 4  ;;  %v2194_v2 = vrot.slane %v1624_v53, 5 }
  0xa1   : > { %v2188_v33 = vsel %vm5834_vm9, %v2186_v9, %v2187_v32  ;;  %v1809_v57 = vor.u32 %v1808_v26, %v1805_v51  ;;  %v5979_v6 = vcombine.low %v1622_v34, %v1623_v38  ;;  %v1824_v16 = vrot.slane %v1822_v8, 5  ;;  %v5102_v8 = vld [vmem:[%s7246_s6] ss:$16 sps:$4 sm:$0xff]  }
  0xa2   : > { %v4704_v12 = vcombine.low %v2185_v52, %v2188_v33  ;;  %v2192_v40 = vsel %vm5834_vm9, %v4655_v60, %v2191_v56  ;;  %v2195_v15 = vsel %vm5834_vm9, %v2193_v1, %v2194_v2  ;;  %v1830_v18 = vshll.u32 %v1625_v41, 16  ;;  %v1628_v33 = vld [vmem:[#allocation2 + $0x60] sm:$0xf]  ;;  %v1630_v56 = vld [vmem:[#allocation2 + $0x68] sm:$0x1] }
  0xa3   : > { %2488 = vrot.lane.b32.xlu0 %v5858_v17, %s7240_s28  ;;  %2593 = vrot.lane.b32.xlu1 %v5937_v25, %s7241_s18  ;;  %v1810_v37 = vrot.slane %v1809_v57, 4  ;;  %v1836_v49 = vshll.u32 %v1626_v29, 16  ;;  %v1840_v31 = vshrl.u32 %v1626_v29, 16  ;;  %v4705_v0 = vcombine.low %v2192_v40, %v2195_v15  ;;  %v5111_v40 = vld [vmem:[%s7246_s6 + $0x24] ss:$16 sps:$4 sm:$0xff]  }
  0xa4   : > { %v1832_v36 = vrot.slane %v1830_v18, 5  ;;  %v2198_v55 = vrot.slane %v1626_v29, 5  ;;  %v1846_v5 = vshll.u32 %v1627_v50, 16  ;;  %v4656_v28 = vrot.slane %v1625_v41, 9 }
  0xa5   : > { %v1815_v10 = vsel %vm5448_vm6, %v1810_v37, %v1814_v47  ;;  %v1838_v21 = vrot.slane %v1836_v49, 5  ;;  %v1842_v22 = vrot.slane %v1840_v31, 4  ;;  %v2201_v32 = vrot.slane %v1627_v50, 5  ;;  %v5107_v37 = vld [vmem:[%s7246_s6 + $0xc] ss:$16 sps:$4 sm:$0xff]  }
  0xa6   : > { %v2200_v9 = vrot.slane %v2198_v55, 4  ;;  %v1848_v20 = vrot.slane %v1846_v5, 5  ;;  %v5999_v52 = vcombine.low %v1625_v41, %v1626_v29  ;;  %v2199_v34 = vsel %vm5834_vm9, %v4656_v28, %v2198_v55  ;;  %3290 = vmatprep.subr.bf16.mxu1 %v5107_v37  ;;  %v2978_v31 = vld [vmem:[%s7246_s6 + $0x40] sm:$0x33] }
  0xa7   : > { %2558 = vrot.lane.b32.xlu0 %v4702_v11, %s7242_s27  ;;  %2663 = vrot.lane.b32.xlu1 %v4703_v19, %s7243_s17  ;;  %v1843_v27 = vor.u32 %v1842_v22, %v1838_v21  ;;  %v1854_v46 = vshll.u32 %v1628_v33, 16  ;;  %v1870_v2 = vshll.u32 %v1630_v56, 16 }
  0xa9   : > { %v1856_v53 = vrot.slane %v1854_v46, 5  ;;  %v1872_v18 = vrot.slane %v1870_v2, 5 }
  0xab   : > { %2628 = vrot.lane.b32.xlu0 %v4687_v42, %s7213_s14  ;;  %2455 = vrot.lane.b32.xlu1 %v4702_v11, %s7244_s0  ;;  %v1791_v11 = vsel %vm5448_vm6, %v1786_v62, %v1790_v23  ;;  %v1844_v62 = vrot.slane %v1843_v27, 4 }
  0xac   : > { %v4688_v48 = vcombine.low %v1791_v11, %v1801_v3  ;;  %v1851_v11 = vshrl.u32 %v1628_v33, 16 }
  0xad   : > { %v1849_v14 = vsel %vm5448_vm6, %v1844_v62, %v1848_v20  ;;  %v1633_v20 = vld [vmem:[#allocation2 + $0x74] sm:$0x1] }
  0xae   : > { %v1853_v26 = vrot.slane %v1851_v11, 4 }
  0xaf   : > { %2375 = vrot.lane.b32.xlu0 %v4686_v45, %s7245_s1  ;;  %2525 = vrot.lane.b32.xlu1 %v4687_v42, %s7239_s20  ;;  %v1816_v45 = vshrl.u32 %v1623_v38, 16  ;;  %v2202_v38 = vsel %vm5834_vm9, %v2200_v9, %v2201_v32 }
  0xb0   : > { %v6013_v3 = vcombine.low %v2199_v34, %v2202_v38  ;;  %v1857_v60 = vor.u32 %v1856_v53, %v1853_v26 }
  0xb1   : > { %v1818_v54 = vrot.slane %v1816_v45, 4 }
  0xb2   : > { %v1858_v15 = vrot.slane %v1857_v60, 4  ;;  %v1635_v60 = vld [vmem:[#allocation2 + $0x7c] sm:$0xf] }
  0xb3   : > { %2490 = vrot.lane.b32.xlu0 %v5937_v25, %s7240_s28  ;;  %2595 = vrot.lane.b32.xlu1 %v5959_v58, %s7241_s18  ;;  %v1819_v35 = vor.u32 %v1818_v54, %v1814_v47 }
  0xb5   : > { %v1820_v13 = vrot.slane %v1819_v35, 4  ;;  %v5104_v35 = vld [vmem:[%s7246_s6 + $0x4] ss:$16 sps:$4 sm:$0xff]  }
  0xb6   : > { %3097 = vmatprep.subr.bf16.mxu0 %v5104_v35 }
  0xb7   : > { %2560 = vrot.lane.b32.xlu0 %v4703_v19, %s7242_s27  ;;  %2665 = vrot.lane.b32.xlu1 %v4704_v12, %s7243_s17  ;;  %v1825_v7 = vsel %vm5448_vm6, %v1820_v13, %v1824_v16  ;;  %v2208_v13 = vrot.slane %v1630_v56, 5  ;;  %v5109_v16 = vld [vmem:[%s7246_s6 + $0x20] ss:$16 sps:$4 sm:$0xff]   ;;  %v1634_v56 = vld [vmem:[#allocation2 + $0x78] sm:$0xf] }
  0xb8   : > { %v4689_v23 = vcombine.low %v1815_v10, %v1825_v7  ;;  %3098 = vmatpush1.bf16.msra.mxu0 %v5102_v8  ;;  %v1631_v7 = vld [vmem:[#allocation2 + $0x6c] sm:$0xf]  ;;  %v1902_v2 = vshll.u32 %v1634_v56, 16 }
  0xb9   : > { %3099 = vmatprep.subr.bf16.mxu0 %v5111_v40  ;;  %v1875_v55 = vshrl.u32 %v1631_v7, 16  ;;  %v4658_v46 = vrot.slane %v1631_v7, 9 }
  0xbb   : > { %2630 = vrot.lane.b32.xlu0 %v4688_v48, %s7213_s14  ;;  %2457 = vrot.lane.b32.xlu1 %v4703_v19, %s7244_s0  ;;  %v1827_v19 = vshrl.u32 %v1625_v41, 16  ;;  %v4657_v41 = vrot.slane %v1628_v33, 9 }
  0xbc   : > { %3100 = vmatpush1.bf16.msra.mxu0 %v5109_v16 }
  0xbf   : > { %2377 = vrot.lane.b32.xlu0 %v4687_v42, %s7245_s1  ;;  %2527 = vrot.lane.b32.xlu1 %v4688_v48, %s7239_s20  ;;  %v1829_v42 = vrot.slane %v1827_v19, 4 }
  0xc1   : > { %v1833_v24 = vor.u32 %v1832_v36, %v1829_v42  ;;  %v4730_v42 = vcombine.high %v2978_v31, %v2978_v31  ;;  %v4729_v36 = vcombine.low %v2978_v31, %v2978_v31 }
  0xc3   : > { %2492 = vrot.lane.b32.xlu0 %v5959_v58, %s7240_s28  ;;  %2597 = vrot.lane.b32.xlu1 %v5979_v6, %s7241_s18  ;;  %v1834_v61 = vrot.slane %v1833_v24, 4  ;;  %v3086_v22 = vsel %vm1107_vm0, %v4729_v36, 0  ;;  %v1878_v24 = vshll.u32 %v1631_v7, 16 }
  0xc4   : > { %4733 = vmatprep.subr.msk.bf16.mxu0 %vm1107_vm0, %v4730_v42 }
  0xc5   : > { %v1839_v4 = vsel %vm5448_vm6, %v1834_v61, %v1838_v21  ;;  %v1632_v21 = vld [vmem:[#allocation2 + $0x70] sm:$0xf]  ;;  %3102 = vmatpush1.bf16.msra.mxu0 %v3086_v22  ;;  %v1877_v61 = vrot.slane %v1875_v55, 4  ;;  %v1880_v62 = vrot.slane %v1878_v24, 5  ;;  %v4659_v24 = vrot.slane %v1634_v56, 9 }
  0xc6   : > { %v6015_v51 = vcombine.low %v1839_v4, %v1849_v14  ;;  %v1884_v28 = vshll.u32 %v1632_v21, 16  ;;  %v1888_v9 = vshrl.u32 %v1632_v21, 16  ;;  %v2212_v38 = vrot.slane %v1632_v21, 5 }
  0xc7   : > { %2562 = vrot.lane.b32.xlu0 %v4704_v12, %s7242_s27  ;;  %2667 = vrot.lane.b32.xlu1 %v4705_v0, %s7243_s17  ;;  %v1881_v4 = vor.u32 %v1880_v62, %v1877_v61  ;;  %v1894_v14 = vshll.u32 %v1633_v20, 16  ;;  %v4667_v61 = vcombine.low %v5809_v43, %v5812_v44 }
  0xc8   : > { %v1890_v34 = vrot.slane %v1888_v9, 4  ;;  %v2213_v8 = vsel %vm5834_vm9, %v4658_v46, %v2212_v38 }
  0xcb   : > { %2632 = vrot.lane.b32.xlu0 %v4689_v23, %s7213_s14  ;;  %2459 = vrot.lane.b32.xlu1 %v4704_v12, %s7244_s0  ;;  %v1629_v12 = vld [vmem:[#allocation2 + $0x64] sm:$0xf]  ;;  %s4597_s14 = sshll.u32 %s5420_s19, 3  ;;  %s7250_s19 = sadd.s32 4294967295, %s5272_s26  }
  0xcc   : > { %v1860_v45 = vshll.u32 %v1629_v12, 16  ;;  %v2205_v57 = vrot.slane %v1629_v12, 5  ;;  %v6041_v49 = vcombine.low %v1628_v33, %v1629_v12  ;;  %v1886_v33 = vrot.slane %v1884_v28, 5 }
  0xce   : > { %v1862_v47 = vrot.slane %v1860_v45, 5  ;;  %v2207_v29 = vrot.slane %v2205_v57, 4  ;;  %v1891_v11 = vor.u32 %v1890_v34, %v1886_v33  ;;  %v2214_v45 = vrot.slane %v2212_v38, 4 }
  0xcf   : > { %2379 = vrot.lane.b32.xlu0 %v4688_v48, %s7245_s1  ;;  %2529 = vrot.lane.b32.xlu1 %v4689_v23, %s7239_s20  ;;  %v1864_v48 = vshrl.u32 %v1629_v12, 16 }
  0xd0   : > { %v2209_v10 = vsel %vm5834_vm9, %v2207_v29, %v2208_v13  ;;  %v1863_v27 = vsel %vm5448_vm6, %v1858_v15, %v1862_v47  ;;  %v1912_v29 = vshrl.u32 %v1635_v60, 16 }
  0xd1   : > { %v1866_v54 = vrot.slane %v1864_v48, 4  ;;  %v2215_v48 = vrot.slane %v1633_v20, 5 }
  0xd3   : > { %2494 = vrot.lane.b32.xlu0 %v5979_v6, %s7240_s28  ;;  %2599 = vrot.lane.b32.xlu1 %v5999_v52, %s7241_s18  ;;  %v1867_v1 = vor.u32 %v1866_v54, %v1862_v47  ;;  %v1882_v47 = vrot.slane %v1881_v4, 4  ;;  %v6076_v54 = vcombine.low %v1631_v7, %v1632_v21  ;;  %v2216_v35 = vsel %vm5834_vm9, %v2214_v45, %v2215_v48  ;;  %v6115_v4 = vld [vmem:[#allocation2 + $0x84] sm:$0xf] }
  0xd4   : > { %v6088_v37 = vcombine.low %v2213_v8, %v2216_v35  ;;  %v2219_v7 = vrot.slane %v1635_v60, 5 }
  0xd5   : > { %v1868_v19 = vrot.slane %v1867_v1, 4  ;;  %v1899_v1 = vshrl.u32 %v1634_v56, 16  ;;  %v1887_v13 = vsel %vm5448_vm6, %v1882_v47, %v1886_v33  ;;  %v1923_v47 = vshrl.u32 %v6115_v4, 16 }
  0xd6   : > { %v2220_v34 = vsel %vm5834_vm9, %v4659_v24, %v2219_v7 }
  0xd7   : > { %2564 = vrot.lane.b32.xlu0 %v4705_v0, %s7242_s27  ;;  %2669 = vrot.lane.b32.xlu1 %v6013_v3, %s7243_s17  ;;  %v1873_v5 = vsel %vm5448_vm6, %v1868_v19, %v1872_v18  ;;  %v1901_v15 = vrot.slane %v1899_v1, 4  ;;  %v1904_v19 = vrot.slane %v1902_v2, 5 }
  0xd8   : > { %v4691_v32 = vcombine.low %v1863_v27, %v1873_v5  ;;  %v2221_v27 = vrot.slane %v2219_v7, 4 }
  0xd9   : > { %v1905_v21 = vor.u32 %v1904_v19, %v1901_v15 }
  0xdb   : > { %2634 = vrot.lane.b32.xlu0 %v6015_v51, %s7247_s25  ;;  %2461 = vrot.lane.b32.xlu1 %v4705_v0, %s7244_s0  ;;  %v2206_v0 = vsel %vm5834_vm9, %v4657_v41, %v2205_v57  ;;  %v1896_v57 = vrot.slane %v1894_v14, 5  ;;  %v1908_v41 = vshll.u32 %v1635_v60, 16  ;;  %v1906_v62 = vrot.slane %v1905_v21, 4 }
  0xdc   : > { %v4707_v50 = vcombine.low %v2206_v0, %v2209_v10  ;;  %v1914_v0 = vrot.slane %v1912_v29, 4  ;;  %v1636_v10 = vld [vmem:[#allocation2 + $0x80] sm:$0x1]  ;;  %v1925_v29 = vrot.slane %v1923_v47, 4 }
  0xdd   : > { %v1910_v31 = vrot.slane %v1908_v41, 5  ;;  %v1918_v55 = vshll.u32 %v1636_v10, 16  ;;  %v2222_v5 = vrot.slane %v1636_v10, 5 }
  0xdf   : > { %2381 = vrot.lane.b32.xlu0 %v4689_v23, %s7245_s1  ;;  %2531 = vrot.lane.b32.xlu1 %v6015_v51, %s7239_s20  ;;  %v5282_v23 = vmov 0   ;;  %v1915_v22 = vor.u32 %v1914_v0, %v1910_v31  ;;  %v1920_v33 = vrot.slane %v1918_v55, 5  ;;  %v2223_v38 = vsel %vm5834_vm9, %v2221_v27, %v2222_v5  ;;  %v1639_v0 = vld [vmem:[#allocation2 + $0x8c] sm:$0x1] }
  0xe0   : > { %3129 = vmatprep.mubr.bf16.mxu0 %v5282_v23  ;;  %v6129_v48 = vcombine.low %v2220_v34, %v2223_v38  ;;  %v1942_v55 = vshll.u32 %v1639_v0, 16  ;;  %v4660_v5 = vrot.slane %v6115_v4, 9 }
  0xe1   : > { %v1916_v20 = vrot.slane %v1915_v22, 4 }
  0xe2   : > { %v1944_v38 = vrot.slane %v1942_v55, 5 }
  0xe3   : > { %2496 = vrot.lane.b32.xlu0 %v5999_v52, %s7240_s28  ;;  %2601 = vrot.lane.b32.xlu1 %v6041_v49, %s7241_s18  ;;  %v1921_v45 = vsel %vm5448_vm6, %v1916_v20, %v1920_v33 }
  0xe7   : > { %2566 = vrot.lane.b32.xlu0 %v6013_v3, %s7242_s27  ;;  %2671 = vrot.lane.b32.xlu1 %v4707_v50, %s7243_s17 }
  0xeb   : > { %2636 = vrot.lane.b32.xlu0 %v4691_v32, %s7247_s25  ;;  %2463 = vrot.lane.b32.xlu1 %v6013_v3, %s7244_s0  ;;  %v1892_v3 = vrot.slane %v1891_v11, 4  ;;  %v1911_v11 = vsel %vm5448_vm6, %v1906_v62, %v1910_v31 }
  0xec   : > { %v6065_v12 = vpop.permute.xlu1 %2484 }
  0xed   : > { %v1897_v16 = vsel %vm5448_vm6, %v1892_v3, %v1896_v57  ;;  %v1926_v3 = vshll.u32 %v6115_v4, 16 }
  0xee   : > { %v6095_v18 = vcombine.low %v1887_v13, %v1897_v16 }
  0xef   : > { %v6069_v26 = vpop.permute.xlu0 %2486  ;;  %2383 = vrot.lane.b32.xlu0 %v6015_v51, %s7245_s1  ;;  %2533 = vrot.lane.b32.xlu1 %v4691_v32, %s7239_s20  ;;  %v1928_v16 = vrot.slane %v1926_v3, 5  ;;  %v6211_v3 = vld [vmem:[%s7248_s3] ss:$0 sm:$0xff] }
  0xf0   : > { %v6073_v53 = vpop.permute.xlu1 %2589 }
  0xf1   : > { %v1929_v21 = vor.u32 %v1928_v16, %v1925_v29 }
  0xf3   : > { %2498 = vrot.lane.b32.xlu0 %v6041_v49, %s7240_s28  ;;  %2603 = vrot.lane.b32.xlu1 %v6076_v54, %s7241_s18  ;;  %v1930_v33 = vrot.slane %v1929_v21, 4 }
  0xf4   : > { %v6084_v51 = vpop.permute.xlu1 %2591 }
  0xf5   : > { %v2450_v40 = vpop.permute.xlu0 %2449 }
  0xf7   : > { %2568 = vrot.lane.b32.xlu0 %v4707_v50, %s7242_s27  ;;  %2673 = vrot.lane.b32.xlu1 %v6088_v37, %s7243_s17 }
  0xf9   : > { %v2555_v42 = vpop.permute.xlu0 %2554  ;;  %v2660_v36 = vpop.permute.xlu1 %2659 }
  0xfb   : > { %2638 = vrot.lane.b32.xlu0 %v6095_v18, %s7247_s25  ;;  %2465 = vrot.lane.b32.xlu1 %v4707_v50, %s7244_s0  ;;  %v6109_v50 = vcombine.low %v1634_v56, %v1635_v60 }
  0xfd   : > { %v6102_v28 = vpop.permute.xlu0 %2556  ;;  %v2452_v9 = vpop.permute.xlu1 %2451 }
  0xff   : > { %2385 = vrot.lane.b32.xlu0 %v4691_v32, %s7245_s1  ;;  %2535 = vrot.lane.b32.xlu1 %v6095_v18, %s7239_s20  ;;  %v6117_v32 = vld [vmem:[#allocation2 + $0x88] sm:$0xf] }
 0x100   : > { %v1932_v57 = vshll.u32 %v6117_v32, 16  ;;  %v1936_v8 = vshrl.u32 %v6117_v32, 16  ;;  %v2226_v10 = vrot.slane %v6117_v32, 5 }
 0x101   : > { %v2370_v43 = vpop.permute.xlu0 %2369  ;;  %v2520_v44 = vpop.permute.xlu1 %2519 }
 0x102   : > { %v2693_v14 = vsel %vm1058_vm5, %v4667_v61, %v2370_v43  ;;  %v1938_v15 = vrot.slane %v1936_v8, 4  ;;  %v2229_v61 = vrot.slane %v1639_v0, 5  ;;  %v6179_v43 = vld [vmem:[#allocation2 + $0x90] sm:$0xf] }
 0x103   : > { %v2741_v46 = vsel %vm2739_vm10, %v2693_v14, %v2450_v40  ;;  %2500 = vrot.lane.b32.xlu0 %v6076_v54, %s7240_s28  ;;  %2605 = vrot.lane.b32.xlu1 %v6109_v50, %s7241_s18  ;;  %v1934_v40 = vrot.slane %v1932_v57, 5  ;;  %v6192_v14 = vld [vmem:[#allocation2 + $0x94] sm:$0xf] }
 0x104   : > { %v2774_v56 = vsel %vm2772_vm11, %v2741_v46, %v6065_v12  ;;  %v6143_v12 = vcombine.low %v1911_v11, %v1921_v45  ;;  %v1947_v46 = vshrl.u32 %v6179_v43, 16  ;;  %v1950_v45 = vshll.u32 %v6179_v43, 16 }
 0x105   : > { %v2807_v35 = vsel %vm2805_vm12, %v2774_v56, %v2520_v44  ;;  %v2625_v60 = vpop.permute.xlu0 %2624  ;;  %v2522_v1 = vpop.permute.xlu1 %2521  ;;  %v1939_v22 = vor.u32 %v1938_v15, %v1934_v40  ;;  %v1935_v47 = vsel %vm5448_vm6, %v1930_v33, %v1934_v40 }
 0x106   : > { %v2840_v2 = vsel %vm2838_vm13, %v2807_v35, %v2555_v42  ;;  %v1956_v35 = vshll.u32 %v6192_v14, 16  ;;  %v1952_v16 = vrot.slane %v1950_v45, 5  ;;  %v1545_v45 = vld [vmem:[%s5716_s30 + $0x14] sm:$0x1] }
 0x107   : > { %v2873_v41 = vsel %vm2871_vm14, %v2840_v2, %v6073_v53  ;;  %2570 = vrot.lane.b32.xlu0 %v6088_v37, %s7242_s27  ;;  %2675 = vrot.lane.b32.xlu1 %v6129_v48, %s7243_s17  ;;  %v1940_v34 = vrot.slane %v1939_v22, 4  ;;  %1554 = vst.msk [vmem:[#allocation2 + $0xd4] sm:$0x1] %vm1549_vm4, %v1545_v45 }
 0x108   : > { %v2906_v13 = vsel %vm2904_vm15, %v2873_v41, %v2625_v60  ;;  %v1960_v60 = vshrl.u32 %v6192_v14, 16 }
 0x109   : > { %v6149_v19 = vsel %vm2937_vm2, %v2906_v13, %v2660_v36  ;;  %v2372_v31 = vpop.permute.xlu0 %2371  ;;  %v2662_v53 = vpop.permute.xlu1 %2661  ;;  %v1945_v56 = vsel %vm5448_vm6, %v1940_v34, %v1944_v38  ;;  %v1949_v13 = vrot.slane %v1947_v46, 4  ;;  %v1544_v46 = vld [vmem:[%s5716_s30 + $0x10] sm:$0xf] }
 0x10a   : > { %v2696_v7 = vsel %vm1058_vm5, %v5805_v39, %v2372_v31  ;;  %4734 = vmatmul.mubr.msk.bf16.vlgmr.msra.gmra.mrb[32].mxu0 %vm3052_vm3, %v6149_v19  ;;  %v6218_v41 = vcombine.low %v1935_v47, %v1945_v56  ;;  %v1642_v31 = vld [vmem:[#allocation2 + $0x98] sm:$0x1]  ;;  %v2979_v56 = vld [vmem:[%s7246_s6 + $0x48] sm:$0x33]  ;;  %1553 = vst.msk [vmem:[#allocation2 + $0xd0] sm:$0xf] %vm1546_vm1, %v1544_v46 }
 0x10b   : > { %v2743_v42 = vsel %vm2739_vm10, %v2696_v7, %v2452_v9  ;;  %2640 = vrot.lane.b32.xlu0 %v6143_v12, %s7247_s25  ;;  %3139 = vmatprep.mubr.bf16.mxu0 %v5282_v23  ;;  %v2228_v9 = vrot.slane %v2226_v10, 4  ;;  %v6225_v7 = vrot.slane %v1956_v35, 5  ;;  %v5114_v35 = vld [vmem:[%s7246_s6 + $0x2c] ss:$16 sps:$4 sm:$0xff]  }
 0x10c   : > { %v2776_v36 = vsel %vm2772_vm11, %v2743_v42, %v6069_v26  ;;  %2467 = vrot.lane.b32.xlu1 %v6088_v37, %s7244_s0  ;;  %v6174_v37 = vcombine.low %v6115_v4, %v6117_v32  ;;  %v1962_v42 = vrot.slane %v1960_v60, 4 }
 0x10d   : > { %v2809_v39 = vsel %vm2805_vm12, %v2776_v36, %v2522_v1  ;;  %v2627_v24 = vpop.permute.xlu0 %2626  ;;  %v2454_v27 = vpop.permute.xlu1 %2453  ;;  %v2230_v4 = vsel %vm5834_vm9, %v2228_v9, %v2229_v61  ;;  %v2233_v36 = vrot.slane %v6192_v14, 5  ;;  %v1966_v9 = vshll.u32 %v1642_v31, 16 }
 0x10e   : > { %v2842_v62 = vsel %vm2838_vm13, %v2809_v39, %v6102_v28 }
 0x10f   : > { %v2875_v26 = vsel %vm2871_vm14, %v2842_v62, %v6084_v51  ;;  %2387 = vrot.lane.b32.xlu0 %v6095_v18, %s7245_s1  ;;  %v2227_v18 = vsel %vm5834_vm9, %v4660_v5, %v2226_v10  ;;  %v4947_v2 = vpop.f32.mrb[0].mxu0  ;;  %v1953_v5 = vor.u32 %v1952_v16, %v1949_v13 }
 0x110   : > { %v2908_v20 = vsel %vm2904_vm15, %v2875_v26, %v2627_v24  ;;  %2537 = vrot.lane.b32.xlu1 %v6143_v12, %s7239_s20  ;;  %v1154_v40 = vadd.f32 %v4947_v2, %v6211_v3  ;;  %v1145_v15 = vpop.f32.mrb[1].mxu0  ;;  %v4661_v26 = vrot.slane %v6179_v43, 9  ;;  %v1968_v2 = vrot.slane %v1966_v9, 5 }
 0x111   : > { %v6182_v28 = vsel %vm2937_vm2, %v2908_v20, %v2662_v53  ;;  %v2374_v51 = vpop.permute.xlu0 %2373  ;;  %v2524_v44 = vpop.permute.xlu1 %2523  ;;  %v1146_v53 = vadd.f32 %v6211_v3, %v1145_v15  ;;  %v2236_v20 = vrot.slane %v1642_v31, 5  ;;  %v4731_v31 = vcombine.low %v2979_v56, %v2979_v56 }
 0x112   : > { %4735 = vmatmul.mubr.msk.bf16.gmra.mrb[36].mxu0 %vm3052_vm3, %v6182_v28  ;;  %v2699_v32 = vsel %vm1058_vm5, %v5828_v59, %v2374_v51  ;;  %v6206_v59 = vcombine.low %v2227_v18, %v2230_v4  ;;  %v4948_v0 = vpop.f32.mrb[2].mxu0  ;;  %v1274_v61 = vmax.f32 %v1154_v40, 0.0  ;;  %v1963_v51 = vor.u32 %v1962_v42, %v6225_v7  ;;  %v1543_v18 = vld [vmem:[%s5716_s30 + $0xc] sm:$0xf]  ;;  %v6273_v40 = vld [vmem:[#allocation2 + $0x9c] sm:$0xf]  ;;  %s6874_s30 = scalar_lea.vmem %s7195_s11, %s4597_s14 }
 0x113   : > { %2502 = vrot.lane.b32.xlu0 %v6109_v50, %s7240_s28  ;;  %v2745_v11 = vsel %vm2739_vm10, %v2699_v32, %v2454_v27  ;;  %3149 = vmatprep.mubr.bf16.mxu0 %v5282_v23  ;;  %v1157_v21 = vadd.f32 %v4948_v0, %v6211_v3  ;;  %v1148_v22 = vpop.f32.mrb[3].mxu0  ;;  %v1272_v33 = vmax.f32 %v1146_v53, 0.0  ;;  %1552 = vst.msk [vmem:[#allocation2 + $0xcc] sm:$0xf] %vm1546_vm1, %v1543_v18 }
 0x114   : > { %2607 = vrot.lane.b32.xlu1 %v6174_v37, %s7241_s18  ;;  %v1149_v24 = vadd.f32 %v6211_v3, %v1148_v22  ;;  %v2234_v13 = vsel %vm5834_vm9, %v4661_v26, %v2233_v36 }
 0x115   : > { %v2489_v57 = vpop.permute.xlu0 %2488  ;;  %v2594_v8 = vpop.permute.xlu1 %2593  ;;  %v1275_v62 = vmax.f32 %v1157_v21, 0.0  ;;  %v5112_v21 = vld [vmem:[%s7246_s6 + $0x28] ss:$16 sps:$4 sm:$0xff]  }
 0x116   : > { %v2778_v1 = vsel %vm2772_vm11, %v2745_v11, %v2489_v57  ;;  %v1273_v34 = vmax.f32 %v1149_v24, 0.0 }
 0x117   : > { %2572 = vrot.lane.b32.xlu0 %v6129_v48, %s7242_s27  ;;  %v2811_v29 = vsel %vm2805_vm12, %v2778_v1, %v2524_v44  ;;  %v2235_v44 = vrot.slane %v2233_v36, 4  ;;  %v1305_v4 = vpack.c.bf16 %v1275_v62, %v1274_v61  ;;  %v1964_v1 = vrot.slane %v1963_v51, 4 }
 0x118   : > { %2677 = vrot.lane.b32.xlu1 %v6206_v59, %s7243_s17  ;;  %v1304_v47 = vpack.c.bf16 %v1273_v34, %v1272_v33 }
 0x119   : > { %v2559_v10 = vpop.permute.xlu0 %2558  ;;  %v2664_v39 = vpop.permute.xlu1 %2663  ;;  %v2237_v16 = vsel %vm5834_vm9, %v2235_v44, %v2236_v20 }
 0x11a   : > { %v2844_v55 = vsel %vm2838_vm13, %v2811_v29, %v2559_v10  ;;  %4979 = vmatprep.mubr.msk.bf16.mxu1 %vm1058_vm5, %v1304_v47  ;;  %v6279_v10 = vld [vmem:[#allocation2 + $0xa0] sm:$0xf]  ;;  %v6294_v24 = vcombine.low %v2234_v13, %v2237_v16 }
 0x11b   : > { %2642 = vrot.lane.b32.xlu0 %v6218_v41, %s7247_s25  ;;  %v2877_v27 = vsel %vm2871_vm14, %v2844_v55, %v2594_v8  ;;  %v1954_v8 = vrot.slane %v1953_v5, 4  ;;  %4980 = vmatmul.mubr.msk.bf16.vlgmr.msra.gmra.mrb[0].mxu1 %vm1058_vm5, %v1305_v4  ;;  %v1974_v5 = vshll.u32 %v6273_v40, 16  ;;  %v1980_v62 = vshll.u32 %v6279_v10, 16 }
 0x11c   : > { %2469 = vrot.lane.b32.xlu1 %v6129_v48, %s7244_s0  ;;  %v5105_v48 = vld [vmem:[%s7246_s6 + $0x8] ss:$16 sps:$4 sm:$0xff]   ;;  %v4951_v60 = vpop.f32.mrb[4].mxu0  ;;  %v1984_v26 = vshrl.u32 %v6279_v10, 16  ;;  %v2240_v16 = vrot.slane %v6279_v10, 5 }
 0x11d   : > { %v2629_v38 = vpop.permute.xlu0 %2628  ;;  %v2456_v11 = vpop.permute.xlu1 %2455  ;;  %v1170_v15 = vadd.f32 %v4951_v60, %v6211_v3  ;;  %3291 = vmatpush1.bf16.msra.mxu1 %v5105_v48  ;;  %v1959_v22 = vsel %vm5448_vm6, %v1954_v8, %v6225_v7  ;;  %v1969_v7 = vsel %vm5448_vm6, %v1964_v1, %v1968_v2  ;;  %v1976_v8 = vrot.slane %v1974_v5, 5 }
 0x11e   : > { %v2910_v32 = vsel %vm2904_vm15, %v2877_v27, %v2629_v38  ;;  %3292 = vmatprep.subr.bf16.mxu1 %v5114_v35  ;;  %v1971_v27 = vshrl.u32 %v6273_v40, 16  ;;  %v6313_v35 = vrot.slane %v1980_v62, 5  ;;  %v1986_v60 = vrot.slane %v1984_v26, 4 }
 0x11f   : > { %2389 = vrot.lane.b32.xlu0 %v6143_v12, %s7245_s1  ;;  %v6252_v57 = vsel %vm2937_vm2, %v2910_v32, %v2664_v39  ;;  %v6265_v12 = vcombine.low %v6179_v43, %v6192_v14  ;;  %v1161_v43 = vpop.f32.mrb[5].mxu0  ;;  %v4732_v14 = vcombine.high %v2979_v56, %v2979_v56  ;;  %v1278_v20 = vmax.f32 %v1170_v15, 0.0  ;;  %v1645_v56 = vld [vmem:[#allocation2 + $0xa4] sm:$0x1] }
 0x120   : > { %4736 = vmatmul.mubr.msk.bf16.gmra.mrb[40].mxu0 %vm3052_vm3, %v6252_v57  ;;  %2539 = vrot.lane.b32.xlu1 %v6218_v41, %s7239_s20  ;;  %v1162_v42 = vadd.f32 %v6211_v3, %v1161_v43  ;;  %v4952_v36 = vpop.f32.mrb[6].mxu0  ;;  %v3092_v32 = vsel %vm1107_vm0, %v4731_v31, 0  ;;  %v1973_v46 = vrot.slane %v1971_v27, 4 }
 0x121   : > { %v2376_v29 = vpop.permute.xlu0 %2375  ;;  %3159 = vmatprep.mubr.bf16.mxu0 %v5282_v23  ;;  %v2526_v0 = vpop.permute.xlu1 %2525  ;;  %v1173_v55 = vadd.f32 %v4952_v36, %v6211_v3  ;;  %3293 = vmatpush1.bf16.msra.mxu1 %v5112_v21 }
 0x122   : > { %v2702_v53 = vsel %vm1058_vm5, %v5858_v17, %v2376_v29  ;;  %v1164_v39 = vpop.f32.mrb[7].mxu0  ;;  %v1276_v51 = vmax.f32 %v1162_v42, 0.0  ;;  %4750 = vmatprep.subr.msk.bf16.mxu1 %vm1107_vm0, %v4732_v14  ;;  %v4662_v42 = vrot.slane %v6273_v40, 9  ;;  %vm4129_vm0 = vcmask 7168  }
 0x123   : > { %2504 = vrot.lane.b32.xlu0 %v6174_v37, %s7240_s28  ;;  %v2747_v17 = vsel %vm2739_vm10, %v2702_v53, %v2456_v11  ;;  %v1165_v9 = vadd.f32 %v6211_v3, %v1164_v39  ;;  %v1279_v33 = vmax.f32 %v1173_v55, 0.0  ;;  %v6309_v11 = vcombine.low %v1959_v22, %v1969_v7 }
 0x124   : > { %2609 = vrot.lane.b32.xlu1 %v6265_v12, %s7241_s18  ;;  %v1977_v22 = vor.u32 %v1976_v8, %v1973_v46  ;;  %v2243_v55 = vrot.slane %v1645_v56, 5  ;;  %v2242_v7 = vrot.slane %v2240_v16, 4 }
 0x125   : > { %v2491_v61 = vpop.permute.xlu0 %2490  ;;  %v2596_v38 = vpop.permute.xlu1 %2595  ;;  %v1277_v44 = vmax.f32 %v1165_v9, 0.0  ;;  %v1307_v4 = vpack.c.bf16 %v1279_v33, %v1278_v20  ;;  %3295 = vmatpush1.bf16.msra.mxu1 %v3092_v32  ;;  %v6334_v20 = vld [vmem:[#allocation2 + $0xa8] sm:$0xf]  ;;  %v2241_v32 = vsel %vm5834_vm9, %v4662_v42, %v2240_v16 }
 0x126   : > { %v2780_v34 = vsel %vm2772_vm11, %v2747_v17, %v2491_v61  ;;  %v4955_v47 = vpop.f32.mrb[8].mxu0  ;;  %v1987_v17 = vor.u32 %v1986_v60, %v6313_v35 }
 0x127   : > { %2574 = vrot.lane.b32.xlu0 %v6206_v59, %s7242_s27  ;;  %v2813_v18 = vsel %vm2805_vm12, %v2780_v34, %v2526_v0  ;;  %v1306_v45 = vpack.c.bf16 %v1277_v44, %v1276_v51  ;;  %v1186_v1 = vadd.f32 %v4955_v47, %v6211_v3  ;;  %v1177_v2 = vpop.f32.mrb[9].mxu0  ;;  %v1990_v0 = vshll.u32 %v1645_v56, 16 }
 0x128   : > { %2679 = vrot.lane.b32.xlu1 %v6294_v24, %s7243_s17  ;;  %v1178_v15 = vadd.f32 %v6211_v3, %v1177_v2  ;;  %v4956_v43 = vpop.f32.mrb[10].mxu0  ;;  %v6342_v34 = vcombine.low %v6273_v40, %v6279_v10  ;;  %v1978_v44 = vrot.slane %v1977_v22, 4  ;;  %v2244_v47 = vsel %vm5834_vm9, %v2242_v7, %v2243_v55 }
 0x129   : > { %v2561_v48 = vpop.permute.xlu0 %2560  ;;  %v2666_v13 = vpop.permute.xlu1 %2665  ;;  %4983 = vmatprep.mubr.msk.bf16.mxu1 %vm1058_vm5, %v1306_v45  ;;  %v1189_v31 = vadd.f32 %v4956_v43, %v6211_v3  ;;  %v1282_v39 = vmax.f32 %v1186_v1, 0.0  ;;  %v1998_v1 = vshll.u32 %v6334_v20, 16 }
 0x12a   : > { %v2846_v29 = vsel %vm2838_vm13, %v2813_v18, %v2561_v48  ;;  %v1180_v53 = vpop.f32.mrb[11].mxu0  ;;  %4984 = vmatmul.mubr.msk.bf16.gmra.mrb[4].mxu1 %vm1058_vm5, %v1307_v4  ;;  %v1280_v61 = vmax.f32 %v1178_v15, 0.0  ;;  %v1988_v18 = vrot.slane %v1987_v17, 4  ;;  %v1995_v48 = vshrl.u32 %v6334_v20, 16 }
 0x12b   : > { %v2879_v14 = vsel %vm2871_vm14, %v2846_v29, %v2596_v38  ;;  %2644 = vrot.lane.b32.xlu0 %v6309_v11, %s7247_s25  ;;  %v1181_v36 = vadd.f32 %v6211_v3, %v1180_v53  ;;  %v1283_v27 = vmax.f32 %v1189_v31, 0.0  ;;  %v1983_v15 = vsel %vm5448_vm6, %v1978_v44, %v6313_v35 }
 0x12c   : > { %2471 = vrot.lane.b32.xlu1 %v6206_v59, %s7244_s0  ;;  %v1992_v59 = vrot.slane %v1990_v0, 5  ;;  %v6375_v31 = vcombine.low %v2241_v32, %v2244_v47  ;;  %v2000_v35 = vrot.slane %v1998_v1, 5 }
 0x12d   : > { %v2631_v21 = vpop.permute.xlu0 %2630  ;;  %v2458_v9 = vpop.permute.xlu1 %2457  ;;  %v1281_v62 = vmax.f32 %v1181_v36, 0.0  ;;  %v1309_v33 = vpack.c.bf16 %v1283_v27, %v1282_v39 }
 0x12e   : > { %v2912_v5 = vsel %vm2904_vm15, %v2879_v14, %v2631_v21  ;;  %v1993_v43 = vsel %vm5448_vm6, %v1988_v18, %v1992_v59  ;;  %v1997_v21 = vrot.slane %v1995_v48, 4 }
 0x12f   : > { %v6332_v26 = vsel %vm2937_vm2, %v2912_v5, %v2666_v13  ;;  %2391 = vrot.lane.b32.xlu0 %v6218_v41, %s7245_s1  ;;  %v1308_v38 = vpack.c.bf16 %v1281_v62, %v1280_v61  ;;  %v6349_v41 = vld [vmem:[#allocation2 + $0xac] sm:$0xf]  ;;  %v6381_v27 = vcombine.low %v1983_v15, %v1993_v43 }
 0x130   : > { %4737 = vmatmul.mubr.msk.bf16.gmra.mrb[44].mxu0 %vm3052_vm3, %v6332_v26  ;;  %v4959_v51 = vpop.f32.mrb[12].mxu0  ;;  %2541 = vrot.lane.b32.xlu1 %v6309_v11, %s7239_s20  ;;  %v2008_v13 = vshrl.u32 %v6349_v41, 16  ;;  %v2247_v18 = vrot.slane %v6349_v41, 5 }
 0x131   : > { %v2378_v4 = vpop.permute.xlu0 %2377  ;;  %3169 = vmatprep.mubr.bf16.mxu0 %v5282_v23  ;;  %v1202_v46 = vadd.f32 %v4959_v51, %v6211_v3  ;;  %v1193_v45 = vpop.f32.mrb[13].mxu0  ;;  %4987 = vmatprep.mubr.msk.bf16.mxu1 %vm1058_vm5, %v1308_v38 }
 0x132   : > { %v2705_v40 = vsel %vm1058_vm5, %v5937_v25, %v2378_v4  ;;  %v2528_v10 = vpop.permute.xlu1 %2527  ;;  %v1194_v56 = vadd.f32 %v6211_v3, %v1193_v45  ;;  %v4960_v8 = vpop.f32.mrb[14].mxu0  ;;  %4988 = vmatmul.mubr.msk.bf16.gmra.mrb[8].mxu1 %vm1058_vm5, %v1309_v33  ;;  %v2004_v25 = vshll.u32 %v6349_v41, 16  ;;  %v1648_v33 = vld [vmem:[#allocation2 + $0xb0] sm:$0x1]  ;;  %v2001_v45 = vor.u32 %v2000_v35, %v1997_v21 }
 0x133   : > { %v2749_v60 = vsel %vm2739_vm10, %v2705_v40, %v2458_v9  ;;  %v1205_v2 = vadd.f32 %v4960_v8, %v6211_v3  ;;  %v1196_v29 = vpop.f32.mrb[15].mxu0  ;;  %2506 = vrot.lane.b32.xlu0 %v6265_v12, %s7240_s28  ;;  %v1286_v53 = vmax.f32 %v1202_v46, 0.0  ;;  %v2010_v9 = vrot.slane %v2008_v13, 4 }
 0x134   : > { %v1197_v16 = vadd.f32 %v6211_v3, %v1196_v29  ;;  %2611 = vrot.lane.b32.xlu1 %v6342_v34, %s7241_s18  ;;  %v1284_v22 = vmax.f32 %v1194_v56, 0.0  ;;  %v6383_v5 = vrot.slane %v2004_v25, 5  ;;  %v2014_v48 = vshll.u32 %v1648_v33, 16 }
 0x135   : > { %v2493_v14 = vpop.permute.xlu0 %2492  ;;  %v1287_v0 = vmax.f32 %v1205_v2, 0.0  ;;  %v2250_v1 = vrot.slane %v1648_v33, 5 }
 0x136   : > { %v2782_v42 = vsel %vm2772_vm11, %v2749_v60, %v2493_v14  ;;  %v2598_v36 = vpop.permute.xlu1 %2597  ;;  %v1285_v17 = vmax.f32 %v1197_v16, 0.0  ;;  %v2011_v47 = vor.u32 %v2010_v9, %v6383_v5  ;;  %v4663_v60 = vrot.slane %v6334_v20, 9 }
 0x137   : > { %v2815_v55 = vsel %vm2805_vm12, %v2782_v42, %v2528_v10  ;;  %v1311_v39 = vpack.c.bf16 %v1287_v0, %v1286_v53  ;;  %2576 = vrot.lane.b32.xlu0 %v6294_v24, %s7242_s27  ;;  %v2249_v16 = vrot.slane %v2247_v18, 4  ;;  %v2002_v53 = vrot.slane %v2001_v45, 4 }
 0x138   : > { %v1310_v7 = vpack.c.bf16 %v1285_v17, %v1284_v22  ;;  %2681 = vrot.lane.b32.xlu1 %v6375_v31, %s7243_s17  ;;  %v2016_v42 = vrot.slane %v2014_v48, 5  ;;  %v6416_v17 = vcombine.low %v6334_v20, %v6349_v41  ;;  %v2248_v9 = vsel %vm5834_vm9, %v4663_v60, %v2247_v18 }
 0x139   : > { %v4963_v61 = vpop.f32.mrb[16].mxu0  ;;  %v2563_v62 = vpop.permute.xlu0 %2562  ;;  %v2007_v20 = vsel %vm5448_vm6, %v2002_v53, %v6383_v5 }
 0x13a   : > { %v1218_v59 = vadd.f32 %v4963_v61, %v6211_v3  ;;  %v1209_v38 = vpop.f32.mrb[17].mxu0  ;;  %v2848_v51 = vsel %vm2838_vm13, %v2815_v55, %v2563_v62  ;;  %v2668_v44 = vpop.permute.xlu1 %2667  ;;  %4991 = vmatprep.mubr.msk.bf16.mxu1 %vm1058_vm5, %v1310_v7  ;;  %v6419_v55 = vld [vmem:[#allocation2 + $0xb8] sm:$0xf]  ;;  %v2251_v7 = vsel %vm5834_vm9, %v2249_v16, %v2250_v1  ;;  %v1651_v16 = vld [vmem:[#allocation2 + $0xbc] sm:$0x1] }
 0x13b   : > { %v1210_v4 = vadd.f32 %v6211_v3, %v1209_v38  ;;  %v4964_v32 = vpop.f32.mrb[18].mxu0  ;;  %v2881_v46 = vsel %vm2871_vm14, %v2848_v51, %v2598_v36  ;;  %4992 = vmatmul.mubr.msk.bf16.gmra.mrb[12].mxu1 %vm1058_vm5, %v1311_v39  ;;  %2646 = vrot.lane.b32.xlu0 %v6381_v27, %s7247_s25  ;;  %v6410_v36 = vld [vmem:[#allocation2 + $0xb4] sm:$0xf]  ;;  %v2032_v45 = vshrl.u32 %v6419_v55, 16 }
 0x13c   : > { %v1221_v40 = vadd.f32 %v4964_v32, %v6211_v3  ;;  %v1212_v10 = vpop.f32.mrb[19].mxu0  ;;  %2473 = vrot.lane.b32.xlu1 %v6294_v24, %s7244_s0  ;;  %v1290_v2 = vmax.f32 %v1218_v59, 0.0  ;;  %v2012_v24 = vrot.slane %v2011_v47, 4  ;;  %v2022_v51 = vshll.u32 %v6410_v36, 16 }
 0x13d   : > { %v1213_v56 = vadd.f32 %v6211_v3, %v1212_v10  ;;  %v2633_v8 = vpop.permute.xlu0 %2632  ;;  %v1288_v15 = vmax.f32 %v1210_v4, 0.0 }
 0x13e   : > { %v1291_v29 = vmax.f32 %v1221_v40, 0.0  ;;  %v2914_v25 = vsel %vm2904_vm15, %v2881_v46, %v2633_v8  ;;  %v2460_v13 = vpop.permute.xlu1 %2459  ;;  %v2017_v38 = vsel %vm5448_vm6, %v2012_v24, %v2016_v42  ;;  %v6445_v46 = vcombine.low %v2248_v9, %v2251_v7 }
 0x13f   : > { %v1289_v43 = vmax.f32 %v1213_v56, 0.0  ;;  %v6404_v14 = vsel %vm2937_vm2, %v2914_v25, %v2668_v44  ;;  %2393 = vrot.lane.b32.xlu0 %v6309_v11, %s7245_s1  ;;  %v2028_v44 = vshll.u32 %v6419_v55, 16  ;;  %v6453_v1 = vcombine.low %v2007_v20, %v2017_v38 }
 0x140   : > { %v1313_v0 = vpack.c.bf16 %v1291_v29, %v1290_v2  ;;  %4738 = vmatmul.mubr.msk.bf16.gmra.mrb[48].mxu0 %vm3052_vm3, %v6404_v14  ;;  %2543 = vrot.lane.b32.xlu1 %v6381_v27, %s7239_s20  ;;  %v2024_v29 = vrot.slane %v2022_v51, 5  ;;  %v2257_v38 = vrot.slane %v1651_v16, 5 }
 0x141   : > { %v1312_v21 = vpack.c.bf16 %v1289_v43, %v1288_v15  ;;  %v2380_v22 = vpop.permute.xlu0 %2379  ;;  %3179 = vmatprep.mubr.bf16.mxu0 %v5282_v23  ;;  %v6457_v15 = vrot.slane %v2028_v44, 5  ;;  %v2034_v43 = vrot.slane %v2032_v45, 4 }
 0x142   : > { %v2708_v35 = vsel %vm1058_vm5, %v5959_v58, %v2380_v22  ;;  %v2530_v39 = vpop.permute.xlu1 %2529  ;;  %v2019_v58 = vshrl.u32 %v6410_v36, 16 }
 0x143   : > { %v4967_v11 = vpop.f32.mrb[20].mxu0  ;;  %4995 = vmatprep.mubr.msk.bf16.mxu1 %vm1058_vm5, %v1312_v21  ;;  %v2751_v41 = vsel %vm2739_vm10, %v2708_v35, %v2460_v13  ;;  %2508 = vrot.lane.b32.xlu0 %v6342_v34, %s7240_s28  ;;  %v2254_v21 = vrot.slane %v6419_v55, 5 }
 0x144   : > { %v1234_v61 = vadd.f32 %v4967_v11, %v6211_v3  ;;  %v1225_v62 = vpop.f32.mrb[21].mxu0  ;;  %4996 = vmatmul.mubr.msk.bf16.gmra.mrb[16].mxu1 %vm1058_vm5, %v1313_v0  ;;  %2613 = vrot.lane.b32.xlu1 %v6416_v17, %s7241_s18  ;;  %v2021_v2 = vrot.slane %v2019_v58, 4 }
 0x145   : > { %v1226_v33 = vadd.f32 %v6211_v3, %v1225_v62  ;;  %v4968_v59 = vpop.f32.mrb[22].mxu0  ;;  %v2495_v32 = vpop.permute.xlu0 %2494  ;;  %v4664_v62 = vrot.slane %v6410_v36, 9 }
 0x146   : > { %v1294_v5 = vmax.f32 %v1234_v61, 0.0  ;;  %v1237_v18 = vadd.f32 %v4968_v59, %v6211_v3  ;;  %v1228_v4 = vpop.f32.mrb[23].mxu0  ;;  %v2784_v47 = vsel %vm2772_vm11, %v2751_v41, %v2495_v32  ;;  %v2600_v48 = vpop.permute.xlu1 %2599  ;;  %v2025_v7 = vor.u32 %v2024_v29, %v2021_v2 }
 0x147   : > { %v1292_v40 = vmax.f32 %v1226_v33, 0.0  ;;  %v1229_v10 = vadd.f32 %v6211_v3, %v1228_v4  ;;  %v2817_v8 = vsel %vm2805_vm12, %v2784_v47, %v2530_v39  ;;  %2578 = vrot.lane.b32.xlu0 %v6375_v31, %s7242_s27  ;;  %v2038_v61 = vshll.u32 %v1651_v16, 16 }
 0x148   : > { %v1295_v56 = vmax.f32 %v1237_v18, 0.0  ;;  %2683 = vrot.lane.b32.xlu1 %v6445_v46, %s7243_s17  ;;  %v2035_v59 = vor.u32 %v2034_v43, %v6457_v15  ;;  %v2256_v4 = vrot.slane %v2254_v21, 4  ;;  %v2255_v16 = vsel %vm5834_vm9, %v4664_v62, %v2254_v21 }
 0x149   : > { %v1293_v60 = vmax.f32 %v1229_v10, 0.0  ;;  %v2565_v13 = vpop.permute.xlu0 %2564  ;;  %v6482_v10 = vld [vmem:[#allocation2 + $0xc0] sm:$0xf] }
 0x14a   : > { %v1315_v25 = vpack.c.bf16 %v1295_v56, %v1294_v5  ;;  %v2850_v24 = vsel %vm2838_vm13, %v2817_v8, %v2565_v13  ;;  %v2670_v42 = vpop.permute.xlu1 %2669  ;;  %v2040_v56 = vrot.slane %v2038_v61, 5  ;;  %v2258_v43 = vsel %vm5834_vm9, %v2256_v4, %v2257_v38 }
 0x14b   : > { %v1314_v53 = vpack.c.bf16 %v1293_v60, %v1292_v40  ;;  %v4971_v0 = vpop.f32.mrb[24].mxu0  ;;  %v2883_v35 = vsel %vm2871_vm14, %v2850_v24, %v2600_v48  ;;  %2648 = vrot.lane.b32.xlu0 %v6453_v1, %s7247_s25  ;;  %v2036_v48 = vrot.slane %v2035_v59, 4  ;;  %v6488_v60 = vcombine.low %v6410_v36, %v6419_v55 }
 0x14c   : > { %v1250_v22 = vadd.f32 %v4971_v0, %v6211_v3  ;;  %v1241_v11 = vpop.f32.mrb[25].mxu0  ;;  %2475 = vrot.lane.b32.xlu1 %v6375_v31, %s7244_s0  ;;  %v2026_v31 = vrot.slane %v2025_v7, 4  ;;  %v2043_v0 = vshrl.u32 %v6482_v10, 16  ;;  %v2046_v24 = vshll.u32 %v6482_v10, 16 }
 0x14d   : > { %4999 = vmatprep.mubr.msk.bf16.mxu1 %vm1058_vm5, %v1314_v53  ;;  %v1242_v39 = vadd.f32 %v6211_v3, %v1241_v11  ;;  %v4972_v9 = vpop.f32.mrb[26].mxu0  ;;  %v2635_v33 = vpop.permute.xlu0 %2634  ;;  %v2041_v7 = vsel %vm5448_vm6, %v2036_v48, %v2040_v56  ;;  %v6518_v62 = vcombine.low %v2255_v16, %v2258_v43  ;;  %v4665_v16 = vrot.slane %v6482_v10, 9 }
 0x14e   : > { %v1298_v20 = vmax.f32 %v1250_v22, 0.0  ;;  %5000 = vmatmul.mubr.msk.bf16.gmra.mrb[20].mxu1 %vm1058_vm5, %v1315_v25  ;;  %v1253_v41 = vadd.f32 %v4972_v9, %v6211_v3  ;;  %v1244_v58 = vpop.f32.mrb[27].mxu0  ;;  %v2916_v5 = vsel %vm2904_vm15, %v2883_v35, %v2635_v33  ;;  %v2462_v18 = vpop.permute.xlu1 %2461  ;;  %v2045_v38 = vrot.slane %v2043_v0, 4 }
 0x14f   : > { %v1296_v51 = vmax.f32 %v1242_v39, 0.0  ;;  %v1245_v44 = vadd.f32 %v6211_v3, %v1244_v58  ;;  %v6476_v45 = vsel %vm2937_vm2, %v2916_v5, %v2670_v42  ;;  %2395 = vrot.lane.b32.xlu0 %v6381_v27, %s7245_s1  ;;  %v6491_v27 = vld [vmem:[#allocation2 + $0xc4] sm:$0xf] }
 0x150   : > { %v1299_v32 = vmax.f32 %v1253_v41, 0.0  ;;  %4739 = vmatmul.mubr.msk.bf16.gmra.mrb[52].mxu0 %vm3052_vm3, %v6476_v45  ;;  %2545 = vrot.lane.b32.xlu1 %v6453_v1, %s7239_s20  ;;  %v2052_v21 = vshll.u32 %v6491_v27, 16  ;;  %v2056_v11 = vshrl.u32 %v6491_v27, 16 }
 0x151   : > { %v1297_v40 = vmax.f32 %v1245_v44, 0.0  ;;  %v2382_v8 = vpop.permute.xlu0 %2381  ;;  %3189 = vmatprep.mubr.bf16.mxu0 %v5282_v23 }
 0x152   : > { %v1317_v47 = vpack.c.bf16 %v1299_v32, %v1298_v20  ;;  %v2711_v25 = vsel %vm1058_vm5, %v5979_v6, %v2382_v8  ;;  %v2532_v13 = vpop.permute.xlu1 %2531  ;;  %v2031_v6 = vsel %vm5448_vm6, %v2026_v31, %v6457_v15  ;;  %v2058_v4 = vrot.slane %v2056_v11, 4 }
 0x153   : > { %v1316_v2 = vpack.c.bf16 %v1297_v40, %v1296_v51  ;;  %v4975_v29 = vpop.f32.mrb[28].mxu0  ;;  %v2753_v55 = vsel %vm2739_vm10, %v2711_v25, %v2462_v18  ;;  %2510 = vrot.lane.b32.xlu0 %v6416_v17, %s7240_s28  ;;  %v2048_v51 = vrot.slane %v2046_v24, 5  ;;  %v6525_v5 = vcombine.low %v2031_v6, %v2041_v7 }
 0x154   : > { %v1266_v53 = vadd.f32 %v4975_v29, %v6211_v3  ;;  %v1257_v36 = vpop.f32.mrb[29].mxu0  ;;  %2615 = vrot.lane.b32.xlu1 %v6488_v60, %s7241_s18  ;;  %v2054_v18 = vrot.slane %v2052_v21, 5  ;;  %v2261_v31 = vrot.slane %v6491_v27, 5  ;;  %v6552_v6 = vcombine.low %v6482_v10, %v6491_v27 }
 0x155   : > { %v1258_v42 = vadd.f32 %v6211_v3, %v1257_v36  ;;  %v4976_v22 = vpop.f32.mrb[30].mxu0  ;;  %5003 = vmatprep.mubr.msk.bf16.mxu1 %vm1058_vm5, %v1316_v2  ;;  %v2497_v61 = vpop.permute.xlu0 %2496  ;;  %v2049_v2 = vor.u32 %v2048_v51, %v2045_v38 }
 0x156   : > { %v1302_v35 = vmax.f32 %v1266_v53, 0.0  ;;  %v1269_v39 = vadd.f32 %v4976_v22, %v6211_v3  ;;  %v1260_v9 = vpop.f32.mrb[31].mxu0  ;;  %5004 = vmatmul.mubr.msk.bf16.gmra.mrb[24].mxu1 %vm1058_vm5, %v1317_v47  ;;  %v2786_v41 = vsel %vm2772_vm11, %v2753_v55, %v2497_v61  ;;  %v2602_v58 = vpop.permute.xlu1 %2601  ;;  %v2059_v29 = vor.u32 %v2058_v4, %v2054_v18 }
 0x157   : > { %v1300_v15 = vmax.f32 %v1258_v42, 0.0  ;;  %v1261_v20 = vadd.f32 %v6211_v3, %v1260_v9  ;;  %v2819_v59 = vsel %vm2805_vm12, %v2786_v41, %v2532_v13  ;;  %2580 = vrot.lane.b32.xlu0 %v6445_v46, %s7242_s27  ;;  %v1654_v3 = vld [vmem:[#allocation2 + $0xc8] sm:$0x1]  ;;  %v2263_v43 = vrot.slane %v2261_v31, 4  ;;  %v6563_v9 = vld [vmem:[#allocation2 + $0xd0] sm:$0xf] }
 0x158   : > { %v1303_v33 = vmax.f32 %v1269_v39, 0.0  ;;  %2685 = vrot.lane.b32.xlu1 %v6518_v62, %s7243_s17  ;;  %v2062_v25 = vshll.u32 %v1654_v3, 16  ;;  %v2264_v53 = vrot.slane %v1654_v3, 5  ;;  %v2050_v24 = vrot.slane %v2049_v2, 4  ;;  %v6561_v39 = vld [vmem:[#allocation2 + $0xcc] sm:$0xf] }
 0x159   : > { %v1301_v44 = vmax.f32 %v1261_v20, 0.0  ;;  %v2567_v40 = vpop.permute.xlu0 %2566  ;;  %v2262_v21 = vsel %vm5834_vm9, %v4665_v16, %v2261_v31  ;;  %v2070_v20 = vshll.u32 %v6561_v39, 16  ;;  %v2076_v41 = vshll.u32 %v6563_v9, 16  ;;  %v1657_v31 = vld [vmem:[#allocation2 + $0xd4] sm:$0x1] }
 0x15a   : > { %v1319_v32 = vpack.c.bf16 %v1303_v33, %v1302_v35  ;;  %v2852_v48 = vsel %vm2838_vm13, %v2819_v59, %v2567_v40  ;;  %v2672_v56 = vpop.permute.xlu1 %2671  ;;  %v2064_v42 = vrot.slane %v2062_v25, 5  ;;  %v2055_v10 = vsel %vm5448_vm6, %v2050_v24, %v2054_v18 }
 0x15b   : > { %v1318_v47 = vpack.c.bf16 %v1301_v44, %v1300_v15  ;;  %v2885_v8 = vsel %vm2871_vm14, %v2852_v48, %v2602_v58  ;;  %2650 = vrot.lane.b32.xlu0 %v6525_v5, %s7247_s25  ;;  %v2067_v15 = vshrl.u32 %v6561_v39, 16  ;;  %v2080_v58 = vshrl.u32 %v6563_v9, 16 }
 0x15c   : > { %2477 = vrot.lane.b32.xlu1 %v6445_v46, %s7244_s0  ;;  %v2060_v46 = vrot.slane %v2059_v29, 4  ;;  %v2072_v18 = vrot.slane %v2070_v20, 5  ;;  %v2078_v4 = vrot.slane %v2076_v41, 5  ;;  %v2086_v29 = vshll.u32 %v1657_v31, 16 }
 0x15d   : > { %5007 = vmatprep.mubr.msk.bf16.mxu1 %vm1058_vm5, %v1318_v47  ;;  %v2637_v13 = vpop.permute.xlu0 %2636  ;;  %v2069_v44 = vrot.slane %v2067_v15, 4  ;;  %v2268_v47 = vrot.slane %v6563_v9, 5  ;;  %v4666_v16 = vrot.slane %v6561_v39, 9 }
 0x15e   : > { %5008 = vmatmul.mubr.msk.bf16.gmra.mrb[28].mxu1 %vm1058_vm5, %v1319_v32  ;;  %v2918_v36 = vsel %vm2904_vm15, %v2885_v8, %v2637_v13  ;;  %v2464_v55 = vpop.permute.xlu1 %2463  ;;  %v2065_v27 = vsel %vm5448_vm6, %v2060_v46, %v2064_v42  ;;  %v2082_v32 = vrot.slane %v2080_v58, 4  ;;  %v4718_v46 = vcombine.low %v6561_v39, %v6563_v9 }
 0x15f   : > { %3322 = vmatprep.mubr.bf16.mxu1 %v5282_v23  ;;  %v6542_v0 = vsel %vm2937_vm2, %v2918_v36, %v2672_v56  ;;  %2397 = vrot.lane.b32.xlu0 %v6453_v1, %s7245_s1  ;;  %v2265_v1 = vsel %vm5834_vm9, %v2263_v43, %v2264_v53  ;;  %v2073_v8 = vor.u32 %v2072_v18, %v2069_v44  ;;  %v2270_v43 = vrot.slane %v2268_v47, 4 }
 0x160   : > { %4740 = vmatmul.mubr.msk.bf16.gmra.mrb[56].mxu0 %vm3052_vm3, %v6542_v0  ;;  %2547 = vrot.lane.b32.xlu1 %v6525_v5, %s7239_s20  ;;  %v6572_v61 = vcombine.low %v2262_v21, %v2265_v1  ;;  %v2083_v2 = vor.u32 %v2082_v32, %v2078_v4  ;;  %v2271_v53 = vrot.slane %v1657_v31, 5 }
 0x161   : > { %v2384_v22 = vpop.permute.xlu0 %2383  ;;  %3199 = vmatprep.mubr.bf16.mxu0 %v5282_v23 }
 0x162   : > { %v2714_v11 = vsel %vm1058_vm5, %v5999_v52, %v2384_v22  ;;  %v2534_v35 = vpop.permute.xlu1 %2533  ;;  %v2272_v21 = vsel %vm5834_vm9, %v2270_v43, %v2271_v53 }
 0x163   : > { %v2755_v7 = vsel %vm2739_vm10, %v2714_v11, %v2464_v55  ;;  %2512 = vrot.lane.b32.xlu0 %v6488_v60, %s7240_s28  ;;  %v2088_v55 = vrot.slane %v2086_v29, 5 }
 0x164   : > { %2617 = vrot.lane.b32.xlu1 %v6552_v6, %s7241_s18 }
 0x165   : > { %v2499_v52 = vpop.permute.xlu0 %2498 }
 0x166   : > { %4751 = vmatmul.mubr.msk.bf16.vlgmr.msra.gmra.mrb[32].mxu1 %vm3052_vm3, %v6149_v19  ;;  %v2788_v33 = vsel %vm2772_vm11, %v2755_v7, %v2499_v52  ;;  %v2604_v59 = vpop.permute.xlu1 %2603  ;;  %v4716_v19 = vcombine.low %v2055_v10, %v2065_v27 }
 0x167   : > { %3332 = vmatprep.mubr.bf16.mxu1 %v5282_v23  ;;  %v2821_v38 = vsel %vm2805_vm12, %v2788_v33, %v2534_v35  ;;  %2582 = vrot.lane.b32.xlu0 %v6518_v62, %s7242_s27 }
 0x168   : > { %2687 = vrot.lane.b32.xlu1 %v6572_v61, %s7243_s17 }
 0x169   : > { %v2569_v51 = vpop.permute.xlu0 %2568 }
 0x16a   : > { %v2854_v40 = vsel %vm2838_vm13, %v2821_v38, %v2569_v51  ;;  %v2674_v3 = vpop.permute.xlu1 %2673 }
 0x16b   : > { %v2887_v48 = vsel %vm2871_vm14, %v2854_v40, %v2604_v59  ;;  %2652 = vrot.lane.b32.xlu0 %v4716_v19, %s7247_s25 }
 0x16c   : > { %2479 = vrot.lane.b32.xlu1 %v6518_v62, %s7244_s0  ;;  %v2084_v62 = vrot.slane %v2083_v2, 4  ;;  %s5138_s0 = sshll.u32 %s5285_s29, 4  ;;  %s5139_s0 = int_to_ptr.vmem [resolvable:$false] %s5138_s0 }
 0x16d   : > { %v2639_v56 = vpop.permute.xlu0 %2638 }
 0x16e   : > { %4752 = vmatmul.mubr.msk.bf16.gmra.mrb[36].mxu1 %vm3052_vm3, %v6182_v28  ;;  %v2920_v25 = vsel %vm2904_vm15, %v2887_v48, %v2639_v56  ;;  %v2466_v13 = vpop.permute.xlu1 %2465  ;;  %v2074_v28 = vrot.slane %v2073_v8, 4 }
 0x16f   : > { %3342 = vmatprep.mubr.bf16.mxu1 %v5282_v23  ;;  %v6601_v36 = vsel %vm2937_vm2, %v2920_v25, %v2674_v3  ;;  %2399 = vrot.lane.b32.xlu0 %v6525_v5, %s7245_s1  ;;  %v2269_v5 = vsel %vm5834_vm9, %v4666_v16, %v2268_v47  ;;  %s7029_s1 = scalar_lea.vmem %s7196_s12, %s4597_s14 }
 0x170   : > { %4741 = vmatmul.mubr.msk.bf16.gmra.mrb[60].mxu0 %vm3052_vm3, %v6601_v36  ;;  %2549 = vrot.lane.b32.xlu1 %v4716_v19, %s7239_s20  ;;  %v2079_v11 = vsel %vm5448_vm6, %v2074_v28, %v2078_v4  ;;  %v4720_v39 = vcombine.low %v2269_v5, %v2272_v21 }
 0x171   : > { %v2386_v24 = vpop.permute.xlu0 %2385  ;;  %3209 = vmatprep.mubr.bf16.mxu0 %v5282_v23 }
 0x172   : > { %v2717_v42 = vsel %vm1058_vm5, %v6041_v49, %v2386_v24  ;;  %v2536_v22 = vpop.permute.xlu1 %2535  ;;  %v2089_v49 = vsel %vm5448_vm6, %v2084_v62, %v2088_v55 }
 0x173   : > { %v2757_v1 = vsel %vm2739_vm10, %v2717_v42, %v2466_v13  ;;  %2514 = vrot.lane.b32.xlu0 %v6552_v6, %s7240_s28  ;;  %s4907_s28 = sshll.u32 %s5264_s24, 13 }
 0x174   : > { %2619 = vrot.lane.b32.xlu1 %v4718_v46, %s7241_s18  ;;  %s7069_s23 = scalar_lea.hbm %s7193_s9, %s4907_s28 }
 0x175   : > { %v2501_v35 = vpop.permute.xlu0 %2500 }
 0x176   : > { %4753 = vmatmul.mubr.msk.bf16.gmra.mrb[40].mxu1 %vm3052_vm3, %v6252_v57  ;;  %v2790_v63 = vsel %vm2772_vm11, %v2757_v1, %v2501_v35  ;;  %v2606_v9 = vpop.permute.xlu1 %2605  ;;  %v4719_v57 = vcombine.low %v2079_v11, %v2089_v49 }
 0x177   : > { %3352 = vmatprep.mubr.bf16.mxu1 %v5282_v23  ;;  %v2823_v6 = vsel %vm2805_vm12, %v2790_v63, %v2536_v22  ;;  %2584 = vrot.lane.b32.xlu0 %v6572_v61, %s7242_s27 }
 0x178   : > { %2689 = vrot.lane.b32.xlu1 %v4720_v39, %s7243_s17 }
 0x179   : > { %v2571_v7 = vpop.permute.xlu0 %2570 }
 0x17a   : > { %v2856_v30 = vsel %vm2838_vm13, %v2823_v6, %v2571_v7  ;;  %v2676_v10 = vpop.permute.xlu1 %2675 }
 0x17b   : > { %v2889_v27 = vsel %vm2871_vm14, %v2856_v30, %v2606_v9  ;;  %2654 = vrot.lane.b32.xlu0 %v4719_v57, %s7247_s25  ;;  %s6740_s25 = sand.u32 1, %s5256_s22  }
 0x17c   : > { %s4593_s27 = sshll.u32 %s6740_s25, 9  ;;  %s4592_s2 = sshll.u32 %s6740_s25, 4 }
 0x17d   : > { %v2641_v52 = vpop.permute.xlu0 %2640  ;;  %s6757_s17 = scalar_lea.vmem [#allocation5], %s4593_s27  ;;  %s6954_s4 = scalar_lea.vmem [#allocation3], %s4592_s2 }
 0x17e   : > { %4754 = vmatmul.mubr.msk.bf16.gmra.mrb[44].mxu1 %vm3052_vm3, %v6332_v26  ;;  %v2922_v15 = vsel %vm2904_vm15, %v2889_v27, %v2641_v52  ;;  %v2468_v61 = vpop.permute.xlu1 %2467  ;;  %s7063_s27 = sand.u32 1, %s7250_s19   ;;  %s4328_s16 = sshll.u32 %s6757_s17, 4  ;;  %s7072_s16 = int_to_ptr.vmem [resolvable:$true] %s4328_s16 }
 0x17f   : > { %3362 = vmatprep.mubr.bf16.mxu1 %v5282_v23  ;;  %v2955_v20 = vsel %vm2937_vm2, %v2922_v15, %v2676_v10  ;;  %s5134_s2 = scalar_lea.vmem %s7072_s16, 8192  ;;  %s5140_s19 = scalar_lea.vmem %s5139_s0, 16384 }
 0x180   : > { %4742 = vmatmul.mubr.msk.bf16.gmra.mrb[64].mxu0 %vm3052_vm3, %v2955_v20  ;;  %p5135_p12 = scmp.ne.s32.totalorder %s7072_s16, %s5134_s2  ;;  %p5141_p1 = scmp.lt.s32.totalorder %s7072_s16, %s5139_s0 }
 0x181   : > { %v2388_v41 = vpop.permute.xlu0 %2387  ;;  %3219 = vmatprep.mubr.bf16.mxu0 %v5282_v23  ;;  %p5142_p2 = scmp.lt.s32.totalorder %s5140_s19, %s5134_s2 }
 0x182   : > { %v2720_v58 = vsel %vm1058_vm5, %v6076_v54, %v2388_v41  ;;  %v2538_v33 = vpop.permute.xlu1 %2537  ;;  %p5136_p13 = pnand %p5135_p12, %p5396_p4 }
 0x183   : > { %v2759_v59 = vsel %vm2739_vm10, %v2720_v58, %v2468_v61  ;;  %v2982_v61 = vlaneseq  ;;  %p5143_p3 = por %p5142_p2, %p5141_p1 }
 0x184   : > { %p5137_p0 = pneg %p5136_p13 }
 0x185   : > { %v2503_v26 = vpop.permute.xlu0 %2502  ;;  %v2983_v58 = vshrl.u32 %v2982_v61, 7 }
 0x186   : > { %4755 = vmatmul.mubr.msk.bf16.gmra.mrb[48].mxu1 %vm3052_vm3, %v6404_v14  ;;  %v2792_v38 = vsel %vm2772_vm11, %v2759_v59, %v2503_v26  ;;  %v2608_v19 = vpop.permute.xlu1 %2607  ;;  %p5144_p5 = pnand %p5143_p3, %p5137_p0 }
 0x187   : > { %3372 = vmatprep.mubr.bf16.mxu1 %v5282_v23  ;;  %v2825_v51 = vsel %vm2805_vm12, %v2792_v38, %v2538_v33  ;;  %v2980_v33 = vld [vmem:[%s7191_s7] sm:$0xf]  ;;  %v2992_v26 = vsub.s32 2, %v2983_v58  ;;  %v2996_v38 = vsub.s32 3, %v2983_v58 }
 0x189   : > { %v2573_v44 = vpop.permute.xlu0 %2572 }
 0x18a   : > { %v2858_v18 = vsel %vm2838_vm13, %v2825_v51, %v2573_v44  ;;  %v2678_v4 = vpop.permute.xlu1 %2677 }
 0x18b   : > { %v2891_v54 = vsel %vm2871_vm14, %v2858_v18, %v2608_v19  ;;  %v6708_v18 = vrot.slane %v2980_v33, %v2992_v26 }
 0x18d   : > { %v2643_v32 = vpop.permute.xlu0 %2642 }
 0x18e   : > { %4756 = vmatmul.mubr.msk.bf16.gmra.mrb[52].mxu1 %vm3052_vm3, %v6476_v45  ;;  %v2924_v14 = vsel %vm2904_vm15, %v2891_v54, %v2643_v32  ;;  %v2470_v40 = vpop.permute.xlu1 %2469 }
 0x18f   : > { %3382 = vmatprep.mubr.bf16.mxu1 %v5282_v23  ;;  %v2957_v3 = vsel %vm2937_vm2, %v2924_v14, %v2678_v4  ;;  %v6711_v4 = vrot.slane %v2980_v33, %v2996_v38 }
 0x190   : > { %4743 = vmatmul.mubr.msk.bf16.gmra.mrb[68].mxu0 %vm3052_vm3, %v2957_v3 }
 0x191   : > { %v2390_v31 = vpop.permute.xlu0 %2389  ;;  %3229 = vmatprep.mubr.bf16.mxu0 %v5282_v23 }
 0x192   : > { %v2723_v47 = vsel %vm1058_vm5, %v6109_v50, %v2390_v31  ;;  %v2540_v48 = vpop.permute.xlu1 %2539 }
 0x193   : > { %v2761_v56 = vsel %vm2739_vm10, %v2723_v47, %v2470_v40 }
 0x195   : > { %v2505_v45 = vpop.permute.xlu0 %2504 }
 0x196   : > { %4757 = vmatmul.mubr.msk.bf16.gmra.mrb[56].mxu1 %vm3052_vm3, %v6542_v0  ;;  %v2794_v8 = vsel %vm2772_vm11, %v2761_v56, %v2505_v45  ;;  %v2610_v2 = vpop.permute.xlu1 %2609 }
 0x197   : > { %3392 = vmatprep.mubr.bf16.mxu1 %v5282_v23  ;;  %v2827_v29 = vsel %vm2805_vm12, %v2794_v8, %v2540_v48 }
 0x199   : > { %v2575_v25 = vpop.permute.xlu0 %2574 }
 0x19a   : > { %v2860_v13 = vsel %vm2838_vm13, %v2827_v29, %v2575_v25  ;;  %v2680_v16 = vpop.permute.xlu1 %2679 }
 0x19b   : > { %v2893_v50 = vsel %vm2871_vm14, %v2860_v13, %v2610_v2 }
 0x19d   : > { %v2645_v0 = vpop.permute.xlu0 %2644 }
 0x19e   : > { %4758 = vmatmul.mubr.msk.bf16.gmra.mrb[60].mxu1 %vm3052_vm3, %v6601_v36  ;;  %v2926_v43 = vsel %vm2904_vm15, %v2893_v50, %v2645_v0  ;;  %v2472_v53 = vpop.permute.xlu1 %2471 }
 0x19f   : > { %3402 = vmatprep.mubr.bf16.mxu1 %v5282_v23  ;;  %v2959_v28 = vsel %vm2937_vm2, %v2926_v43, %v2680_v16 }
 0x1a0   : > { %4744 = vmatmul.mubr.msk.bf16.gmra.mrb[72].mxu0 %vm3052_vm3, %v2959_v28 }
 0x1a1   : > { %v2392_v62 = vpop.permute.xlu0 %2391  ;;  %3239 = vmatprep.mubr.bf16.mxu0 %v5282_v23 }
 0x1a2   : > { %v2726_v55 = vsel %vm1058_vm5, %v6174_v37, %v2392_v62  ;;  %v2542_v24 = vpop.permute.xlu1 %2541  ;;  %v2988_v62 = vsub.s32 1, %v2983_v58 }
 0x1a3   : > { %v2763_v46 = vsel %vm2739_vm10, %v2726_v55, %v2472_v53  ;;  %v2984_v53 = vsub.s32 0, %v2983_v58 }
 0x1a5   : > { %v2507_v36 = vpop.permute.xlu0 %2506 }
 0x1a6   : > { %4759 = vmatmul.mubr.msk.bf16.gmra.mrb[64].mxu1 %vm3052_vm3, %v2955_v20  ;;  %v2796_v42 = vsel %vm2772_vm11, %v2763_v46, %v2507_v36  ;;  %v2612_v22 = vpop.permute.xlu1 %2611  ;;  %v6734_v36 = vrot.slane %v2980_v33, %v2984_v53 }
 0x1a7   : > { %3412 = vmatprep.mubr.bf16.mxu1 %v5282_v23  ;;  %v2829_v5 = vsel %vm2805_vm12, %v2796_v42, %v2542_v24 }
 0x1a9   : > { %v2577_v21 = vpop.permute.xlu0 %2576 }
 0x1aa   : > { %v2862_v1 = vsel %vm2838_vm13, %v2829_v5, %v2577_v21  ;;  %v2682_v11 = vpop.permute.xlu1 %2681 }
 0x1ab   : > { %v2895_v49 = vsel %vm2871_vm14, %v2862_v1, %v2612_v22  ;;  %v6736_v22 = vrot.slane %v2980_v33, %v2988_v62 }
 0x1ad   : > { %v2647_v37 = vpop.permute.xlu0 %2646 }
 0x1ae   : > { %4760 = vmatmul.mubr.msk.bf16.gmra.mrb[68].mxu1 %vm3052_vm3, %v2957_v3  ;;  %v2928_v35 = vsel %vm2904_vm15, %v2895_v49, %v2647_v37  ;;  %v2474_v39 = vpop.permute.xlu1 %2473 }
 0x1af   : > { %3422 = vmatprep.mubr.bf16.mxu1 %v5282_v23  ;;  %v2961_v63 = vsel %vm2937_vm2, %v2928_v35, %v2682_v11 }
 0x1b0   : > { %4745 = vmatmul.mubr.msk.bf16.gmra.mrb[76].mxu0 %vm3052_vm3, %v2961_v63 }
 0x1b1   : > { %v2394_v9 = vpop.permute.xlu0 %2393  ;;  %3249 = vmatprep.mubr.bf16.mxu0 %v5282_v23 }
 0x1b2   : > { %v2729_v6 = vsel %vm1058_vm5, %v6265_v12, %v2394_v9  ;;  %v2544_v57 = vpop.permute.xlu1 %2543 }
 0x1b3   : > { %v2765_v7 = vsel %vm2739_vm10, %v2729_v6, %v2474_v39 }
 0x1b5   : > { %v2509_v30 = vpop.permute.xlu0 %2508 }
 0x1b6   : > { %4761 = vmatmul.mubr.msk.bf16.gmra.mrb[72].mxu1 %vm3052_vm3, %v2959_v28  ;;  %v2798_v10 = vsel %vm2772_vm11, %v2765_v7, %v2509_v30  ;;  %v2614_v27 = vpop.permute.xlu1 %2613 }
 0x1b7   : > { %3432 = vmatprep.mubr.bf16.mxu1 %v5282_v23  ;;  %v2831_v52 = vsel %vm2805_vm12, %v2798_v10, %v2544_v57 }
 0x1b9   : > { %v2579_v15 = vpop.permute.xlu0 %2578 }
 0x1ba   : > { %v2864_v20 = vsel %vm2838_vm13, %v2831_v52, %v2579_v15  ;;  %v2684_v41 = vpop.permute.xlu1 %2683 }
 0x1bb   : > { %v2897_v12 = vsel %vm2871_vm14, %v2864_v20, %v2614_v27 }
 0x1bd   : > { %v2649_v59 = vpop.permute.xlu0 %2648 }
 0x1be   : > { %4762 = vmatmul.mubr.msk.bf16.gmra.mrb[76].mxu1 %vm3052_vm3, %v2961_v63  ;;  %v2930_v19 = vsel %vm2904_vm15, %v2897_v12, %v2649_v59  ;;  %v2476_v51 = vpop.permute.xlu1 %2475 }
 0x1bf   : > { %3442 = vmatprep.mubr.bf16.mxu1 %v5282_v23  ;;  %v2963_v44 = vsel %vm2937_vm2, %v2930_v19, %v2684_v41 }
 0x1c0   : > { %4746 = vmatmul.mubr.msk.bf16.gmra.mrb[80].mxu0 %vm3052_vm3, %v2963_v44 }
 0x1c1   : > { %v2396_v54 = vpop.permute.xlu0 %2395  ;;  %3259 = vmatprep.mubr.bf16.mxu0 %v5282_v23 }
 0x1c2   : > { %v2732_v32 = vsel %vm1058_vm5, %v6342_v34, %v2396_v54  ;;  %v2546_v14 = vpop.permute.xlu1 %2545 }
 0x1c3   : > { %v2767_v40 = vsel %vm2739_vm10, %v2732_v32, %v2476_v51 }
 0x1c5   : > { %v2511_v3 = vpop.permute.xlu0 %2510 }
 0x1c6   : > { %4763 = vmatmul.mubr.msk.bf16.gmra.mrb[80].mxu1 %vm3052_vm3, %v2963_v44  ;;  %v2800_v31 = vsel %vm2772_vm11, %v2767_v40, %v2511_v3  ;;  %v2616_v47 = vpop.permute.xlu1 %2615 }
 0x1c7   : > { %3452 = vmatprep.mubr.bf16.mxu1 %v5282_v23  ;;  %v2833_v48 = vsel %vm2805_vm12, %v2800_v31, %v2546_v14 }
 0x1c9   : > { %v2581_v56 = vpop.permute.xlu0 %2580 }
 0x1ca   : > { %v2866_v45 = vsel %vm2838_vm13, %v2833_v48, %v2581_v56  ;;  %v2686_v8 = vpop.permute.xlu1 %2685 }
 0x1cb   : > { %v2899_v2 = vsel %vm2871_vm14, %v2866_v45, %v2616_v47 }
 0x1cd   : > { %v2651_v34 = vpop.permute.xlu0 %2650 }
 0x1ce   : > { %v2932_v29 = vsel %vm2904_vm15, %v2899_v2, %v2651_v34  ;;  %v2478_v25 = vpop.permute.xlu1 %2477 }
 0x1cf   : > { %v2965_v13 = vsel %vm2937_vm2, %v2932_v29, %v2686_v8 }
 0x1d0   : > { %4747 = vmatmul.mubr.msk.bf16.gmra.mrb[84].mxu0 %vm3052_vm3, %v2965_v13  ;;  %4764 = vmatmul.mubr.msk.bf16.gmra.mrb[84].mxu1 %vm3052_vm3, %v2965_v13 }
 0x1d1   : > { %v2398_v16 = vpop.permute.xlu0 %2397  ;;  %3269 = vmatprep.mubr.bf16.mxu0 %v5282_v23  ;;  %3462 = vmatprep.mubr.bf16.mxu1 %v5282_v23 }
 0x1d2   : > { %v2735_v50 = vsel %vm1058_vm5, %v6416_v17, %v2398_v16  ;;  %v2548_v0 = vpop.permute.xlu1 %2547 }
 0x1d3   : > { %v2769_v43 = vsel %vm2739_vm10, %v2735_v50, %v2478_v25 }
 0x1d5   : > { %v2513_v28 = vpop.permute.xlu0 %2512 }
 0x1d6   : > { %v2802_v55 = vsel %vm2772_vm11, %v2769_v43, %v2513_v28  ;;  %v2618_v24 = vpop.permute.xlu1 %2617 }
 0x1d7   : > { %v2835_v46 = vsel %vm2805_vm12, %v2802_v55, %v2548_v0  ;;  %v6778_v55 = vld [vmem:[%s7249_s5] ss:$0 sm:$0xff] }
 0x1d9   : > { %v2583_v42 = vpop.permute.xlu0 %2582 }
 0x1da   : > { %v2868_v5 = vsel %vm2838_vm13, %v2835_v46, %v2583_v42  ;;  %v2688_v21 = vpop.permute.xlu1 %2687 }
 0x1db   : > { %v2901_v17 = vsel %vm2871_vm14, %v2868_v5, %v2618_v24 }
 0x1dd   : > { %v3131_v1 = vpop.f32.mrb[32].mxu0  ;;  %v2653_v37 = vpop.permute.xlu0 %2652 }
 0x1de   : > { %v3132_v11 = vadd.f32 %v3131_v1, %v6734_v36  ;;  %v3133_v49 = vpop.f32.mrb[33].mxu0  ;;  %v2934_v63 = vsel %vm2904_vm15, %v2901_v17, %v2653_v37  ;;  %v2480_v9 = vpop.permute.xlu1 %2479 }
 0x1df   : > { %v3134_v35 = vadd.f32 %v3133_v49, %v6736_v22  ;;  %v3135_v39 = vpop.f32.mrb[34].mxu0  ;;  %v2967_v30 = vsel %vm2937_vm2, %v2934_v63, %v2688_v21 }
 0x1e0   : > { %v3483_v6 = vmax.f32 %v3132_v11, 0.0  ;;  %v3136_v57 = vadd.f32 %v3135_v39, %v6734_v36  ;;  %v3137_v7 = vpop.f32.mrb[35].mxu0  ;;  %4748 = vmatmul.mubr.msk.bf16.gmra.mrb[88].mxu0 %vm3052_vm3, %v2967_v30  ;;  %4765 = vmatmul.mubr.msk.bf16.gmra.mrb[88].mxu1 %vm3052_vm3, %v2967_v30 }
 0x1e1   : > { %v3484_v10 = vmax.f32 %v3134_v35, 0.0  ;;  %v3138_v27 = vadd.f32 %v3137_v7, %v6736_v22  ;;  %v2400_v15 = vpop.permute.xlu0 %2399  ;;  %3279 = vmatprep.mubr.bf16.mxu0 %v5282_v23  ;;  %3472 = vmatprep.mubr.bf16.mxu1 %v5282_v23 }
 0x1e2   : > { %v3487_v52 = vmax.f32 %v3136_v57, 0.0  ;;  %v2738_v41 = vsel %vm1058_vm5, %v6488_v60, %v2400_v15  ;;  %v2550_v12 = vpop.permute.xlu1 %2549 }
 0x1e3   : > { %v4842_v61 = vpack.c.bf16 %v3484_v10, %v3483_v6  ;;  %v3488_v20 = vmax.f32 %v3138_v27, 0.0  ;;  %v2771_v33 = vsel %vm2739_vm10, %v2738_v41, %v2480_v9 }
 0x1e4   : > { %v3611_v58 = vpack.c.bf16 %v3487_v52, %v3483_v6 }
 0x1e5   : > { %3995 = vst [vmem:[%s6757_s17] sm:$0xff] %v4842_v61  ;;  %v3612_v59 = vpack.c.bf16 %v3488_v20, %v3484_v10  ;;  %v4844_v26 = vpack.c.bf16 %v3488_v20, %v3487_v52  ;;  %v3141_v38 = vpop.f32.mrb[36].mxu0  ;;  %v2515_v44 = vpop.permute.xlu0 %2514 }
 0x1e6   : > { %v3142_v19 = vadd.f32 %v3141_v38, %v6734_v36  ;;  %v3143_v51 = vpop.f32.mrb[37].mxu0  ;;  %v2804_v32 = vsel %vm2772_vm11, %v2771_v33, %v2515_v44  ;;  %v2620_v14 = vpop.permute.xlu1 %2619 }
 0x1e7   : > { %3997 = vst [vmem:[%s6757_s17 + $0x10] sm:$0xff] %v4844_v26  ;;  %v3144_v54 = vadd.f32 %v3143_v51, %v6736_v22  ;;  %v3145_v60 = vpop.f32.mrb[38].mxu0  ;;  %4176 = vmatprep.subr.bf16.mxu0 %v3612_v59  ;;  %v2837_v47 = vsel %vm2805_vm12, %v2804_v32, %v2550_v12 }
 0x1e8   : > { %v3491_v40 = vmax.f32 %v3142_v19, 0.0  ;;  %v3146_v3 = vadd.f32 %v3145_v60, %v6734_v36  ;;  %v3147_v31 = vpop.f32.mrb[39].mxu0  ;;  %4177 = vmatpush1.bf16.msra.mxu0 %v3611_v58 }
 0x1e9   : > { %v3492_v48 = vmax.f32 %v3144_v54, 0.0  ;;  %v3148_v56 = vadd.f32 %v3147_v31, %v6736_v22  ;;  %v2585_v8 = vpop.permute.xlu0 %2584 }
 0x1ea   : > { %v3495_v45 = vmax.f32 %v3146_v3, 0.0  ;;  %v2870_v29 = vsel %vm2838_vm13, %v2837_v47, %v2585_v8  ;;  %v2690_v0 = vpop.permute.xlu1 %2689 }
 0x1eb   : > { %v4846_v2 = vpack.c.bf16 %v3492_v48, %v3491_v40  ;;  %v3496_v34 = vmax.f32 %v3148_v56, 0.0  ;;  %v2903_v13 = vsel %vm2871_vm14, %v2870_v29, %v2620_v14 }
 0x1ec   : > { %v3615_v25 = vpack.c.bf16 %v3495_v45, %v3491_v40 }
 0x1ed   : > { %3999 = vst [vmem:[%s6757_s17 + $0x20] sm:$0xff] %v4846_v2  ;;  %v3616_v16 = vpack.c.bf16 %v3496_v34, %v3492_v48  ;;  %v4848_v50 = vpack.c.bf16 %v3496_v34, %v3495_v45  ;;  %v2655_v43 = vpop.permute.xlu0 %2654 }
 0x1ee   : > { %v2936_v53 = vsel %vm2904_vm15, %v2903_v13, %v2655_v43  ;;  %v4981_v42 = vpop.f32.mrb[0].mxu1 }
 0x1ef   : > { %4001 = vst [vmem:[%s6757_s17 + $0x30] sm:$0xff] %v4848_v50  ;;  %4178 = vmatprep.subr.bf16.mxu0 %v3616_v16  ;;  %v2969_v28 = vsel %vm2937_vm2, %v2936_v53, %v2690_v0  ;;  %v1413_v17 = vpop.f32.mrb[1].mxu1  ;;  %v1422_v15 = vadd.f32 %v4981_v42, %v6778_v55 }
 0x1f0   : > { %4179 = vmatpush1.bf16.msra.mxu0 %v3615_v25  ;;  %4766 = vmatmul.mubr.msk.bf16.gmra.mrb[92].mxu1 %vm3052_vm3, %v2969_v28  ;;  %v1414_v37 = vadd.f32 %v6778_v55, %v1413_v17  ;;  %v4982_v35 = vpop.f32.mrb[2].mxu1 }
 0x1f1   : > { %4749 = vmatmul.mubr.msk.bf16.gmra.mrb[92].mxu0 %vm3052_vm3, %v2969_v28  ;;  %v1416_v9 = vpop.f32.mrb[3].mxu1  ;;  %v1425_v58 = vadd.f32 %v4982_v35, %v6778_v55 }
 0x1f2   : > { %4059 = vxpose.xlu0.b32.start [1/16] (narrow) %v1414_v37, 8  ;;  %v1417_v10 = vadd.f32 %v6778_v55, %v1416_v9 }
 0x1f3   : > { %v3151_v62 = vpop.f32.mrb[40].mxu0 }
 0x1f4   : > { %v3152_v24 = vadd.f32 %v3151_v62, %v6734_v36  ;;  %v3153_v46 = vpop.f32.mrb[41].mxu0 }
 0x1f5   : > { %v3154_v5 = vadd.f32 %v3153_v46, %v6736_v22  ;;  %v3155_v21 = vpop.f32.mrb[42].mxu0 }
 0x1f6   : > { %v3499_v1 = vmax.f32 %v3152_v24, 0.0  ;;  %v3156_v11 = vadd.f32 %v3155_v21, %v6734_v36  ;;  %v3157_v49 = vpop.f32.mrb[43].mxu0  ;;  %4060 = vxpose.xlu0.b32.cont [2/16] (narrow) %v1417_v10, 8 }
 0x1f7   : > { %v3500_v39 = vmax.f32 %v3154_v5, 0.0  ;;  %v3158_v63 = vadd.f32 %v3157_v49, %v6736_v22 }
 0x1f8   : > { %v3503_v6 = vmax.f32 %v3156_v11, 0.0 }
 0x1f9   : > { %v4850_v57 = vpack.c.bf16 %v3500_v39, %v3499_v1  ;;  %v3504_v7 = vmax.f32 %v3158_v63, 0.0 }
 0x1fa   : > { %v3619_v30 = vpack.c.bf16 %v3503_v6, %v3499_v1  ;;  %4061 = vxpose.xlu0.b32.cont [3/16] (narrow) %v1422_v15, 8 }
 0x1fb   : > { %4003 = vst [vmem:[%s6757_s17 + $0x40] sm:$0xff] %v4850_v57  ;;  %v3620_v27 = vpack.c.bf16 %v3504_v7, %v3500_v39  ;;  %v4852_v52 = vpack.c.bf16 %v3504_v7, %v3503_v6 }
 0x1fd   : > { %4005 = vst [vmem:[%s6757_s17 + $0x50] sm:$0xff] %v4852_v52  ;;  %4180 = vmatprep.subr.bf16.mxu0 %v3620_v27  ;;  %v4985_v61 = vpop.f32.mrb[4].mxu1 }
 0x1fe   : > { %4181 = vmatpush1.bf16.msra.mxu0 %v3619_v30  ;;  %v1429_v20 = vpop.f32.mrb[5].mxu1  ;;  %4062 = vxpose.xlu0.b32.cont [4/16] (narrow) %v1425_v58, 8  ;;  %v1438_v25 = vadd.f32 %v4985_v61, %v6778_v55 }
 0x1ff   : > { %v4986_v41 = vpop.f32.mrb[6].mxu1  ;;  %v1430_v60 = vadd.f32 %v6778_v55, %v1429_v20 }
 0x200   : > { %v1432_v12 = vpop.f32.mrb[7].mxu1  ;;  %v1441_v43 = vadd.f32 %v4986_v41, %v6778_v55 }
 0x201   : > { %v1433_v2 = vadd.f32 %v6778_v55, %v1432_v12 }
 0x202   : > { %4063 = vxpose.xlu0.b32.cont [5/16] (narrow) %v1430_v60, 8 }
 0x203   : > { %v3161_v33 = vpop.f32.mrb[44].mxu0 }
 0x204   : > { %v3162_v59 = vadd.f32 %v3161_v33, %v6734_v36  ;;  %v3163_v26 = vpop.f32.mrb[45].mxu0 }
 0x205   : > { %v3164_v38 = vadd.f32 %v3163_v26, %v6736_v22  ;;  %v3165_v19 = vpop.f32.mrb[46].mxu0  ;;  %v4989_v32 = vpop.f32.mrb[8].mxu1 }
 0x206   : > { %v3507_v51 = vmax.f32 %v3162_v59, 0.0  ;;  %v3166_v44 = vadd.f32 %v3165_v19, %v6734_v36  ;;  %v3167_v54 = vpop.f32.mrb[47].mxu0  ;;  %v1445_v3 = vpop.f32.mrb[9].mxu1  ;;  %4064 = vxpose.xlu0.b32.cont [6/16] (narrow) %v1433_v2, 8  ;;  %v1454_v15 = vadd.f32 %v4989_v32, %v6778_v55 }
 0x207   : > { %v3508_v14 = vmax.f32 %v3164_v38, 0.0  ;;  %v3168_v40 = vadd.f32 %v3167_v54, %v6736_v22  ;;  %v4990_v47 = vpop.f32.mrb[10].mxu1  ;;  %v1446_v17 = vadd.f32 %v6778_v55, %v1445_v3 }
 0x208   : > { %v3511_v31 = vmax.f32 %v3166_v44, 0.0  ;;  %v1448_v45 = vpop.f32.mrb[11].mxu1  ;;  %v1457_v58 = vadd.f32 %v4990_v47, %v6778_v55 }
 0x209   : > { %v4854_v48 = vpack.c.bf16 %v3508_v14, %v3507_v51  ;;  %v3512_v56 = vmax.f32 %v3168_v40, 0.0  ;;  %v1449_v30 = vadd.f32 %v6778_v55, %v1448_v45 }
 0x20a   : > { %v3623_v8 = vpack.c.bf16 %v3511_v31, %v3507_v51  ;;  %4065 = vxpose.xlu0.b32.cont [7/16] (narrow) %v1438_v25, 8 }
 0x20b   : > { %4007 = vst [vmem:[%s6757_s17 + $0x60] sm:$0xff] %v4854_v48  ;;  %v3624_v34 = vpack.c.bf16 %v3512_v56, %v3508_v14  ;;  %v4856_v29 = vpack.c.bf16 %v3512_v56, %v3511_v31 }
 0x20d   : > { %4009 = vst [vmem:[%s6757_s17 + $0x70] sm:$0xff] %v4856_v29  ;;  %4182 = vmatprep.subr.bf16.mxu0 %v3624_v34 }
 0x20e   : > { %4183 = vmatpush1.bf16.msra.mxu0 %v3623_v8  ;;  %v6799_v13 = vpop.f32.mrb[12].mxu1  ;;  %4066 = vxpose.xlu0.b32.cont [8/16] (narrow) %v1441_v43, 8 }
 0x20f   : > { %v1461_v16 = vpop.f32.mrb[13].mxu1 }
 0x210   : > { %v6801_v50 = vpop.f32.mrb[14].mxu1  ;;  %v1462_v14 = vadd.f32 %v6778_v55, %v1461_v16 }
 0x211   : > { %v6803_v0 = vpop.f32.mrb[15].mxu1 }
 0x212   : > { %4067 = vxpose.xlu0.b32.cont [9/16] (narrow) %v1446_v17, 8  ;;  %v1465_v16 = vadd.f32 %v6778_v55, %v6803_v0 }
 0x213   : > { %v3171_v53 = vpop.f32.mrb[48].mxu0 }
 0x214   : > { %v3172_v28 = vadd.f32 %v3171_v53, %v6734_v36  ;;  %v3173_v62 = vpop.f32.mrb[49].mxu0 }
 0x215   : > { %v3174_v24 = vadd.f32 %v3173_v62, %v6736_v22  ;;  %v3175_v46 = vpop.f32.mrb[50].mxu0 }
 0x216   : > { %v3515_v42 = vmax.f32 %v3172_v28, 0.0  ;;  %v3176_v5 = vadd.f32 %v3175_v46, %v6734_v36  ;;  %v3177_v21 = vpop.f32.mrb[51].mxu0  ;;  %4068 = vxpose.xlu0.b32.cont [10/16] (narrow) %v1449_v30, 8 }
 0x217   : > { %v4997_v1 = vpop.f32.mrb[16].mxu1  ;;  %v3516_v11 = vmax.f32 %v3174_v24, 0.0  ;;  %v3178_v49 = vadd.f32 %v3177_v21, %v6736_v22 }
 0x218   : > { %v1477_v37 = vpop.f32.mrb[17].mxu1  ;;  %v3519_v35 = vmax.f32 %v3176_v5, 0.0  ;;  %v1486_v20 = vadd.f32 %v4997_v1, %v6778_v55 }
 0x219   : > { %v1478_v39 = vadd.f32 %v6778_v55, %v1477_v37  ;;  %v4998_v63 = vpop.f32.mrb[18].mxu1  ;;  %v4858_v9 = vpack.c.bf16 %v3516_v11, %v3515_v42  ;;  %v3520_v6 = vmax.f32 %v3178_v49, 0.0  ;;  %v1473_v49 = vadd.f32 %v6801_v50, %v6778_v55 }
 0x21a   : > { %v1480_v57 = vpop.f32.mrb[19].mxu1  ;;  %v3627_v7 = vpack.c.bf16 %v3519_v35, %v3515_v42  ;;  %4069 = vxpose.xlu0.b32.cont [11/16] (narrow) %v1454_v15, 8  ;;  %v1489_v19 = vadd.f32 %v4998_v63, %v6778_v55  ;;  %v1470_v42 = vadd.f32 %v6799_v13, %v6778_v55 }
 0x21b   : > { %4091 = vxpose.xlu1.b32.start [1/16] (narrow) %v1478_v39, 8  ;;  %4011 = vst [vmem:[%s6757_s17 + $0x80] sm:$0xff] %v4858_v9  ;;  %v3628_v10 = vpack.c.bf16 %v3520_v6, %v3516_v11  ;;  %v4860_v27 = vpack.c.bf16 %v3520_v6, %v3519_v35  ;;  %v1481_v52 = vadd.f32 %v6778_v55, %v1480_v57 }
 0x21d   : > { %4013 = vst [vmem:[%s6757_s17 + $0x90] sm:$0xff] %v4860_v27  ;;  %4184 = vmatprep.subr.bf16.mxu0 %v3628_v10 }
 0x21e   : > { %4185 = vmatpush1.bf16.msra.mxu0 %v3627_v7  ;;  %4070 = vxpose.xlu0.b32.cont [12/16] (narrow) %v1457_v58, 8 }
 0x21f   : > { %4092 = vxpose.xlu1.b32.cont [2/16] (narrow) %v1481_v52, 8 }
 0x221   : > { %v5001_v61 = vpop.f32.mrb[20].mxu1 }
 0x222   : > { %v1493_v41 = vpop.f32.mrb[21].mxu1  ;;  %4071 = vxpose.xlu0.b32.cont [13/16] (narrow) %v1462_v14, 8  ;;  %v1502_v5 = vadd.f32 %v5001_v61, %v6778_v55 }
 0x223   : > { %v5002_v12 = vpop.f32.mrb[22].mxu1  ;;  %4093 = vxpose.xlu1.b32.cont [3/16] (narrow) %v1486_v20, 8  ;;  %v3181_v59 = vpop.f32.mrb[52].mxu0  ;;  %v1494_v48 = vadd.f32 %v6778_v55, %v1493_v41 }
 0x224   : > { %v1496_v33 = vpop.f32.mrb[23].mxu1  ;;  %v3182_v26 = vadd.f32 %v3181_v59, %v6734_v36  ;;  %v3183_v38 = vpop.f32.mrb[53].mxu0  ;;  %v1505_v6 = vadd.f32 %v5002_v12, %v6778_v55 }
 0x225   : > { %v3184_v51 = vadd.f32 %v3183_v38, %v6736_v22  ;;  %v3185_v44 = vpop.f32.mrb[54].mxu0  ;;  %v1497_v46 = vadd.f32 %v6778_v55, %v1496_v33 }
 0x226   : > { %v3523_v54 = vmax.f32 %v3182_v26, 0.0  ;;  %v3186_v60 = vadd.f32 %v3185_v44, %v6734_v36  ;;  %v3187_v32 = vpop.f32.mrb[55].mxu0  ;;  %4072 = vxpose.xlu0.b32.cont [14/16] (narrow) %v1465_v16, 8 }
 0x227   : > { %4094 = vxpose.xlu1.b32.cont [4/16] (narrow) %v1489_v19, 8  ;;  %v3524_v40 = vmax.f32 %v3184_v51, 0.0  ;;  %v3188_v3 = vadd.f32 %v3187_v32, %v6736_v22 }
 0x228   : > { %v3527_v47 = vmax.f32 %v3186_v60, 0.0 }
 0x229   : > { %v5005_v31 = vpop.f32.mrb[24].mxu1  ;;  %v4862_v8 = vpack.c.bf16 %v3524_v40, %v3523_v54  ;;  %v3528_v2 = vmax.f32 %v3188_v3, 0.0 }
 0x22a   : > { %v6827_v56 = vadd.f32 %v5005_v31, %v6778_v55  ;;  %v1509_v45 = vpop.f32.mrb[25].mxu1  ;;  %v3631_v25 = vpack.c.bf16 %v3527_v47, %v3523_v54  ;;  %4073 = vxpose.xlu0.b32.cont [15/16] (narrow) %v1470_v42, 8 }
 0x22b   : > { %v1510_v34 = vadd.f32 %v6778_v55, %v1509_v45  ;;  %v5006_v29 = vpop.f32.mrb[26].mxu1  ;;  %4095 = vxpose.xlu1.b32.cont [5/16] (narrow) %v1494_v48, 8  ;;  %4015 = vst [vmem:[%s6757_s17 + $0xa0] sm:$0xff] %v4862_v8  ;;  %v3632_v28 = vpack.c.bf16 %v3528_v2, %v3524_v40  ;;  %v4864_v62 = vpack.c.bf16 %v3528_v2, %v3527_v47  ;;  %v5283_v2 = vmov -inf  }
 0x22c   : > { %v6833_v43 = vadd.f32 %v5006_v29, %v6778_v55  ;;  %v1512_v53 = vpop.f32.mrb[27].mxu1  ;;  %4130 = vst.msk [vmem:[%s6874_s30] sm:$0xff] %vm4129_vm0, %v5283_v2 }
 0x22d   : > { %v1513_v24 = vadd.f32 %v6778_v55, %v1512_v53  ;;  %4017 = vst [vmem:[%s6757_s17 + $0xb0] sm:$0xff] %v4864_v62  ;;  %4186 = vmatprep.subr.bf16.mxu0 %v3632_v28 }
 0x22e   : > { %4187 = vmatpush1.bf16.msra.mxu0 %v3631_v25  ;;  %4074 = vxpose.xlu0.b32.end [16/16] (narrow) %v1473_v49, 8 }
 0x22f   : > { %4096 = vxpose.xlu1.b32.cont [6/16] (narrow) %v1497_v46, 8 }
 0x231   : > { %v5009_v0 = vpop.f32.mrb[28].mxu1 }
 0x232   : > { %v6843_v21 = vadd.f32 %v5009_v0, %v6778_v55  ;;  %v1525_v17 = vpop.f32.mrb[29].mxu1 }
 0x233   : > { %v6846_v1 = vadd.f32 %v6778_v55, %v1525_v17  ;;  %v5010_v11 = vpop.f32.mrb[30].mxu1  ;;  %4097 = vxpose.xlu1.b32.cont [7/16] (narrow) %v1502_v5, 8  ;;  %v3191_v35 = vpop.f32.mrb[56].mxu0 }
 0x234   : > { %v6851_v37 = vadd.f32 %v5010_v11, %v6778_v55  ;;  %v1528_v13 = vpop.f32.mrb[31].mxu1  ;;  %v3192_v63 = vadd.f32 %v3191_v35, %v6734_v36  ;;  %v3193_v9 = vpop.f32.mrb[57].mxu0 }
 0x235   : > { %v6854_v39 = vadd.f32 %v6778_v55, %v1528_v13  ;;  %v3194_v57 = vadd.f32 %v3193_v9, %v6736_v22  ;;  %v3195_v7 = vpop.f32.mrb[58].mxu0 }
 0x236   : > { %v3531_v30 = vmax.f32 %v3192_v63, 0.0  ;;  %v3196_v50 = vadd.f32 %v3195_v7, %v6734_v36  ;;  %v3197_v10 = vpop.f32.mrb[59].mxu0 }
 0x237   : > { %4098 = vxpose.xlu1.b32.cont [8/16] (narrow) %v1505_v6, 8  ;;  %v3532_v27 = vmax.f32 %v3194_v57, 0.0  ;;  %v3198_v52 = vadd.f32 %v3197_v10, %v6736_v22 }
 0x238   : > { %v3535_v61 = vmax.f32 %v3196_v50, 0.0 }
 0x239   : > { %v3324_v15 = vpop.f32.mrb[32].mxu1  ;;  %v4866_v55 = vpack.c.bf16 %v3532_v27, %v3531_v30  ;;  %v3536_v12 = vmax.f32 %v3198_v52, 0.0 }
 0x23a   : > { %v3325_v20 = vadd.f32 %v3324_v15, %v6708_v18  ;;  %v3326_v41 = vpop.f32.mrb[33].mxu1  ;;  %v3635_v59 = vpack.c.bf16 %v3535_v61, %v3531_v30 }
 0x23b   : > { %v3327_v58 = vadd.f32 %v3326_v41, %v6711_v4  ;;  %v3328_v33 = vpop.f32.mrb[34].mxu1  ;;  %4099 = vxpose.xlu1.b32.cont [9/16] (narrow) %v1510_v34, 8  ;;  %4019 = vst [vmem:[%s6757_s17 + $0xc0] sm:$0xff] %v4866_v55  ;;  %v3636_v51 = vpack.c.bf16 %v3536_v12, %v3532_v27  ;;  %v4868_v44 = vpack.c.bf16 %v3536_v12, %v3535_v61 }
 0x23c   : > { %v3485_v26 = vmax.f32 %v3325_v20, 0.0  ;;  %v3329_v38 = vadd.f32 %v3328_v33, %v6708_v18  ;;  %v3330_v19 = vpop.f32.mrb[35].mxu1 }
 0x23d   : > { %v3486_v54 = vmax.f32 %v3327_v58, 0.0  ;;  %v3331_v60 = vadd.f32 %v3330_v19, %v6711_v4  ;;  %4021 = vst [vmem:[%s6757_s17 + $0xd0] sm:$0xff] %v4868_v44  ;;  %4188 = vmatprep.subr.bf16.mxu0 %v3636_v51 }
 0x23e   : > { %v3489_v32 = vmax.f32 %v3329_v38, 0.0  ;;  %4189 = vmatpush1.bf16.msra.mxu0 %v3635_v59 }
 0x23f   : > { %v4843_v14 = vpack.c.bf16 %v3486_v54, %v3485_v26  ;;  %v3490_v40 = vmax.f32 %v3331_v60, 0.0  ;;  %4100 = vxpose.xlu1.b32.cont [10/16] (narrow) %v1513_v24, 8 }
 0x240   : > { %v3613_v3 = vpack.c.bf16 %v3489_v32, %v3485_v26 }
 0x241   : > { %3996 = vst [vmem:[%s6757_s17 + $0x8] sm:$0xff] %v4843_v14  ;;  %v3614_v31 = vpack.c.bf16 %v3490_v40, %v3486_v54  ;;  %v4845_v47 = vpack.c.bf16 %v3490_v40, %v3489_v32  ;;  %v3334_v48 = vpop.f32.mrb[36].mxu1 }
 0x242   : > { %v3335_v45 = vadd.f32 %v3334_v48, %v6708_v18  ;;  %v3336_v8 = vpop.f32.mrb[37].mxu1 }
 0x243   : > { %3998 = vst [vmem:[%s6757_s17 + $0x18] sm:$0xff] %v4845_v47  ;;  %v3337_v34 = vadd.f32 %v3336_v8, %v6711_v4  ;;  %v3338_v29 = vpop.f32.mrb[38].mxu1  ;;  %4217 = vmatprep.subr.bf16.mxu1 %v3614_v31  ;;  %4101 = vxpose.xlu1.b32.cont [11/16] (narrow) %v6827_v56, 8  ;;  %v3201_v28 = vpop.f32.mrb[60].mxu0 }
 0x244   : > { %v3493_v25 = vmax.f32 %v3335_v45, 0.0  ;;  %v3339_v16 = vadd.f32 %v3338_v29, %v6708_v18  ;;  %v3340_v53 = vpop.f32.mrb[39].mxu1  ;;  %4218 = vmatpush1.bf16.msra.mxu1 %v3613_v3  ;;  %v3202_v46 = vadd.f32 %v3201_v28, %v6734_v36  ;;  %v3203_v42 = vpop.f32.mrb[61].mxu0 }
 0x245   : > { %v3494_v62 = vmax.f32 %v3337_v34, 0.0  ;;  %v3341_v24 = vadd.f32 %v3340_v53, %v6711_v4  ;;  %v3204_v5 = vadd.f32 %v3203_v42, %v6736_v22  ;;  %v3205_v17 = vpop.f32.mrb[62].mxu0 }
 0x246   : > { %v3497_v0 = vmax.f32 %v3339_v16, 0.0  ;;  %v3539_v13 = vmax.f32 %v3202_v46, 0.0  ;;  %v3206_v56 = vadd.f32 %v3205_v17, %v6734_v36  ;;  %v3207_v35 = vpop.f32.mrb[63].mxu0 }
 0x247   : > { %v4847_v11 = vpack.c.bf16 %v3494_v62, %v3493_v25  ;;  %v3498_v49 = vmax.f32 %v3341_v24, 0.0  ;;  %4102 = vxpose.xlu1.b32.cont [12/16] (narrow) %v6833_v43, 8  ;;  %v3540_v9 = vmax.f32 %v3204_v5, 0.0  ;;  %v3208_v6 = vadd.f32 %v3207_v35, %v6736_v22 }
 0x248   : > { %v3617_v63 = vpack.c.bf16 %v3497_v0, %v3493_v25  ;;  %v3543_v50 = vmax.f32 %v3206_v56, 0.0 }
 0x249   : > { %4000 = vst [vmem:[%s6757_s17 + $0x28] sm:$0xff] %v4847_v11  ;;  %v3618_v57 = vpack.c.bf16 %v3498_v49, %v3494_v62  ;;  %v4849_v7 = vpack.c.bf16 %v3498_v49, %v3497_v0  ;;  %v3344_v30 = vpop.f32.mrb[40].mxu1  ;;  %v4870_v52 = vpack.c.bf16 %v3540_v9, %v3539_v13  ;;  %v3544_v15 = vmax.f32 %v3208_v6, 0.0 }
 0x24a   : > { %v3345_v10 = vadd.f32 %v3344_v30, %v6708_v18  ;;  %v3346_v27 = vpop.f32.mrb[41].mxu1  ;;  %v3639_v20 = vpack.c.bf16 %v3543_v50, %v3539_v13 }
 0x24b   : > { %4002 = vst [vmem:[%s6757_s17 + $0x38] sm:$0xff] %v4849_v7  ;;  %4219 = vmatprep.subr.bf16.mxu1 %v3618_v57  ;;  %v3347_v61 = vadd.f32 %v3346_v27, %v6711_v4  ;;  %v3348_v43 = vpop.f32.mrb[42].mxu1  ;;  %4103 = vxpose.xlu1.b32.cont [13/16] (narrow) %v6846_v1, 8  ;;  %4023 = vst [vmem:[%s6757_s17 + $0xe0] sm:$0xff] %v4870_v52  ;;  %v3640_v58 = vpack.c.bf16 %v3544_v15, %v3540_v9 }
 0x24c   : > { %4220 = vmatpush1.bf16.msra.mxu1 %v3617_v63  ;;  %v3501_v41 = vmax.f32 %v3345_v10, 0.0  ;;  %v3349_v55 = vadd.f32 %v3348_v43, %v6708_v18  ;;  %v3350_v12 = vpop.f32.mrb[43].mxu1  ;;  %v4872_v33 = vpack.c.bf16 %v3544_v15, %v3543_v50 }
 0x24d   : > { %v3502_v59 = vmax.f32 %v3347_v61, 0.0  ;;  %v3351_v26 = vadd.f32 %v3350_v12, %v6711_v4  ;;  %4190 = vmatprep.subr.bf16.mxu0 %v3640_v58 }
 0x24e   : > { %v3505_v38 = vmax.f32 %v3349_v55, 0.0  ;;  %4025 = vst [vmem:[%s6757_s17 + $0xf0] sm:$0xff] %v4872_v33  ;;  %4191 = vmatpush1.bf16.msra.mxu0 %v3639_v20 }
 0x24f   : > { %v4851_v19 = vpack.c.bf16 %v3502_v59, %v3501_v41  ;;  %v3506_v51 = vmax.f32 %v3351_v26, 0.0  ;;  %4104 = vxpose.xlu1.b32.cont [14/16] (narrow) %v6854_v39, 8 }
 0x250   : > { %v3621_v1 = vpack.c.bf16 %v3505_v38, %v3501_v41 }
 0x251   : > { %4004 = vst [vmem:[%s6757_s17 + $0x48] sm:$0xff] %v4851_v19  ;;  %v3622_v44 = vpack.c.bf16 %v3506_v51, %v3502_v59  ;;  %v4853_v54 = vpack.c.bf16 %v3506_v51, %v3505_v38  ;;  %v3354_v60 = vpop.f32.mrb[44].mxu1 }
 0x252   : > { %v3355_v32 = vadd.f32 %v3354_v60, %v6708_v18  ;;  %v3356_v14 = vpop.f32.mrb[45].mxu1 }
 0x253   : > { %4006 = vst [vmem:[%s6757_s17 + $0x58] sm:$0xff] %v4853_v54  ;;  %4221 = vmatprep.subr.bf16.mxu1 %v3622_v44  ;;  %v3357_v40 = vadd.f32 %v3356_v14, %v6711_v4  ;;  %v3358_v3 = vpop.f32.mrb[46].mxu1  ;;  %4105 = vxpose.xlu1.b32.cont [15/16] (narrow) %v6843_v21, 8  ;;  %v3211_v48 = vpop.f32.mrb[64].mxu0 }
 0x254   : > { %4222 = vmatpush1.bf16.msra.mxu1 %v3621_v1  ;;  %v3509_v31 = vmax.f32 %v3355_v32, 0.0  ;;  %v3359_v47 = vadd.f32 %v3358_v3, %v6708_v18  ;;  %v3360_v39 = vpop.f32.mrb[47].mxu1  ;;  %v3212_v2 = vadd.f32 %v3211_v48, %v6734_v36  ;;  %v3213_v34 = vpop.f32.mrb[65].mxu0 }
 0x255   : > { %v3510_v45 = vmax.f32 %v3357_v40, 0.0  ;;  %v3361_v8 = vadd.f32 %v3360_v39, %v6711_v4  ;;  %v3214_v25 = vadd.f32 %v3213_v34, %v6736_v22  ;;  %v3215_v16 = vpop.f32.mrb[66].mxu0 }
 0x256   : > { %v3513_v29 = vmax.f32 %v3359_v47, 0.0  ;;  %v3547_v21 = vmax.f32 %v3212_v2, 0.0  ;;  %v3216_v62 = vadd.f32 %v3215_v16, %v6734_v36  ;;  %v3217_v24 = vpop.f32.mrb[67].mxu0 }
 0x257   : > { %v4855_v53 = vpack.c.bf16 %v3510_v45, %v3509_v31  ;;  %v3514_v28 = vmax.f32 %v3361_v8, 0.0  ;;  %4106 = vxpose.xlu1.b32.end [16/16] (narrow) %v6851_v37, 8  ;;  %v3548_v42 = vmax.f32 %v3214_v25, 0.0  ;;  %v3218_v0 = vadd.f32 %v3217_v24, %v6736_v22  ;;  %5093 = vset.pattern.permute.xlu0 %v5282_v23 }
 0x258   : > { %v3625_v46 = vpack.c.bf16 %v3513_v29, %v3509_v31  ;;  %v3551_v49 = vmax.f32 %v3216_v62, 0.0 }
 0x259   : > { %4008 = vst [vmem:[%s6757_s17 + $0x68] sm:$0xff] %v4855_v53  ;;  %v3626_v5 = vpack.c.bf16 %v3514_v28, %v3510_v45  ;;  %v4857_v17 = vpack.c.bf16 %v3514_v28, %v3513_v29  ;;  %v3364_v11 = vpop.f32.mrb[48].mxu1  ;;  %v4874_v35 = vpack.c.bf16 %v3548_v42, %v3547_v21  ;;  %v3552_v63 = vmax.f32 %v3218_v0, 0.0 }
 0x25a   : > { %v3365_v13 = vadd.f32 %v3364_v11, %v6708_v18  ;;  %v3366_v56 = vpop.f32.mrb[49].mxu1  ;;  %v3643_v6 = vpack.c.bf16 %v3551_v49, %v3547_v21 }
 0x25b   : > { %4010 = vst [vmem:[%s6757_s17 + $0x78] sm:$0xff] %v4857_v17  ;;  %4223 = vmatprep.subr.bf16.mxu1 %v3626_v5  ;;  %v3367_v37 = vadd.f32 %v3366_v56, %v6711_v4  ;;  %v3368_v9 = vpop.f32.mrb[50].mxu1  ;;  %4027 = vst [vmem:[%s6757_s17 + $0x100] sm:$0xff] %v4874_v35  ;;  %v3644_v50 = vpack.c.bf16 %v3552_v63, %v3548_v42  ;;  %v4876_v10 = vpack.c.bf16 %v3552_v63, %v3551_v49 }
 0x25c   : > { %4224 = vmatpush1.bf16.msra.mxu1 %v3625_v46  ;;  %v3517_v57 = vmax.f32 %v3365_v13, 0.0  ;;  %v3369_v7 = vadd.f32 %v3368_v9, %v6708_v18  ;;  %v3370_v30 = vpop.f32.mrb[51].mxu1 }
 0x25d   : > { %v3518_v27 = vmax.f32 %v3367_v37, 0.0  ;;  %v3371_v52 = vadd.f32 %v3370_v30, %v6711_v4  ;;  %4029 = vst [vmem:[%s6757_s17 + $0x110] sm:$0xff] %v4876_v10  ;;  %4192 = vmatprep.subr.bf16.mxu0 %v3644_v50 }
 0x25e   : > { %v3521_v15 = vmax.f32 %v3369_v7, 0.0  ;;  %4193 = vmatpush1.bf16.msra.mxu0 %v3643_v6 }
 0x25f   : > { %v4859_v61 = vpack.c.bf16 %v3518_v27, %v3517_v57  ;;  %v3522_v43 = vmax.f32 %v3371_v52, 0.0 }
 0x260   : > { %v3629_v20 = vpack.c.bf16 %v3521_v15, %v3517_v57 }
 0x261   : > { %4012 = vst [vmem:[%s6757_s17 + $0x88] sm:$0xff] %v4859_v61  ;;  %v3630_v41 = vpack.c.bf16 %v3522_v43, %v3518_v27  ;;  %v4861_v55 = vpack.c.bf16 %v3522_v43, %v3521_v15  ;;  %v3374_v12 = vpop.f32.mrb[52].mxu1 }
 0x262   : > { %v3375_v58 = vadd.f32 %v3374_v12, %v6708_v18  ;;  %v3376_v33 = vpop.f32.mrb[53].mxu1 }
 0x263   : > { %4014 = vst [vmem:[%s6757_s17 + $0x98] sm:$0xff] %v4861_v55  ;;  %4225 = vmatprep.subr.bf16.mxu1 %v3630_v41  ;;  %v3377_v59 = vadd.f32 %v3376_v33, %v6711_v4  ;;  %v3378_v26 = vpop.f32.mrb[54].mxu1  ;;  %v3221_v1 = vpop.f32.mrb[68].mxu0 }
 0x264   : > { %4226 = vmatpush1.bf16.msra.mxu1 %v3629_v20  ;;  %v3525_v38 = vmax.f32 %v3375_v58, 0.0  ;;  %v3379_v19 = vadd.f32 %v3378_v26, %v6708_v18  ;;  %v3380_v51 = vpop.f32.mrb[55].mxu1  ;;  %v3222_v60 = vadd.f32 %v3221_v1, %v6734_v36  ;;  %v3223_v32 = vpop.f32.mrb[69].mxu0 }
 0x265   : > { %v3526_v44 = vmax.f32 %v3377_v59, 0.0  ;;  %v3381_v54 = vadd.f32 %v3380_v51, %v6711_v4  ;;  %v3224_v40 = vadd.f32 %v3223_v32, %v6736_v22  ;;  %v3225_v3 = vpop.f32.mrb[70].mxu0 }
 0x266   : > { %v3529_v14 = vmax.f32 %v3379_v19, 0.0  ;;  %v3555_v39 = vmax.f32 %v3222_v60, 0.0  ;;  %v3226_v48 = vadd.f32 %v3225_v3, %v6734_v36  ;;  %v3227_v45 = vpop.f32.mrb[71].mxu0 }
 0x267   : > { %v4863_v31 = vpack.c.bf16 %v3526_v44, %v3525_v38  ;;  %v3530_v47 = vmax.f32 %v3381_v54, 0.0  ;;  %v3556_v2 = vmax.f32 %v3224_v40, 0.0  ;;  %v3228_v34 = vadd.f32 %v3227_v45, %v6736_v22 }
 0x268   : > { %v3633_v8 = vpack.c.bf16 %v3529_v14, %v3525_v38  ;;  %v3559_v53 = vmax.f32 %v3226_v48, 0.0 }
 0x269   : > { %4016 = vst [vmem:[%s6757_s17 + $0xa8] sm:$0xff] %v4863_v31  ;;  %v3634_v29 = vpack.c.bf16 %v3530_v47, %v3526_v44  ;;  %v4865_v25 = vpack.c.bf16 %v3530_v47, %v3529_v14  ;;  %v3384_v16 = vpop.f32.mrb[56].mxu1  ;;  %v4878_v62 = vpack.c.bf16 %v3556_v2, %v3555_v39  ;;  %v3560_v24 = vmax.f32 %v3228_v34, 0.0 }
 0x26a   : > { %v3385_v28 = vadd.f32 %v3384_v16, %v6708_v18  ;;  %v3386_v21 = vpop.f32.mrb[57].mxu1  ;;  %v3647_v0 = vpack.c.bf16 %v3559_v53, %v3555_v39 }
 0x26b   : > { %4018 = vst [vmem:[%s6757_s17 + $0xb8] sm:$0xff] %v4865_v25  ;;  %4227 = vmatprep.subr.bf16.mxu1 %v3634_v29  ;;  %v3387_v46 = vadd.f32 %v3386_v21, %v6711_v4  ;;  %v3388_v42 = vpop.f32.mrb[58].mxu1  ;;  %4031 = vst [vmem:[%s6757_s17 + $0x120] sm:$0xff] %v4878_v62  ;;  %v3648_v49 = vpack.c.bf16 %v3560_v24, %v3556_v2  ;;  %v4880_v13 = vpack.c.bf16 %v3560_v24, %v3559_v53 }
 0x26c   : > { %4228 = vmatpush1.bf16.msra.mxu1 %v3633_v8  ;;  %v3533_v5 = vmax.f32 %v3385_v28, 0.0  ;;  %v3389_v17 = vadd.f32 %v3388_v42, %v6708_v18  ;;  %v3390_v11 = vpop.f32.mrb[59].mxu1 }
 0x26d   : > { %v3534_v56 = vmax.f32 %v3387_v46, 0.0  ;;  %v3391_v35 = vadd.f32 %v3390_v11, %v6711_v4  ;;  %4033 = vst [vmem:[%s6757_s17 + $0x130] sm:$0xff] %v4880_v13  ;;  %4194 = vmatprep.subr.bf16.mxu0 %v3648_v49 }
 0x26e   : > { %v3537_v63 = vmax.f32 %v3389_v17, 0.0  ;;  %4195 = vmatpush1.bf16.msra.mxu0 %v3647_v0 }
 0x26f   : > { %v4867_v37 = vpack.c.bf16 %v3534_v56, %v3533_v5  ;;  %v3538_v9 = vmax.f32 %v3391_v35, 0.0 }
 0x270   : > { %v3637_v6 = vpack.c.bf16 %v3537_v63, %v3533_v5 }
 0x271   : > { %4020 = vst [vmem:[%s6757_s17 + $0xc8] sm:$0xff] %v4867_v37  ;;  %v3638_v57 = vpack.c.bf16 %v3538_v9, %v3534_v56  ;;  %v4869_v7 = vpack.c.bf16 %v3538_v9, %v3537_v63  ;;  %v3394_v30 = vpop.f32.mrb[60].mxu1 }
 0x272   : > { %v3395_v50 = vadd.f32 %v3394_v30, %v6708_v18  ;;  %v3396_v10 = vpop.f32.mrb[61].mxu1  ;;  %v6951_v31 = vpop.trf.xlu0 }
 0x273   : > { %4022 = vst [vmem:[%s6757_s17 + $0xd8] sm:$0xff] %v4869_v7  ;;  %4229 = vmatprep.subr.bf16.mxu1 %v3638_v57  ;;  %v3397_v27 = vadd.f32 %v3396_v10, %v6711_v4  ;;  %v3398_v52 = vpop.f32.mrb[62].mxu1  ;;  %v3231_v55 = vpop.f32.mrb[72].mxu0  ;;  %4123 = vst [vmem:[%s6954_s4] sm:$0xff] %v6951_v31 }
 0x274   : > { %4230 = vmatpush1.bf16.msra.mxu1 %v3637_v6  ;;  %v3541_v15 = vmax.f32 %v3395_v50, 0.0  ;;  %v3399_v61 = vadd.f32 %v3398_v52, %v6708_v18  ;;  %v3400_v43 = vpop.f32.mrb[63].mxu1  ;;  %v3232_v58 = vadd.f32 %v3231_v55, %v6734_v36  ;;  %v3233_v33 = vpop.f32.mrb[73].mxu0 }
 0x275   : > { %v3542_v20 = vmax.f32 %v3397_v27, 0.0  ;;  %v3401_v41 = vadd.f32 %v3400_v43, %v6711_v4  ;;  %5092 = vset.pattern.permute.xlu1 %v5282_v23  ;;  %v3234_v38 = vadd.f32 %v3233_v33, %v6736_v22  ;;  %v3235_v19 = vpop.f32.mrb[74].mxu0 }
 0x276   : > { %v3545_v12 = vmax.f32 %v3399_v61, 0.0  ;;  %v3563_v1 = vmax.f32 %v3232_v58, 0.0  ;;  %v3236_v44 = vadd.f32 %v3235_v19, %v6734_v36  ;;  %v3237_v54 = vpop.f32.mrb[75].mxu0 }
 0x277   : > { %v4871_v59 = vpack.c.bf16 %v3542_v20, %v3541_v15  ;;  %v3546_v26 = vmax.f32 %v3401_v41, 0.0  ;;  %v3564_v40 = vmax.f32 %v3234_v38, 0.0  ;;  %v3238_v3 = vadd.f32 %v3237_v54, %v6736_v22 }
 0x278   : > { %v3641_v51 = vpack.c.bf16 %v3545_v12, %v3541_v15  ;;  %v3567_v39 = vmax.f32 %v3236_v44, 0.0 }
 0x279   : > { %4024 = vst [vmem:[%s6757_s17 + $0xe8] sm:$0xff] %v4871_v59  ;;  %v3642_v60 = vpack.c.bf16 %v3546_v26, %v3542_v20  ;;  %v4873_v32 = vpack.c.bf16 %v3546_v26, %v3545_v12  ;;  %v3404_v14 = vpop.f32.mrb[64].mxu1  ;;  %v4882_v8 = vpack.c.bf16 %v3564_v40, %v3563_v1  ;;  %v3568_v2 = vmax.f32 %v3238_v3, 0.0 }
 0x27a   : > { %v3405_v23 = vadd.f32 %v3404_v14, %v6708_v18  ;;  %v3406_v47 = vpop.f32.mrb[65].mxu1  ;;  %v3651_v16 = vpack.c.bf16 %v3567_v39, %v3563_v1 }
 0x27b   : > { %4026 = vst [vmem:[%s6757_s17 + $0xf8] sm:$0xff] %v4873_v32  ;;  %4231 = vmatprep.subr.bf16.mxu1 %v3642_v60  ;;  %v3407_v48 = vadd.f32 %v3406_v47, %v6711_v4  ;;  %v3408_v45 = vpop.f32.mrb[66].mxu1  ;;  %4035 = vst [vmem:[%s6757_s17 + $0x140] sm:$0xff] %v4882_v8  ;;  %v3652_v21 = vpack.c.bf16 %v3568_v2, %v3564_v40  ;;  %v4884_v62 = vpack.c.bf16 %v3568_v2, %v3567_v39 }
 0x27c   : > { %4232 = vmatpush1.bf16.msra.mxu1 %v3641_v51  ;;  %v3549_v34 = vmax.f32 %v3405_v23, 0.0  ;;  %v3409_v29 = vadd.f32 %v3408_v45, %v6708_v18  ;;  %v3410_v25 = vpop.f32.mrb[67].mxu1 }
 0x27d   : > { %v3550_v53 = vmax.f32 %v3407_v48, 0.0  ;;  %v3411_v28 = vadd.f32 %v3410_v25, %v6711_v4  ;;  %4037 = vst [vmem:[%s6757_s17 + $0x150] sm:$0xff] %v4884_v62  ;;  %4196 = vmatprep.subr.bf16.mxu0 %v3652_v21 }
 0x27e   : > { %v3553_v24 = vmax.f32 %v3409_v29, 0.0  ;;  %4197 = vmatpush1.bf16.msra.mxu0 %v3651_v16 }
 0x27f   : > { %v4875_v46 = vpack.c.bf16 %v3550_v53, %v3549_v34  ;;  %v3554_v42 = vmax.f32 %v3411_v28, 0.0 }
 0x280   : > { %v3645_v0 = vpack.c.bf16 %v3553_v24, %v3549_v34 }
 0x281   : > { %4028 = vst [vmem:[%s6757_s17 + $0x108] sm:$0xff] %v4875_v46  ;;  %v3646_v5 = vpack.c.bf16 %v3554_v42, %v3550_v53  ;;  %v4877_v17 = vpack.c.bf16 %v3554_v42, %v3553_v24  ;;  %v3414_v11 = vpop.f32.mrb[68].mxu1 }
 0x282   : > { %v3415_v49 = vadd.f32 %v3414_v11, %v6708_v18  ;;  %v3416_v13 = vpop.f32.mrb[69].mxu1 }
 0x283   : > { %4030 = vst [vmem:[%s6757_s17 + $0x118] sm:$0xff] %v4877_v17  ;;  %4233 = vmatprep.subr.bf16.mxu1 %v3646_v5  ;;  %v3417_v56 = vadd.f32 %v3416_v13, %v6711_v4  ;;  %v3418_v35 = vpop.f32.mrb[70].mxu1  ;;  %v3241_v7 = vpop.f32.mrb[76].mxu0 }
 0x284   : > { %4234 = vmatpush1.bf16.msra.mxu1 %v3645_v0  ;;  %v3557_v63 = vmax.f32 %v3415_v49, 0.0  ;;  %v3419_v37 = vadd.f32 %v3418_v35, %v6708_v18  ;;  %v3420_v9 = vpop.f32.mrb[71].mxu1  ;;  %v3242_v50 = vadd.f32 %v3241_v7, %v6734_v36  ;;  %v3243_v10 = vpop.f32.mrb[77].mxu0 }
 0x285   : > { %v3558_v6 = vmax.f32 %v3417_v56, 0.0  ;;  %v3421_v57 = vadd.f32 %v3420_v9, %v6711_v4  ;;  %v3244_v15 = vadd.f32 %v3243_v10, %v6736_v22  ;;  %v3245_v61 = vpop.f32.mrb[78].mxu0 }
 0x286   : > { %v3561_v30 = vmax.f32 %v3419_v37, 0.0  ;;  %v3571_v20 = vmax.f32 %v3242_v50, 0.0  ;;  %v3246_v41 = vadd.f32 %v3245_v61, %v6734_v36  ;;  %v3247_v55 = vpop.f32.mrb[79].mxu0 }
 0x287   : > { %v4879_v27 = vpack.c.bf16 %v3558_v6, %v3557_v63  ;;  %v3562_v52 = vmax.f32 %v3421_v57, 0.0  ;;  %v3572_v59 = vmax.f32 %v3244_v15, 0.0  ;;  %v3248_v26 = vadd.f32 %v3247_v55, %v6736_v22 }
 0x288   : > { %v3649_v43 = vpack.c.bf16 %v3561_v30, %v3557_v63  ;;  %v3575_v51 = vmax.f32 %v3246_v41, 0.0 }
 0x289   : > { %4032 = vst [vmem:[%s6757_s17 + $0x128] sm:$0xff] %v4879_v27  ;;  %v3650_v12 = vpack.c.bf16 %v3562_v52, %v3558_v6  ;;  %v4881_v58 = vpack.c.bf16 %v3562_v52, %v3561_v30  ;;  %v3424_v33 = vpop.f32.mrb[72].mxu1  ;;  %v4886_v54 = vpack.c.bf16 %v3572_v59, %v3571_v20  ;;  %v3576_v60 = vmax.f32 %v3248_v26, 0.0 }
 0x28a   : > { %v3425_v38 = vadd.f32 %v3424_v33, %v6708_v18  ;;  %v3426_v19 = vpop.f32.mrb[73].mxu1  ;;  %v3655_v3 = vpack.c.bf16 %v3575_v51, %v3571_v20 }
 0x28b   : > { %4034 = vst [vmem:[%s6757_s17 + $0x138] sm:$0xff] %v4881_v58  ;;  %4235 = vmatprep.subr.bf16.mxu1 %v3650_v12  ;;  %v3427_v1 = vadd.f32 %v3426_v19, %v6711_v4  ;;  %v3428_v44 = vpop.f32.mrb[74].mxu1  ;;  %4039 = vst [vmem:[%s6757_s17 + $0x160] sm:$0xff] %v4886_v54  ;;  %v3656_v39 = vpack.c.bf16 %v3576_v60, %v3572_v59  ;;  %v4888_v48 = vpack.c.bf16 %v3576_v60, %v3575_v51 }
 0x28c   : > { %4236 = vmatpush1.bf16.msra.mxu1 %v3649_v43  ;;  %v3565_v32 = vmax.f32 %v3425_v38, 0.0  ;;  %v3429_v14 = vadd.f32 %v3428_v44, %v6708_v18  ;;  %v3430_v40 = vpop.f32.mrb[75].mxu1 }
 0x28d   : > { %v3566_v23 = vmax.f32 %v3427_v1, 0.0  ;;  %v3431_v47 = vadd.f32 %v3430_v40, %v6711_v4  ;;  %4041 = vst [vmem:[%s6757_s17 + $0x170] sm:$0xff] %v4888_v48  ;;  %4198 = vmatprep.subr.bf16.mxu0 %v3656_v39 }
 0x28e   : > { %v3569_v45 = vmax.f32 %v3429_v14, 0.0  ;;  %4199 = vmatpush1.bf16.msra.mxu0 %v3655_v3 }
 0x28f   : > { %v4883_v8 = vpack.c.bf16 %v3566_v23, %v3565_v32  ;;  %v3570_v2 = vmax.f32 %v3431_v47, 0.0 }
 0x290   : > { %v3653_v34 = vpack.c.bf16 %v3569_v45, %v3565_v32 }
 0x291   : > { %4036 = vst [vmem:[%s6757_s17 + $0x148] sm:$0xff] %v4883_v8  ;;  %v3654_v29 = vpack.c.bf16 %v3570_v2, %v3566_v23  ;;  %v4885_v25 = vpack.c.bf16 %v3570_v2, %v3569_v45  ;;  %v3434_v16 = vpop.f32.mrb[76].mxu1 }
 0x292   : > { %v3435_v53 = vadd.f32 %v3434_v16, %v6708_v18  ;;  %v3436_v28 = vpop.f32.mrb[77].mxu1 }
 0x293   : > { %4038 = vst [vmem:[%s6757_s17 + $0x158] sm:$0xff] %v4885_v25  ;;  %4237 = vmatprep.subr.bf16.mxu1 %v3654_v29  ;;  %v3437_v21 = vadd.f32 %v3436_v28, %v6711_v4  ;;  %v3438_v62 = vpop.f32.mrb[78].mxu1  ;;  %v3251_v17 = vpop.f32.mrb[80].mxu0 }
 0x294   : > { %4238 = vmatpush1.bf16.msra.mxu1 %v3653_v34  ;;  %v3573_v24 = vmax.f32 %v3435_v53, 0.0  ;;  %v3439_v46 = vadd.f32 %v3438_v62, %v6708_v18  ;;  %v3440_v42 = vpop.f32.mrb[79].mxu1  ;;  %v3252_v49 = vadd.f32 %v3251_v17, %v6734_v36  ;;  %v3253_v13 = vpop.f32.mrb[81].mxu0 }
 0x295   : > { %v3574_v0 = vmax.f32 %v3437_v21, 0.0  ;;  %v3441_v5 = vadd.f32 %v3440_v42, %v6711_v4  ;;  %v3254_v63 = vadd.f32 %v3253_v13, %v6736_v22  ;;  %v3255_v37 = vpop.f32.mrb[82].mxu0 }
 0x296   : > { %v3577_v11 = vmax.f32 %v3439_v46, 0.0  ;;  %v3579_v6 = vmax.f32 %v3252_v49, 0.0  ;;  %v3256_v57 = vadd.f32 %v3255_v37, %v6734_v36  ;;  %v3257_v7 = vpop.f32.mrb[83].mxu0 }
 0x297   : > { %v4887_v56 = vpack.c.bf16 %v3574_v0, %v3573_v24  ;;  %v3578_v35 = vmax.f32 %v3441_v5, 0.0  ;;  %v3580_v27 = vmax.f32 %v3254_v63, 0.0  ;;  %v3258_v52 = vadd.f32 %v3257_v7, %v6736_v22 }
 0x298   : > { %v3657_v9 = vpack.c.bf16 %v3577_v11, %v3573_v24  ;;  %v3583_v43 = vmax.f32 %v3256_v57, 0.0 }
 0x299   : > { %4040 = vst [vmem:[%s6757_s17 + $0x168] sm:$0xff] %v4887_v56  ;;  %v3658_v30 = vpack.c.bf16 %v3578_v35, %v3574_v0  ;;  %v4889_v50 = vpack.c.bf16 %v3578_v35, %v3577_v11  ;;  %v3444_v10 = vpop.f32.mrb[80].mxu1  ;;  %v4890_v20 = vpack.c.bf16 %v3580_v27, %v3579_v6  ;;  %v3584_v12 = vmax.f32 %v3258_v52, 0.0 }
 0x29a   : > { %v3445_v15 = vadd.f32 %v3444_v10, %v6708_v18  ;;  %v3446_v61 = vpop.f32.mrb[81].mxu1  ;;  %v3659_v59 = vpack.c.bf16 %v3583_v43, %v3579_v6 }
 0x29b   : > { %4042 = vst [vmem:[%s6757_s17 + $0x178] sm:$0xff] %v4889_v50  ;;  %4239 = vmatprep.subr.bf16.mxu1 %v3658_v30  ;;  %v3447_v41 = vadd.f32 %v3446_v61, %v6711_v4  ;;  %v3448_v55 = vpop.f32.mrb[82].mxu1  ;;  %v6996_v58 = vpop.trf.xlu1  ;;  %4043 = vst [vmem:[%s6757_s17 + $0x180] sm:$0xff] %v4890_v20  ;;  %v3660_v1 = vpack.c.bf16 %v3584_v12, %v3580_v27  ;;  %v4892_v44 = vpack.c.bf16 %v3584_v12, %v3583_v43 }
 0x29c   : > { %4240 = vmatpush1.bf16.msra.mxu1 %v3657_v9  ;;  %v3581_v33 = vmax.f32 %v3445_v15, 0.0  ;;  %v3449_v26 = vadd.f32 %v3448_v55, %v6708_v18  ;;  %v3450_v38 = vpop.f32.mrb[83].mxu1  ;;  %4124 = vst [vmem:[%s6954_s4 + $0x8] sm:$0xff] %v6996_v58  ;;  %v4142_v19 = vmax.f32 %v6951_v31, %v6996_v58 }
 0x29d   : > { %v3582_v51 = vmax.f32 %v3447_v41, 0.0  ;;  %v3451_v60 = vadd.f32 %v3450_v38, %v6711_v4  ;;  %4045 = vst [vmem:[%s6757_s17 + $0x190] sm:$0xff] %v4892_v44  ;;  %4200 = vmatprep.subr.bf16.mxu0 %v3660_v1 }
 0x29e   : > { %v3585_v54 = vmax.f32 %v3449_v26, 0.0  ;;  %4143 = vmax.xlane.f32.xlu0 %v4142_v19  ;;  %4201 = vmatpush1.bf16.msra.mxu0 %v3659_v59 }
 0x29f   : > { %v4891_v32 = vpack.c.bf16 %v3582_v51, %v3581_v33  ;;  %v3586_v40 = vmax.f32 %v3451_v60, 0.0 }
 0x2a0   : > { %v3661_v14 = vpack.c.bf16 %v3585_v54, %v3581_v33 }
 0x2a1   : > { %4044 = vst [vmem:[%s6757_s17 + $0x188] sm:$0xff] %v4891_v32  ;;  %v3662_v3 = vpack.c.bf16 %v3586_v40, %v3582_v51  ;;  %v4893_v23 = vpack.c.bf16 %v3586_v40, %v3585_v54  ;;  %v5284_v51 = vmov 0.0  }
 0x2a2   : > { %4131 = vst.msk [vmem:[%s7029_s1] sm:$0xff] %vm4129_vm0, %v5284_v51 }
 0x2a3   : > { %4046 = vst [vmem:[%s6757_s17 + $0x198] sm:$0xff] %v4893_v23  ;;  %4241 = vmatprep.subr.bf16.mxu1 %v3662_v3  ;;  %v3261_v47 = vpop.f32.mrb[84].mxu0  ;;  %v3454_v39 = vpop.f32.mrb[84].mxu1 }
 0x2a4   : > { %4242 = vmatpush1.bf16.msra.mxu1 %v3661_v14  ;;  %v3262_v48 = vadd.f32 %v3261_v47, %v6734_v36  ;;  %v3455_v45 = vadd.f32 %v3454_v39, %v6708_v18  ;;  %v3263_v8 = vpop.f32.mrb[85].mxu0  ;;  %v3456_v2 = vpop.f32.mrb[85].mxu1 }
 0x2a5   : > { %v3264_v34 = vadd.f32 %v3263_v8, %v6736_v22  ;;  %v3457_v29 = vadd.f32 %v3456_v2, %v6711_v4  ;;  %v3265_v25 = vpop.f32.mrb[86].mxu0  ;;  %v3458_v16 = vpop.f32.mrb[86].mxu1 }
 0x2a6   : > { %v3587_v53 = vmax.f32 %v3262_v48, 0.0  ;;  %v3589_v28 = vmax.f32 %v3455_v45, 0.0  ;;  %v3266_v21 = vadd.f32 %v3265_v25, %v6734_v36  ;;  %v3459_v62 = vadd.f32 %v3458_v16, %v6708_v18  ;;  %v3267_v24 = vpop.f32.mrb[87].mxu0  ;;  %v3460_v46 = vpop.f32.mrb[87].mxu1 }
 0x2a7   : > { %v3588_v42 = vmax.f32 %v3264_v34, 0.0  ;;  %v3590_v0 = vmax.f32 %v3457_v29, 0.0  ;;  %v3268_v5 = vadd.f32 %v3267_v24, %v6736_v22  ;;  %v3461_v17 = vadd.f32 %v3460_v46, %v6711_v4 }
 0x2a8   : > { %v3591_v11 = vmax.f32 %v3266_v21, 0.0  ;;  %v3593_v49 = vmax.f32 %v3459_v62, 0.0 }
 0x2a9   : > { %v4894_v13 = vpack.c.bf16 %v3588_v42, %v3587_v53  ;;  %v4895_v56 = vpack.c.bf16 %v3590_v0, %v3589_v28  ;;  %v3592_v35 = vmax.f32 %v3268_v5, 0.0  ;;  %v3594_v63 = vmax.f32 %v3461_v17, 0.0 }
 0x2aa   : > { %v3663_v37 = vpack.c.bf16 %v3591_v11, %v3587_v53  ;;  %v3665_v9 = vpack.c.bf16 %v3593_v49, %v3589_v28 }
 0x2ab   : > { %4047 = vst [vmem:[%s6757_s17 + $0x1a0] sm:$0xff] %v4894_v13  ;;  %4048 = vst [vmem:[%s6757_s17 + $0x1a8] sm:$0xff] %v4895_v56  ;;  %v3664_v6 = vpack.c.bf16 %v3592_v35, %v3588_v42  ;;  %v4896_v57 = vpack.c.bf16 %v3592_v35, %v3591_v11  ;;  %v3666_v7 = vpack.c.bf16 %v3594_v63, %v3590_v0 }
 0x2ac   : > { %v4897_v30 = vpack.c.bf16 %v3594_v63, %v3593_v49 }
 0x2ad   : > { %4049 = vst [vmem:[%s6757_s17 + $0x1b0] sm:$0xff] %v4896_v57  ;;  %4202 = vmatprep.subr.bf16.mxu0 %v3664_v6  ;;  %4243 = vmatprep.subr.bf16.mxu1 %v3666_v7 }
 0x2ae   : > { %4050 = vst [vmem:[%s6757_s17 + $0x1b8] sm:$0xff] %v4897_v30  ;;  %4203 = vmatpush1.bf16.msra.mxu0 %v3663_v37  ;;  %4244 = vmatpush1.bf16.msra.mxu1 %v3665_v9 }
 0x2b3   : > { %v3271_v50 = vpop.f32.mrb[88].mxu0  ;;  %v3464_v10 = vpop.f32.mrb[88].mxu1 }
 0x2b4   : > { %v3272_v27 = vadd.f32 %v3271_v50, %v6734_v36  ;;  %v3465_v52 = vadd.f32 %v3464_v10, %v6708_v18  ;;  %v3273_v15 = vpop.f32.mrb[89].mxu0  ;;  %v3466_v61 = vpop.f32.mrb[89].mxu1 }
 0x2b5   : > { %v3274_v43 = vadd.f32 %v3273_v15, %v6736_v22  ;;  %v3467_v20 = vadd.f32 %v3466_v61, %v6711_v4  ;;  %v3275_v41 = vpop.f32.mrb[90].mxu0  ;;  %v3468_v55 = vpop.f32.mrb[90].mxu1 }
 0x2b6   : > { %v3595_v12 = vmax.f32 %v3272_v27, 0.0  ;;  %v3597_v33 = vmax.f32 %v3465_v52, 0.0  ;;  %v3276_v59 = vadd.f32 %v3275_v41, %v6734_v36  ;;  %v3469_v26 = vadd.f32 %v3468_v55, %v6708_v18  ;;  %v3277_v38 = vpop.f32.mrb[91].mxu0  ;;  %v3470_v19 = vpop.f32.mrb[91].mxu1 }
 0x2b7   : > { %v3596_v1 = vmax.f32 %v3274_v43, 0.0  ;;  %v3598_v44 = vmax.f32 %v3467_v20, 0.0  ;;  %v3278_v54 = vadd.f32 %v3277_v38, %v6736_v22  ;;  %v3471_v60 = vadd.f32 %v3470_v19, %v6711_v4 }
 0x2b8   : > { %v3599_v32 = vmax.f32 %v3276_v59, 0.0  ;;  %v3601_v14 = vmax.f32 %v3469_v26, 0.0 }
 0x2b9   : > { %v4898_v40 = vpack.c.bf16 %v3596_v1, %v3595_v12  ;;  %v4899_v3 = vpack.c.bf16 %v3598_v44, %v3597_v33  ;;  %v3600_v23 = vmax.f32 %v3278_v54, 0.0  ;;  %v3602_v47 = vmax.f32 %v3471_v60, 0.0 }
 0x2ba   : > { %v3667_v39 = vpack.c.bf16 %v3599_v32, %v3595_v12  ;;  %v3669_v48 = vpack.c.bf16 %v3601_v14, %v3597_v33 }
 0x2bb   : > { %4051 = vst [vmem:[%s6757_s17 + $0x1c0] sm:$0xff] %v4898_v40  ;;  %4052 = vst [vmem:[%s6757_s17 + $0x1c8] sm:$0xff] %v4899_v3  ;;  %v3668_v45 = vpack.c.bf16 %v3600_v23, %v3596_v1  ;;  %v4900_v8 = vpack.c.bf16 %v3600_v23, %v3599_v32  ;;  %v3670_v2 = vpack.c.bf16 %v3602_v47, %v3598_v44 }
 0x2bc   : > { %v4901_v34 = vpack.c.bf16 %v3602_v47, %v3601_v14 }
 0x2bd   : > { %4053 = vst [vmem:[%s6757_s17 + $0x1d0] sm:$0xff] %v4900_v8  ;;  %4204 = vmatprep.subr.bf16.mxu0 %v3668_v45  ;;  %4245 = vmatprep.subr.bf16.mxu1 %v3670_v2 }
 0x2be   : > { %4054 = vst [vmem:[%s6757_s17 + $0x1d8] sm:$0xff] %v4901_v34  ;;  %4205 = vmatpush1.bf16.msra.mxu0 %v3667_v39  ;;  %4246 = vmatpush1.bf16.msra.mxu1 %v3669_v48 }
 0x2c3   : > { %v3474_v25 = vpop.f32.mrb[92].mxu1 }
 0x2c4   : > { %v3281_v29 = vpop.f32.mrb[92].mxu0  ;;  %v3475_v53 = vadd.f32 %v3474_v25, %v6708_v18  ;;  %v3476_v21 = vpop.f32.mrb[93].mxu1 }
 0x2c5   : > { %v3282_v16 = vadd.f32 %v3281_v29, %v6734_v36  ;;  %v3283_v28 = vpop.f32.mrb[93].mxu0  ;;  %v3477_v24 = vadd.f32 %v3476_v21, %v6711_v4  ;;  %v3478_v42 = vpop.f32.mrb[94].mxu1 }
 0x2c6   : > { %v3284_v62 = vadd.f32 %v3283_v28, %v6736_v22  ;;  %v3285_v46 = vpop.f32.mrb[94].mxu0  ;;  %v3605_v5 = vmax.f32 %v3475_v53, 0.0  ;;  %v3479_v11 = vadd.f32 %v3478_v42, %v6708_v18  ;;  %v3480_v13 = vpop.f32.mrb[95].mxu1 }
 0x2c7   : > { %v3603_v0 = vmax.f32 %v3282_v16, 0.0  ;;  %v3286_v17 = vadd.f32 %v3285_v46, %v6734_v36  ;;  %v3287_v49 = vpop.f32.mrb[95].mxu0  ;;  %v3606_v35 = vmax.f32 %v3477_v24, 0.0  ;;  %v3481_v37 = vadd.f32 %v3480_v13, %v6711_v4  ;;  %v4136_v4 = vld [vmem:[%s6874_s30] sm:$0xff] }
 0x2c8   : > { %v3604_v56 = vmax.f32 %v3284_v62, 0.0  ;;  %v3288_v63 = vadd.f32 %v3287_v49, %v6736_v22  ;;  %v3609_v6 = vmax.f32 %v3479_v11, 0.0 }
 0x2c9   : > { %v3607_v9 = vmax.f32 %v3286_v17, 0.0  ;;  %v4903_v7 = vpack.c.bf16 %v3606_v35, %v3605_v5  ;;  %v3610_v36 = vmax.f32 %v3481_v37, 0.0 }
 0x2ca   : > { %v4902_v57 = vpack.c.bf16 %v3604_v56, %v3603_v0  ;;  %v3608_v30 = vmax.f32 %v3288_v63, 0.0  ;;  %v3673_v18 = vpack.c.bf16 %v3609_v6, %v3605_v5 }
 0x2cb   : > { %v3671_v50 = vpack.c.bf16 %v3607_v9, %v3603_v0  ;;  %4056 = vst [vmem:[%s6757_s17 + $0x1e8] sm:$0xff] %v4903_v7  ;;  %v3674_v52 = vpack.c.bf16 %v3610_v36, %v3606_v35  ;;  %v4905_v22 = vpack.c.bf16 %v3610_v36, %v3609_v6 }
 0x2cc   : > { %4055 = vst [vmem:[%s6757_s17 + $0x1e0] sm:$0xff] %v4902_v57  ;;  %v3672_v10 = vpack.c.bf16 %v3608_v30, %v3604_v56  ;;  %v4904_v27 = vpack.c.bf16 %v3608_v30, %v3607_v9 }
 0x2cd   : > { %4058 = vst [vmem:[%s6757_s17 + $0x1f8] sm:$0xff] %v4905_v22  ;;  %4247 = vmatprep.subr.bf16.mxu1 %v3674_v52 }
 0x2ce   : > { %4057 = vst [vmem:[%s6757_s17 + $0x1f0] sm:$0xff] %v4904_v27  ;;  %4206 = vmatprep.subr.bf16.mxu0 %v3672_v10  ;;  %4248 = vmatpush1.bf16.msra.mxu1 %v3673_v18 }
 0x2cf   : > { %4207 = vmatpush1.bf16.msra.mxu0 %v3671_v50 }
 0x32b   : > { %v4144_v15 = vpop.xlane.xlu0 %4143 }
 0x32c   : > { %v4145_v61 = vmax.f32 %v4136_v4, %v4144_v15 }
 0x32e   : > { %v4146_v43 = vsub.f32 %v4136_v4, %v4145_v61  ;;  %4263 = vst.msk [vmem:[%s6874_s30] sm:$0xff] %vm4129_vm0, %v4145_v61  ;;  %4151 = vperm.xlu1 %5092, %v4145_v61   ;;  %s4275_s30 = scalar_lea.sflag [#allocation6], %s7063_s27 }
 0x330   : > { %v4147_v20 = vmul.f32 1.442695, %v4146_v43 }
 0x332   : > { %5128 = vpow2.f32 %v4147_v20 }
 0x33c   : > { %v7056_v41 = vpop.eup %5128 }
 0x33d   : > { %4167 = vperm.xlu0 %5093, %v7056_v41  }
 0x3ad   : > { %v4152_v55 = vpop.permute.xlu1 %4151 }
 0x3ae   : > { %v4154_v12 = vsub.f32 %v6951_v31, %v4152_v55  ;;  %v4155_v33 = vsub.f32 %v6996_v58, %v4152_v55 }
 0x3b0   : > { %v4156_v59 = vmul.f32 1.442695, %v4154_v12  ;;  %v4158_v26 = vmul.f32 1.442695, %v4155_v33 }
 0x3b2   : > { %5130 = vpow2.f32 %v4156_v59 }
 0x3b3   : > { %5132 = vpow2.f32 %v4158_v26 }
 0x3bc   : > { %v5131_v38 = vpop.eup %5130 }
 0x3bd   : > { %v5133_v19 = vpop.eup %5132  ;;  %v4174_v51 = vpack.c.bf16 %v5131_v38, %v5131_v38 }
 0x3be   : > { %v4175_v1 = vpack.c.bf16 %v5133_v19, %v5133_v19  ;;  %v4161_v44 = vadd.f32 %v5133_v19, %v5131_v38 }
 0x3c0   : > { %4208 = vmatprep.mubr.bf16.mxu0 %v4175_v1  ;;  %4249 = vmatprep.mubr.bf16.mxu1 %v4175_v1 }
 0x3c1   : > { %4162 = vadd.xlane.f32.xlu1 %v4161_v44  ;;  %4209 = vmatmul.mubr.bf16.vlgmr.msra.gmra.mrb[96].mxu0 %v4174_v51 }
 0x3c2   : > { %4250 = vmatmul.mubr.bf16.vlgmr.msra.gmra.mrb[96].mxu1 %v4174_v51 }
 0x3c3   : > { %5147 = shalt.err (!%p5144_p5)
}
 0x3c4   : > { %s5148_s17 = scalar_lea.hbm %s7069_s23, 8192  ;;  %s5152_s14 = scalar_lea.hbm %s7193_s9, 16384 }
 0x3c5   : > { %p5149_p6 = scmp.ne.s32.totalorder %s7069_s23, %s5148_s17  ;;  %p5153_p10 = scmp.lt.u32.totalorder %s7069_s23, %s7193_s9 }
 0x3c6   : > { %p5154_p11 = scmp.lt.u32.totalorder %s5152_s14, %s5148_s17  ;;  %p5156_p13 = scmp.lt.u32.totalorder %s5148_s17, %s7069_s23 }
 0x3c7   : > { %p5150_p7 = pnand %p5149_p6, %p5396_p4 }
 0x3c8   : > { %p5155_p12 = por %p5154_p11, %p5153_p10 }
 0x3c9   : > { %p5151_p9 = pneg %p5150_p7 }
 0x3ca   : > { %p5157_p0 = por %p5156_p13, %p5155_p12 }
 0x3cc   : > { %p5158_p1 = pnand %p5157_p0, %p5151_p9 }
 0x3ce   : > { %5161 = shalt.err (!%p5158_p1)
}
 0x3cf   : > { %s5286_s2 = smov 256   ;;  %s4906_s19 = sshll.u32 %s5264_s24, 8 }
 0x3d0   : > { %5016 = dma.vmem_to_hbm [thread:$0]  (%p5396_p4), %s7072_s16, 8192, %s7069_s23, %s4275_s30, %s5286_s2, %s5286_s2, %s7239_s20  }
 0x3d1   : > { %s4311_s28 = sshll.u32 %s6954_s4, 4  ;;  %s7104_s14 = scalar_lea.hbm %s7192_s8, %s4906_s19  ;;  %s4312_s28 = int_to_ptr.vmem [resolvable:$true] %s4311_s28 }
 0x3d2   : > { %s4270_s29 = scalar_lea.sflag [#allocation4], %s6740_s25  ;;  %s5162_s0 = scalar_lea.vmem %s4312_s28, 256 }
 0x3d3   : > { %p5163_p2 = scmp.ne.s32.totalorder %s4312_s28, %s5162_s0  ;;  %s5287_s3 = smov [#allocation3]  }
 0x3d4   : > { %s5166_s5 = sshll.u32 %s5287_s3, 4  ;;  %s5167_s5 = int_to_ptr.vmem [resolvable:$false] %s5166_s5 }
 0x3d5   : > { %p5164_p3 = pnand %p5163_p2, %p5396_p4  ;;  %s5168_s6 = scalar_lea.vmem %s5167_s5, 512 }
 0x3d6   : > { %p5169_p6 = scmp.lt.s32.totalorder %s4312_s28, %s5167_s5  ;;  %p5170_p7 = scmp.lt.s32.totalorder %s5168_s6, %s5162_s0 }
 0x3d7   : > { %p5165_p5 = pneg %p5164_p3 }
 0x3d8   : > { %p5171_p9 = por %p5170_p7, %p5169_p6 }
 0x3da   : > { %p5172_p10 = pnand %p5171_p9, %p5165_p5 }
 0x3dc   : > { %5175 = shalt.err (!%p5172_p10)
}
 0x3dd   : > { %s5176_s20 = scalar_lea.hbm %s7104_s14, 256  ;;  %s5180_s3 = scalar_lea.hbm %s7192_s8, 512 }
 0x3de   : > { %p5177_p11 = scmp.ne.s32.totalorder %s7104_s14, %s5176_s20  ;;  %p5181_p0 = scmp.lt.u32.totalorder %s7104_s14, %s7192_s8 }
 0x3df   : > { %p5182_p1 = scmp.lt.u32.totalorder %s5180_s3, %s5176_s20  ;;  %p5184_p3 = scmp.lt.u32.totalorder %s5176_s20, %s7104_s14 }
 0x3e0   : > { %p5178_p12 = pnand %p5177_p11, %p5396_p4 }
 0x3e1   : > { %p5183_p2 = por %p5182_p1, %p5181_p0 }
 0x3e2   : > { %p5179_p13 = pneg %p5178_p12 }
 0x3e3   : > { %p5185_p5 = por %p5184_p3, %p5183_p2 }
 0x3e5   : > { %p5186_p6 = pnand %p5185_p5, %p5179_p13 }
 0x3e7   : > { %5189 = shalt.err (!%p5186_p6)
}
 0x3e8   : > { %5015 = dma.vmem_to_hbm [thread:$0]  (%p5396_p4), %s4312_s28, 256, %s7104_s14, %s4270_s29   ;;  %v4137_v31 = vld [vmem:[%s7029_s1] sm:$0xff]  ;;  %v4168_v32 = vpop.permute.xlu0 %4167 }
 0x3e9   : > { %v4160_v58 = vmul.f32 %v7056_v41, %v4137_v31  ;;  %s4594_s6 = sshll.u32 %s6740_s25, 5  ;;  %v4170_v14 = vmul.f32 0.0, %v4168_v32  ;;  %s4908_s2 = sshll.u32 %s5264_s24, 9 }
 0x3ea   : > { %s505_s19 = scalar_lea.vmem [#allocation7], %s4594_s6  ;;  %s7133_s28 = scalar_lea.hbm %s7194_s10, %s4908_s2 }
 0x3eb   : > { %s4347_s18 = sshll.u32 %s505_s19, 4  ;;  %s5288_s17 = smov [#allocation7]   ;;  %s7135_s18 = int_to_ptr.vmem [resolvable:$true] %s4347_s18 }
 0x3ec   : > { %s5190_s24 = scalar_lea.vmem %s7135_s18, 512  ;;  %s5194_s14 = sshll.u32 %s5288_s17, 4  ;;  %s5195_s14 = int_to_ptr.vmem [resolvable:$false] %s5194_s14 }
 0x3ed   : > { %p5191_p7 = scmp.ne.s32.totalorder %s7135_s18, %s5190_s24  ;;  %s5196_s29 = scalar_lea.vmem %s5195_s14, 1024 }
 0x3ee   : > { %p5197_p11 = scmp.lt.s32.totalorder %s7135_s18, %s5195_s14  ;;  %p5198_p12 = scmp.lt.s32.totalorder %s5196_s29, %s5190_s24 }
 0x3ef   : > { %p5192_p9 = pnand %p5191_p7, %p5396_p4 }
 0x3f0   : > { %p5199_p13 = por %p5198_p12, %p5197_p11 }
 0x3f1   : > { %p5193_p10 = pneg %p5192_p9 }
 0x3f3   : > { %p5200_p0 = pnand %p5199_p13, %p5193_p10 }
 0x44e   : > { %v4163_v54 = vpop.xlane.xlu1 %4162 }
 0x44f   : > { %v4164_v60 = vadd.f32 %v4163_v54, %v4160_v58 }
 0x451   : > { %4264 = vst.msk [vmem:[%s7029_s1] sm:$0xff] %vm4129_vm0, %v4164_v60 }
 0x494   : > { %v4210_v40 = vpop.f32.mrb[96].mxu0 }
 0x495   : > { %v4258_v3 = vadd.f32 %v4210_v40, %v4170_v14  ;;  %v4251_v23 = vpop.f32.mrb[96].mxu1  ;;  %v4212_v47 = vpop.f32.mrb[97].mxu0 }
 0x496   : > { %v4260_v39 = vadd.f32 %v4251_v23, %v4170_v14  ;;  %v4259_v48 = vadd.f32 %v4212_v47, %v4170_v14  ;;  %v4253_v45 = vpop.f32.mrb[97].mxu1  ;;  %v4214_v8 = vpop.f32.mrb[98].mxu0 }
 0x497   : > { %4265 = vst [vmem:[%s505_s19] sm:$0xff] %v4258_v3  ;;  %v4261_v2 = vadd.f32 %v4253_v45, %v4170_v14  ;;  %v4255_v34 = vpop.f32.mrb[98].mxu1  ;;  %v4215_v29 = vpop.f32.mrb[99].mxu0 }
 0x498   : > { %4267 = vst [vmem:[%s505_s19 + $0x10] sm:$0xff] %v4260_v39  ;;  %4266 = vst [vmem:[%s505_s19 + $0x8] sm:$0xff] %v4259_v48  ;;  %v4256_v25 = vpop.f32.mrb[99].mxu1 }
 0x499   : > { %4268 = vst [vmem:[%s505_s19 + $0x18] sm:$0xff] %v4261_v2 }
 0x49a   : > { %5203 = shalt.err (!%p5200_p0)
}
 0x49b   : > { %s5204_s0 = scalar_lea.hbm %s7133_s28, 512  ;;  %s5208_s23 = scalar_lea.hbm %s7194_s10, 1024 }
 0x49c   : > { %p5205_p1 = scmp.ne.s32.totalorder %s7133_s28, %s5204_s0  ;;  %p5209_p5 = scmp.lt.u32.totalorder %s7133_s28, %s7194_s10 }
 0x49d   : > { %p5210_p6 = scmp.lt.u32.totalorder %s5208_s23, %s5204_s0  ;;  %p5212_p9 = scmp.lt.u32.totalorder %s5204_s0, %s7133_s28 }
 0x49e   : > { %p5206_p2 = pnand %p5205_p1, %p5396_p4 }
 0x49f   : > { %p5211_p7 = por %p5210_p6, %p5209_p5 }
 0x4a0   : > { %p5207_p3 = pneg %p5206_p2 }
 0x4a1   : > { %p5213_p10 = por %p5212_p9, %p5211_p7 }
 0x4a3   : > { %p5214_p11 = pnand %p5213_p10, %p5207_p3 }
 0x4a5   : > { %5217 = shalt.err (!%p5214_p11)
}
 0x4a6   : > { %5017 = dma.vmem_to_hbm [thread:$0]  (%p5396_p4), %s7135_s18, 512, %s7133_s28, %s4275_s30  }
 0x4a7 PF: > { %p5031_p12 = scmp.ge.s32.totalorder %s5272_s26, 2  ;;  %s4365_s5 = sand.u32 1, %s5252_s21  }
 0x4a8   : > { %s4366_s6 = scalar_lea.sflag [#allocation4], %s4365_s5 }
 0x4a9   : > { %p5022_p13 = pnand %p5031_p12, %p5405_p8 }
 0x4ab   : > { %5243 = dma.done.wait (!%p5022_p13), %s4366_s6, 256  }
 0x4ac   : > { %5245 = vsyncadd (!%p5022_p13), %s4366_s6, 4294967040  ;;  %s7251_s2 = sadd.s32 4294967294, %s5272_s26  }
 0x4ad   : > { %s4374_s19 = sand.u32 1, %s7251_s2  }
 0x4ae   : > { %s4375_s13 = scalar_lea.sflag [#allocation6], %s4374_s19 }
 0x4af   : > { %5247 = dma.done.wait (!%p5022_p13), %s4375_s13, 8704  }
 0x4b0   : > { %5249 = vsyncadd (!%p5022_p13), %s4375_s13, 4294958592  ;;  %s29_s26 = sadd.s32 1, %s5272_s26   ;;  %s7252_s27 = sld [smem:[#allocation10_spill]] }
 0x4b1   : > { %p26_p4 = scmp.ge.s32.totalorder %s29_s26, 4   ;;  %s7253_s23 = sld [smem:[#allocation13_spill]] }
 0x4b2   : > { %s7254_s24 = sld [smem:[#allocation11_spill]]  ;;  %s7255_s25 = sld [smem:[#allocation12_spill]] }
 0x4b3   : > { %s7256_s21 = smov %s5256_s22  ;;  %28 = sbr.rel (!%p26_p4) target bundleno = 14 (0xe), region = 152 }
 0x4b6   : > { %s7257_s22 = smov %s7252_s27 }
 0x4ba   :  { %4409 = vsyncpa [#allocation4], 1 }
 0x4bb   :  { %4411 = vsyncpa [#allocation4 + $0x1], 1 }
 0x4bc   :  { %4412 = vsyncpa [#allocation6], 1 }
 0x4bd   :  { %4414 = vsyncpa [#allocation6 + $0x1], 1 }

</bundles_post_ra>
